<compile_context>
chip_gen: v6e
topology: v6e:2x2x1
jax: 0.10.0
libtpu: 0.0.40
codegen_flags: <defaults>
</compile_context>

<pallas_src>
import functools

import jax
import jax.numpy as jnp
from jax.experimental import pallas as pl
from jax.experimental.pallas import tpu as pltpu


def _round_up(x, m):
    return (x + m - 1) // m * m


# ---------------------------------------------------------------------------
# Fused VectorQuantizer kernel
# ---------------------------------------------------------------------------
def _vq_kernel(x_ref, e_ref, q_ref, enc_ref, stats_ref, enc_acc, sq_acc, *,
               n_valid, commitment_cost):
    """One row-tile of the VQ forward.

    x_ref   : (T, D)   flattened inputs (rows may include zero padding)
    e_ref   : (Ne, D)  codebook (resident, constant index_map)
    q_ref   : (T, D)   quantized rows (one-hot @ codebook)
    enc_ref : (T, Ne)  one-hot encodings
    stats_ref : (1, 128) lane-dense scalar pack: [vq_loss, perplexity, 0...]
    enc_acc : (1, Ne)  VMEM scratch — running column-sum of one-hots
    sq_acc  : (1, D)   VMEM scratch — running per-feature squared error
    """
    i = pl.program_id(0)
    n_prog = pl.num_programs(0)
    tile, d = x_ref.shape
    n_emb = e_ref.shape[0]

    @pl.when(i == 0)
    def _init():
        enc_acc[...] = jnp.zeros_like(enc_acc)
        sq_acc[...] = jnp.zeros_like(sq_acc)

    x = x_ref[...]                                       # (T, D) f32
    e = e_ref[...]                                       # (Ne, D) f32

    # ||x||^2 + ||e||^2 - 2 x.e   (MXU for the cross term)
    x2 = jnp.sum(x * x, axis=1, keepdims=True)           # (T, 1)
    e2 = jnp.sum(e * e, axis=1)                          # (Ne,)
    xe = jnp.einsum("nd,kd->nk", x, e,
                    preferred_element_type=jnp.float32)  # (T, Ne)
    dist = x2 + e2[None, :] - 2.0 * xe                   # (T, Ne)

    # argmin with first-index tie-breaking (matches torch.argmin), as one-hot.
    ids = jax.lax.broadcasted_iota(jnp.int32, dist.shape, 1)
    dmin = jnp.min(dist, axis=1, keepdims=True)
    idx = jnp.min(jnp.where(dist <= dmin, ids, n_emb), axis=1, keepdims=True)
    enc = (ids == idx).astype(jnp.float32)               # (T, Ne)

    quant = jnp.dot(enc, e, preferred_element_type=jnp.float32)  # (T, D)

    enc_ref[...] = enc
    q_ref[...] = quant

    # Statistics accumulation — mask out padded rows (global row >= n_valid).
    row = i * tile + jax.lax.broadcasted_iota(jnp.int32, (tile, 1), 0)
    valid = (row < n_valid).astype(jnp.float32)          # (T, 1)
    enc_acc[...] += jnp.sum(enc * valid, axis=0, keepdims=True)
    sq_acc[...] += jnp.sum(((quant - x) ** 2) * valid, axis=0, keepdims=True)

    @pl.when(i == n_prog - 1)
    def _finalize():
        inv_n = 1.0 / float(n_valid)
        avg = enc_acc[...] * inv_n                       # (1, Ne) avg_probs
        mse = jnp.sum(sq_acc[...], axis=1, keepdims=True) * (inv_n / float(d))
        # e_latent_loss == q_latent_loss in the forward pass (detach() only
        # changes gradients).
        vq_loss = mse + commitment_cost * mse            # (1, 1)
        ppl = jnp.exp(-jnp.sum(avg * jnp.log(avg + 1e-10),
                               axis=1, keepdims=True))   # (1, 1)
        lane = jax.lax.broadcasted_iota(jnp.int32, stats_ref.shape, 1)
        stats_ref[...] = (jnp.where(lane == 0, vq_loss, 0.0)
                          + jnp.where(lane == 1, ppl, 0.0))


# ---------------------------------------------------------------------------
# Module wrapper: VectorQuantizer.forward
# ---------------------------------------------------------------------------
def vq_quantizer_forward(x, embedding, commitment_cost=0.25, tile_n=128):
    """VectorQuantizer forward.

    x          : (B, embedding_dim, L) float32 — same NCW layout as the module.
    embedding  : (num_embeddings, embedding_dim) float32 codebook.
    Returns (vq_loss, quantized (B, embedding_dim, L), perplexity,
             encodings (B*L, num_embeddings)), matching the PyTorch module.
    """
    B, D, L = x.shape
    n_emb, d_emb = embedding.shape
    assert d_emb == D, "embedding_dim mismatch"

    # inputs.permute(0, 2, 1).contiguous().view(-1, D) — part of the op itself.
    inputs = jnp.transpose(x, (0, 2, 1))                 # (B, L, D)
    flat = inputs.reshape(B * L, D)
    n = B * L

    # Row tiling: multiple of 8 sublanes; pad N up to a tile multiple.
    tile = tile_n if n > tile_n else _round_up(n, 8)
    n_pad = _round_up(n, tile)
    flat_in = jnp.pad(flat, ((0, n_pad - n), (0, 0))) if n_pad != n else flat
    grid = (n_pad // tile,)

    kernel = functools.partial(_vq_kernel, n_valid=n,
                               commitment_cost=float(commitment_cost))

    out_shape = (
        jax.ShapeDtypeStruct((n_pad, D), jnp.float32),       # quantized (flat)
        jax.ShapeDtypeStruct((n_pad, n_emb), jnp.float32),   # one-hot encodings
        jax.ShapeDtypeStruct((1, 128), jnp.float32),         # [vq_loss, ppl, ...]
    )

    grid_spec = pltpu.PrefetchScalarGridSpec(
        num_scalar_prefetch=0,
        grid=grid,
        in_specs=[
            pl.BlockSpec((tile, D), lambda i: (i, 0)),       # input rows
            pl.BlockSpec((n_emb, D), lambda i: (0, 0)),      # codebook (resident)
        ],
        out_specs=(
            pl.BlockSpec((tile, D), lambda i: (i, 0)),
            pl.BlockSpec((tile, n_emb), lambda i: (i, 0)),
            pl.BlockSpec((1, 128), lambda i: (0, 0)),
        ),
        scratch_shapes=[
            pltpu.VMEM((1, n_emb), jnp.float32),             # one-hot column sums
            pltpu.VMEM((1, D), jnp.float32),                 # squared-error sums
        ],
    )

    q_flat, encodings, stats = pl.pallas_call(
        kernel,
        out_shape=out_shape,
        grid_spec=grid_spec,
        # The single grid axis carries the statistics reduction -> arbitrary.
        compiler_params=pltpu.CompilerParams(
            dimension_semantics=("arbitrary",)),
    )(flat_in, embedding)

    q_flat = q_flat[:n]
    encodings = encodings[:n]

    quantized = q_flat.reshape(B, L, D)
    # Straight-through estimator: forward value is unchanged.
    # TODO(synk): training would need a custom_vjp to reproduce the detach()
    # gradient semantics; this is a forward-only implementation.
    quantized = inputs + (quantized - inputs)
    quantized = jnp.transpose(quantized, (0, 2, 1))      # back to (B, D, L)

    vq_loss = stats[0, 0]
    perplexity = stats[0, 1]
    return vq_loss, quantized, perplexity, encodings


# ---------------------------------------------------------------------------
# Pure-JAX reference (for correctness check)
# ---------------------------------------------------------------------------
def _vq_reference(x, emb, commitment_cost):
    inputs = jnp.transpose(x, (0, 2, 1))
    flat = inputs.reshape(-1, emb.shape[1])
    dist = (jnp.sum(flat ** 2, axis=1, keepdims=True)
            + jnp.sum(emb ** 2, axis=1)[None, :]
            - 2.0 * jnp.matmul(flat, emb.T, precision=jax.lax.Precision.HIGHEST))
    idx = jnp.argmin(dist, axis=1)
    enc = jax.nn.one_hot(idx, emb.shape[0], dtype=jnp.float32)
    quant = emb[idx].reshape(inputs.shape)
    mse = jnp.mean((quant - inputs) ** 2)
    loss = mse + commitment_cost * mse
    quant_st = inputs + (quant - inputs)
    avg = jnp.mean(enc, axis=0)
    ppl = jnp.exp(-jnp.sum(avg * jnp.log(avg + 1e-10)))
    return loss, jnp.transpose(quant_st, (0, 2, 1)), ppl, enc


if __name__ == "__main__":
    key = jax.random.PRNGKey(0)
    k_emb, k_idx, k_noise, k_idx2, k_noise2 = jax.random.split(key, 5)

    num_embeddings, embedding_dim, commitment_cost = 512, 64, 0.25

    # A well-separated "trained" codebook; demo inputs are codebook rows plus
    # small noise so the nearest-code assignment is unambiguous and the
    # pure-JAX reference comparison is not precision-flaky.
    emb = jax.random.uniform(k_emb, (num_embeddings, embedding_dim),
                             jnp.float32, -0.5, 0.5)

    def make_input(kidx, knoise, batch, length):
        ids = jax.random.randint(kidx, (batch * length,), 0, num_embeddings)
        rows = emb[ids] + 0.05 * jax.random.normal(
            knoise, (batch * length, embedding_dim), jnp.float32)
        return rows.reshape(batch, length, embedding_dim).transpose(0, 2, 1)

    fwd = jax.jit(functools.partial(vq_quantizer_forward,
                                    commitment_cost=commitment_cost))

    # Config 1: N = B*L = 512 -> four 128-row tiles (pipelined, accumulator-
    # carrying grid).
    B, L = 4, 128
    x = make_input(k_idx, k_noise, B, L)
    vq_loss, quantized, perplexity, encodings = fwd(x, emb)
    jax.block_until_ready((vq_loss, quantized, perplexity, encodings))

    r_loss, r_q, r_ppl, r_enc = _vq_reference(x, emb, commitment_cost)
    assert quantized.shape == (B, embedding_dim, L)
    assert encodings.shape == (B * L, num_embeddings)
    assert bool(jnp.array_equal(encodings, r_enc)), "encodings mismatch"
    assert bool(jnp.allclose(quantized, r_q, atol=2e-3, rtol=1e-3))
    assert bool(jnp.allclose(vq_loss, r_loss, rtol=2e-2, atol=1e-6))
    assert bool(jnp.allclose(perplexity, r_ppl, rtol=1e-3))

    # Config 2: N = 44 (pads to one 48-row tile; exercises the row mask that
    # keeps padded rows out of the loss / perplexity statistics).
    B2, L2 = 2, 22
    x2 = make_input(k_idx2, k_noise2, B2, L2)
    out2 = fwd(x2, emb)
    jax.block_until_ready(out2)
    r2 = _vq_reference(x2, emb, commitment_cost)
    assert out2[1].shape == (B2, embedding_dim, L2)
    assert out2[3].shape == (B2 * L2, num_embeddings)
    assert bool(jnp.array_equal(out2[3], r2[3]))
    assert bool(jnp.allclose(out2[1], r2[1], atol=2e-3, rtol=1e-3))
    assert bool(jnp.allclose(out2[0], r2[0], rtol=2e-2, atol=1e-6))
    assert bool(jnp.allclose(out2[2], r2[2], rtol=1e-3))

    print("KERNEL_OK")
</pallas_src>

<mosaic_0001>
module attributes {stable_mosaic.version = 11 : i64} {
  func.func @_vq_kernel(%arg0: i32, %arg1: memref<128x64xf32, #tpu.memory_space<vmem>>, %arg2: memref<512x64xf32, #tpu.memory_space<vmem>>, %arg3: memref<128x64xf32, #tpu.memory_space<vmem>>, %arg4: memref<128x512xf32, #tpu.memory_space<vmem>>, %arg5: memref<1x128xf32, #tpu.memory_space<vmem>>, %arg6: memref<1x512xf32, #tpu.memory_space<vmem>>, %arg7: memref<1x64xf32, #tpu.memory_space<vmem>>) attributes {dimension_semantics = [#tpu.dimension_semantics<arbitrary>], iteration_bounds = array<i64: 4>, scalar_prefetch = 0 : i64, scratch_operands = 2 : i64, tpu.core_type = #tpu.core_type<tc>, window_params = [{transform_indices = @transform_0, window_bounds = array<i64: 128, 64>}, {pipeline_mode = #tpu.pipeline_mode<synchronous>, transform_indices = @transform_1, window_bounds = array<i64: 512, 64>}, {transform_indices = @transform_2, window_bounds = array<i64: 128, 64>}, {transform_indices = @transform_3, window_bounds = array<i64: 128, 512>}, {pipeline_mode = #tpu.pipeline_mode<synchronous>, transform_indices = @transform_4, window_bounds = array<i64: 1, 128>}]} {
    %c0_i32 = arith.constant 0 : i32
    %0 = arith.cmpi eq, %arg0, %c0_i32 : i32
    %1 = arith.extui %0 : i1 to i32
    %c0_i32_0 = arith.constant 0 : i32
    %2 = arith.cmpi ne, %1, %c0_i32_0 : i32
    scf.if %2 {
      %cst_26 = arith.constant 0.000000e+00 : f32
      %61 = vector.broadcast %cst_26 : f32 to vector<1x512xf32>
      %c0_27 = arith.constant 0 : index
      %c0_28 = arith.constant 0 : index
      %62 = vector.load %arg6[%c0_27, %c0_28] : memref<1x512xf32, #tpu.memory_space<vmem>>, vector<1x512xf32>
      tpu.vector_store %arg6[%c0_27, %c0_28], %61 {strides = array<i32>} : memref<1x512xf32, #tpu.memory_space<vmem>>, vector<1x512xf32>,
      %cst_29 = arith.constant 0.000000e+00 : f32
      %63 = vector.broadcast %cst_29 : f32 to vector<1x64xf32>
      %c0_30 = arith.constant 0 : index
      %c0_31 = arith.constant 0 : index
      %64 = vector.load %arg7[%c0_30, %c0_31] : memref<1x64xf32, #tpu.memory_space<vmem>>, vector<1x64xf32>
      tpu.vector_store %arg7[%c0_30, %c0_31], %63 {strides = array<i32>} : memref<1x64xf32, #tpu.memory_space<vmem>>, vector<1x64xf32>,
    } else {
    }
    %c0 = arith.constant 0 : index
    %c0_1 = arith.constant 0 : index
    %3 = vector.load %arg1[%c0, %c0_1] : memref<128x64xf32, #tpu.memory_space<vmem>>, vector<128x64xf32>
    %c0_2 = arith.constant 0 : index
    %c0_3 = arith.constant 0 : index
    %4 = vector.load %arg2[%c0_2, %c0_3] : memref<512x64xf32, #tpu.memory_space<vmem>>, vector<512x64xf32>
    %5 = arith.mulf %3, %3 : vector<128x64xf32>
    %cst = arith.constant dense<0.000000e+00> : vector<128xf32>
    %6 = vector.multi_reduction <add>, %5, %cst [1] : vector<128x64xf32> to vector<128xf32>
    %7 = vector.shape_cast %6 : vector<128xf32> to vector<128x1xf32>
    %8 = arith.mulf %4, %4 : vector<512x64xf32>
    %cst_4 = arith.constant dense<0.000000e+00> : vector<512xf32>
    %9 = vector.multi_reduction <add>, %8, %cst_4 [1] : vector<512x64xf32> to vector<512xf32>
    "tpu.trace_start"() <{level = 10 : i32, message = "nd,kd->nk"}> : () -> ()
    %cst_5 = arith.constant dense<0.000000e+00> : vector<128x512xf32>
    %10 = tpu.matmul %3, %4, %cst_5 {dimension_numbers = #tpu.dot_dimension_numbers<[1], [1], [0], [0], [0, 0, 1, 0], [], []>} : vector<128x64xf32>, vector<512x64xf32>, vector<128x512xf32> -> vector<128x512xf32>
    "tpu.trace_stop"() : () -> ()
    %11 = vector.shape_cast %9 : vector<512xf32> to vector<1x512xf32>
    %12 = vector.broadcast %7 : vector<128x1xf32> to vector<128x512xf32>
    %13 = vector.broadcast %11 : vector<1x512xf32> to vector<128x512xf32>
    %14 = arith.addf %12, %13 : vector<128x512xf32>
    %cst_6 = arith.constant 2.000000e+00 : f32
    %15 = vector.broadcast %cst_6 : f32 to vector<128x512xf32>
    %16 = arith.mulf %15, %10 : vector<128x512xf32>
    %17 = arith.subf %14, %16 : vector<128x512xf32>
    %18 = tpu.iota {dimensions = array<i32: 1>} : vector<128x512xi32>
    %cst_7 = arith.constant dense<0x7F800000> : vector<128xf32>
    %19 = vector.multi_reduction <minimumf>, %17, %cst_7 [1] : vector<128x512xf32> to vector<128xf32>
    %20 = vector.shape_cast %19 : vector<128xf32> to vector<128x1xf32>
    %21 = vector.broadcast %20 : vector<128x1xf32> to vector<128x512xf32>
    %22 = arith.cmpf ole, %17, %21 : vector<128x512xf32>
    %c512_i32 = arith.constant 512 : i32
    %23 = vector.broadcast %c512_i32 : i32 to vector<128x512xi32>
    %24 = arith.select %22, %18, %23 : vector<128x512xi1>, vector<128x512xi32>
    %cst_8 = arith.constant dense<2147483647> : vector<128xi32>
    %25 = vector.multi_reduction <minsi>, %24, %cst_8 [1] : vector<128x512xi32> to vector<128xi32>
    %26 = vector.shape_cast %25 : vector<128xi32> to vector<128x1xi32>
    %27 = vector.broadcast %26 : vector<128x1xi32> to vector<128x512xi32>
    %28 = arith.cmpi eq, %18, %27 : vector<128x512xi32>
    %29 = arith.extui %28 : vector<128x512xi1> to vector<128x512xi32>
    %30 = arith.sitofp %29 : vector<128x512xi32> to vector<128x512xf32>
    %cst_9 = arith.constant dense<0.000000e+00> : vector<128x64xf32>
    %31 = tpu.matmul %30, %4, %cst_9 {dimension_numbers = #tpu.dot_dimension_numbers<[1], [0], [0], [1], [0, 0, 1, 1], [], []>} : vector<128x512xf32>, vector<512x64xf32>, vector<128x64xf32> -> vector<128x64xf32>
    %c0_10 = arith.constant 0 : index
    %c0_11 = arith.constant 0 : index
    %32 = vector.load %arg4[%c0_10, %c0_11] : memref<128x512xf32, #tpu.memory_space<vmem>>, vector<128x512xf32>
    tpu.vector_store %arg4[%c0_10, %c0_11], %30 {strides = array<i32>} : memref<128x512xf32, #tpu.memory_space<vmem>>, vector<128x512xf32>,
    %c0_12 = arith.constant 0 : index
    %c0_13 = arith.constant 0 : index
    %33 = vector.load %arg3[%c0_12, %c0_13] : memref<128x64xf32, #tpu.memory_space<vmem>>, vector<128x64xf32>
    tpu.vector_store %arg3[%c0_12, %c0_13], %31 {strides = array<i32>} : memref<128x64xf32, #tpu.memory_space<vmem>>, vector<128x64xf32>,
    %c128_i32 = arith.constant 128 : i32
    %34 = arith.muli %arg0, %c128_i32 : i32
    %35 = tpu.iota {dimensions = array<i32: 0>} : vector<128x1xi32>
    %36 = vector.broadcast %34 : i32 to vector<128x1xi32>
    %37 = arith.addi %36, %35 : vector<128x1xi32>
    %c512_i32_14 = arith.constant 512 : i32
    %38 = vector.broadcast %c512_i32_14 : i32 to vector<128x1xi32>
    %39 = arith.cmpi slt, %37, %38 : vector<128x1xi32>
    %40 = arith.extui %39 : vector<128x1xi1> to vector<128x1xi32>
    %41 = arith.sitofp %40 : vector<128x1xi32> to vector<128x1xf32>
    %c0_15 = arith.constant 0 : index
    %c0_16 = arith.constant 0 : index
    %42 = vector.load %arg6[%c0_15, %c0_16] : memref<1x512xf32, #tpu.memory_space<vmem>>, vector<1x512xf32>
    %43 = vector.broadcast %41 : vector<128x1xf32> to vector<128x512xf32>
    %44 = arith.mulf %30, %43 : vector<128x512xf32>
    %cst_17 = arith.constant dense<0.000000e+00> : vector<512xf32>
    %45 = vector.multi_reduction <add>, %44, %cst_17 [0] : vector<128x512xf32> to vector<512xf32>
    %46 = vector.shape_cast %45 : vector<512xf32> to vector<1x512xf32>
    %47 = arith.addf %42, %46 : vector<1x512xf32>
    %c0_18 = arith.constant 0 : index
    %c0_19 = arith.constant 0 : index
    %48 = vector.load %arg6[%c0_18, %c0_19] : memref<1x512xf32, #tpu.memory_space<vmem>>, vector<1x512xf32>
    tpu.vector_store %arg6[%c0_18, %c0_19], %47 {strides = array<i32>} : memref<1x512xf32, #tpu.memory_space<vmem>>, vector<1x512xf32>,
    %c0_20 = arith.constant 0 : index
    %c0_21 = arith.constant 0 : index
    %49 = vector.load %arg7[%c0_20, %c0_21] : memref<1x64xf32, #tpu.memory_space<vmem>>, vector<1x64xf32>
    %50 = arith.subf %31, %3 : vector<128x64xf32>
    %51 = arith.mulf %50, %50 : vector<128x64xf32>
    %52 = vector.broadcast %41 : vector<128x1xf32> to vector<128x64xf32>
    %53 = arith.mulf %51, %52 : vector<128x64xf32>
    %cst_22 = arith.constant dense<0.000000e+00> : vector<64xf32>
    %54 = vector.multi_reduction <add>, %53, %cst_22 [0] : vector<128x64xf32> to vector<64xf32>
    %55 = vector.shape_cast %54 : vector<64xf32> to vector<1x64xf32>
    %56 = arith.addf %49, %55 : vector<1x64xf32>
    %c0_23 = arith.constant 0 : index
    %c0_24 = arith.constant 0 : index
    %57 = vector.load %arg7[%c0_23, %c0_24] : memref<1x64xf32, #tpu.memory_space<vmem>>, vector<1x64xf32>
    tpu.vector_store %arg7[%c0_23, %c0_24], %56 {strides = array<i32>} : memref<1x64xf32, #tpu.memory_space<vmem>>, vector<1x64xf32>,
    %c3_i32 = arith.constant 3 : i32
    %58 = arith.cmpi eq, %arg0, %c3_i32 : i32
    %59 = arith.extui %58 : i1 to i32
    %c0_i32_25 = arith.constant 0 : i32
    %60 = arith.cmpi ne, %59, %c0_i32_25 : i32
    scf.if %60 {
      %c0_26 = arith.constant 0 : index
      %c0_27 = arith.constant 0 : index
      %61 = vector.load %arg6[%c0_26, %c0_27] : memref<1x512xf32, #tpu.memory_space<vmem>>, vector<1x512xf32>
      %cst_28 = arith.constant 0.001953125 : f32
      %62 = vector.broadcast %cst_28 : f32 to vector<1x512xf32>
      %63 = arith.mulf %61, %62 : vector<1x512xf32>
      %c0_29 = arith.constant 0 : index
      %c0_30 = arith.constant 0 : index
      %64 = vector.load %arg7[%c0_29, %c0_30] : memref<1x64xf32, #tpu.memory_space<vmem>>, vector<1x64xf32>
      %cst_31 = arith.constant dense<0.000000e+00> : vector<1xf32>
      %65 = vector.multi_reduction <add>, %64, %cst_31 [1] : vector<1x64xf32> to vector<1xf32>
      %66 = vector.shape_cast %65 : vector<1xf32> to vector<1x1xf32>
      %cst_32 = arith.constant 3.05175781E-5 : f32
      %67 = vector.broadcast %cst_32 : f32 to vector<1x1xf32>
      %68 = arith.mulf %66, %67 : vector<1x1xf32>
      %cst_33 = arith.constant 2.500000e-01 : f32
      %69 = vector.broadcast %cst_33 : f32 to vector<1x1xf32>
      %70 = arith.mulf %69, %68 : vector<1x1xf32>
      %71 = arith.addf %68, %70 : vector<1x1xf32>
      %cst_34 = arith.constant 1.000000e-10 : f32
      %72 = vector.broadcast %cst_34 : f32 to vector<1x512xf32>
      %73 = arith.addf %63, %72 : vector<1x512xf32>
      %74 = math.log %73 : vector<1x512xf32>
      %75 = arith.mulf %63, %74 : vector<1x512xf32>
      %cst_35 = arith.constant dense<0.000000e+00> : vector<1xf32>
      %76 = vector.multi_reduction <add>, %75, %cst_35 [1] : vector<1x512xf32> to vector<1xf32>
      %77 = vector.shape_cast %76 : vector<1xf32> to vector<1x1xf32>
      %cst_36 = arith.constant 0.000000e+00 : f32
      %78 = vector.broadcast %cst_36 : f32 to vector<1x1xf32>
      %79 = arith.subf %78, %77 : vector<1x1xf32>
      %80 = math.exp %79 : vector<1x1xf32>
      %81 = tpu.iota {dimensions = array<i32: 1>} : vector<1x128xi32>
      %c0_i32_37 = arith.constant 0 : i32
      %82 = vector.broadcast %c0_i32_37 : i32 to vector<1x128xi32>
      %83 = arith.cmpi eq, %81, %82 : vector<1x128xi32>
      %cst_38 = arith.constant 0.000000e+00 : f32
      %84 = vector.shape_cast %71 : vector<1x1xf32> to vector<1x1xf32>
      %85 = vector.broadcast %84 : vector<1x1xf32> to vector<1x128xf32>
      %86 = vector.broadcast %cst_38 : f32 to vector<1x128xf32>
      %87 = arith.select %83, %85, %86 : vector<1x128xi1>, vector<1x128xf32>
      %c1_i32 = arith.constant 1 : i32
      %88 = vector.broadcast %c1_i32 : i32 to vector<1x128xi32>
      %89 = arith.cmpi eq, %81, %88 : vector<1x128xi32>
      %cst_39 = arith.constant 0.000000e+00 : f32
      %90 = vector.shape_cast %80 : vector<1x1xf32> to vector<1x1xf32>
      %91 = vector.broadcast %90 : vector<1x1xf32> to vector<1x128xf32>
      %92 = vector.broadcast %cst_39 : f32 to vector<1x128xf32>
      %93 = arith.select %89, %91, %92 : vector<1x128xi1>, vector<1x128xf32>
      %94 = arith.addf %87, %93 : vector<1x128xf32>
      %c0_40 = arith.constant 0 : index
      %c0_41 = arith.constant 0 : index
      %95 = vector.load %arg5[%c0_40, %c0_41] : memref<1x128xf32, #tpu.memory_space<vmem>>, vector<1x128xf32>
      tpu.vector_store %arg5[%c0_40, %c0_41], %94 {strides = array<i32>} : memref<1x128xf32, #tpu.memory_space<vmem>>, vector<1x128xf32>,
    } else {
    }
    return
  }
  func.func @transform_0(%arg0: i32) -> (i32, i32) {
    %c0_i32 = arith.constant 0 : i32
    %c0_i32_0 = arith.constant 0 : i32
    return %arg0, %c0_i32 : i32, i32
  }
  func.func @transform_1(%arg0: i32) -> (i32, i32) {
    %c0_i32 = arith.constant 0 : i32
    %c0_i32_0 = arith.constant 0 : i32
    %c0_i32_1 = arith.constant 0 : i32
    return %c0_i32, %c0_i32_0 : i32, i32
  }
  func.func @transform_2(%arg0: i32) -> (i32, i32) {
    %c0_i32 = arith.constant 0 : i32
    %c0_i32_0 = arith.constant 0 : i32
    return %arg0, %c0_i32 : i32, i32
  }
  func.func @transform_3(%arg0: i32) -> (i32, i32) {
    %c0_i32 = arith.constant 0 : i32
    %c0_i32_0 = arith.constant 0 : i32
    return %arg0, %c0_i32 : i32, i32
  }
  func.func @transform_4(%arg0: i32) -> (i32, i32) {
    %c0_i32 = arith.constant 0 : i32
    %c0_i32_0 = arith.constant 0 : i32
    %c0_i32_1 = arith.constant 0 : i32
    return %c0_i32, %c0_i32_0 : i32, i32
  }
}

</mosaic_0001>

<bundles_post_ra>
// kernel: vq_quantizer_forward.1
= control target key start
LH: loop header
LB: loop body
LE: loop exit
PB: predicated region body
PF: predicated region fallthrough
CT: control target
= control target key end

     0   :  { %10 = vsyncpa [#allocation5], 0  ;;  %s6932_s0 = inlined_call_operand.vmem [shape: f32[512,64], index: 0, kind: input, shape index: {}]   ;;  %s6933_s1 = inlined_call_operand.vmem [shape: f32[512,64], index: 1, kind: input, shape index: {}]   ;;  %s6934_s2 = inlined_call_operand.vmem [shape: f32[512,64], index: 2, kind: output, shape index: {0}]   ;;  %s6935_s3 = inlined_call_operand.hbm [shape: f32[512,512], index: 3, kind: output, shape index: {1}]   ;;  %s6936_s4 = inlined_call_operand.vmem [shape: f32[1,128], index: 4, kind: output, shape index: {2}]  }
   0x1   :  { %12 = vsyncpa [#allocation5 + $0x1], 0  ;;  %s4152_s15 = smov 0   ;;  %s4154_s16 = smov 0  }
   0x2   :  { %s4156_s17 = smov 0   ;;  %s4158_s18 = smov 0  }
   0x3 LB: > { %s4173_s19 = sadd.s32 4294967295, %s4118_s18   ;;  %s3445_s20 = sadd.s32 4294967294, %s4118_s18   ;;  %s4118_s18 = sphi %s4158_s18, %s7101_s18   ;;  %s4114_s17 = sphi %s4156_s17, %s7100_s17   ;;  %s4110_s16 = sphi %s4154_s16, %s7099_s16   ;;  %s4106_s15 = sphi %s4152_s15, %s7098_s15  }
   0x4   : > { %s4177_s21 = sadd.s32 1, %s4118_s18   ;;  %s98_s22 = sadd.s32 1, %s4114_s17 }
   0x5   : > { %s95_s23 = ssub.s32 %s4118_s18, %s4177_s21  ;;  %p108_p0 = scmp.ne.s32.totalorder %s4114_s17, %s4110_s16 }
   0x6   : > { %p96_p1 = scmp.eq.s32.totalorder %s95_s23, 0  ;;  %p109_p2 = scmp.eq.s32.totalorder %s4173_s19, 3 }
   0x7   : > { %p114_p3 = scmp.ne.s32.totalorder %s4110_s16, %s4106_s15  ;;  %p115_p4 = scmp.eq.s32.totalorder %s3445_s20, 3 }
   0x8   : > { %s4188_s24 = scalar_select %p96_p1, %s4114_s17, %s98_s22  }
   0x9   : > { %p4190_p5 = por %p109_p2, %p108_p0  ;;  %p4194_p6 = por %p115_p4, %p114_p3 }
   0xa   : > { %p3448_p7 = scmp.ge.s32.totalorder %s4118_s18, 1  ;;  %p166_p8 = scmp.lt.s32.totalorder %s4118_s18, 5 }
   0xc   : > { %p167_p9 = pnand %p3448_p7, %p166_p8 }
   0xe   : > { %170 = sbr.rel (%p167_p9) target bundleno = 1264 (0x4f0), region = 28 }
  0x13   : > { %s192_s27 = sand.u32 1, %s4110_s16   ;;  %s3450_s28 = sshll.u32 %s4173_s19, 4 }
  0x14   : > { %s3449_s29 = sshll.u32 %s192_s27, 9  ;;  %p198_p10 = scmp.lt.s32.totalorder %s3450_s28, 63 }
  0x15   : > { %s4214_s11 = scalar_lea.vmem [#allocation4], %s3449_s29  ;;  %p3454_p11 = scmp.ne.s32.totalorder %s4173_s19, 0 }
  0x16   : > { %s7103_s28 = smov (!%p198_p10, %s3450_s28), 63 }
  0x17   : > { %s3451_s30 = sshll.u32 %s7103_s28, 3  ;;  %213 = sbr.rel (%p3454_p11) target bundleno = 32 (0x20), region = 32 }
  0x18   : > { %s4207_s7 = scalar_lea.vmem %s6932_s0, %s3451_s30  ;;  %s4212_s10 = scalar_lea.vmem %s6934_s2, %s3451_s30 }
  0x1c   : > { %v214_v0 = vlaneseq  ;;  %vm219_vm0 = vcmask 516096   ;;  %v4120_v1 = vmov 0.0  }
  0x1d   : > { %220 = vst.msk [vmem:[#allocation3] sm:$0x1] %vm219_vm0, %v4120_v1 }
  0x1e   : > { %vm216_vm1 = vcmp.lt.s32.totalorder %v214_v0, 512 }
  0x1f   : > { %218 = vst.msk [vmem:[#allocation2] sm:$0xf] %vm216_vm1, %v4120_v1 }
  0x20 PF: > { %v4220_v2 = vld [vmem:[%s6933_s1 + $0xf8] sm:$0xff]  ;;  %vm317_vm2 = vcmask 523264   ;;  %v4244_v6 = vld [vmem:[%s6933_s1 + $0x80] sm:$0xff]  ;;  %v4262_v10 = vld [vmem:[%s6933_s1 + $0xf0] sm:$0xff]  ;;  %vm1259_vm3 = vcmask 130112   ;;  %vm1266_vm4 = vcmask 195712  }
  0x21   : > { %v4225_v3 = vld [vmem:[%s6933_s1 + $0x1f8] sm:$0xff]  ;;  %3705 = vmatprep.subr.msk.mxu0 %vm317_vm2, %v4220_v2  ;;  %6991 = vst [vmem:[#allocation7_spill] sm:$0xff] %v4244_v6  ;;  %v4249_v7 = vld [vmem:[%s6933_s1] sm:$0xff]  ;;  %v382_v8 = vmul.f32 %v4244_v6, %v4244_v6  ;;  %v4267_v11 = vld [vmem:[%s6933_s1 + $0x1f0] sm:$0xff]  ;;  %vm1273_vm5 = vcmask 261312   ;;  %vm1280_vm6 = vcmask 326912  }
  0x22   : > { %v4230_v4 = vld [vmem:[%s6933_s1 + $0x78] sm:$0xff]  ;;  %3769 = vmatprep.subr.msk.mxu1 %vm317_vm2, %v4225_v3  ;;  %6992 = vst [vmem:[#allocation8_spill] sm:$0xff] %v4249_v7  ;;  %v366_v9 = vmul.f32 %v4249_v7, %v4249_v7  ;;  %v4272_v12 = vld [vmem:[%s6933_s1 + $0x70] sm:$0xff]  ;;  %v4286_v14 = vld [vmem:[%s6933_s1 + $0x88] sm:$0xff]  ;;  %vm1287_vm7 = vcmask 392512   ;;  %vm1294_vm8 = vcmask 458112  }
  0x23   : > { %v4239_v5 = vld [vmem:[%s6933_s1 + $0x178] sm:$0xff]  ;;  %3706 = vmatpush3.xpose.msk.msra.mxu0 %vm317_vm2, %v4230_v4  ;;  %v4281_v13 = vld [vmem:[%s6933_s1 + $0x170] sm:$0xff]  ;;  %6993 = vst [vmem:[#allocation9_spill] sm:$0xff] %v4286_v14  ;;  %v4291_v15 = vld [vmem:[%s6933_s1 + $0x8] sm:$0xff]  ;;  %v478_v16 = vsel %vm317_vm2, %v382_v8, 0.0  ;;  %v383_v18 = vmul.f32 %v4286_v14, %v4286_v14  ;;  %vm1301_vm9 = vcmask 523712  }
  0x24   : > { %3770 = vmatpush3.xpose.msk.msra.mxu1 %vm317_vm2, %v4239_v5  ;;  %3707 = vmatprep.subr.msk.mxu0 %vm317_vm2, %v4262_v10  ;;  %6994 = vst [vmem:[#allocation10_spill] sm:$0xff] %v4291_v15  ;;  %v430_v17 = vsel %vm317_vm2, %v366_v9, 0.0  ;;  %v367_v19 = vmul.f32 %v4291_v15, %v4291_v15  ;;  %v4302_v20 = vld [vmem:[%s6933_s1 + $0xe8] sm:$0xff]  ;;  %v4312_v22 = vld [vmem:[%s6933_s1 + $0x90] sm:$0xff]  ;;  %v4346_v30 = vld [vmem:[%s6933_s1 + $0x98] sm:$0xff]  ;;  %vm1308_vm10 = vcmask 589312  }
  0x25   : > { %3771 = vmatprep.subr.msk.mxu1 %vm317_vm2, %v4267_v11  ;;  %v4307_v21 = vld [vmem:[%s6933_s1 + $0x1e8] sm:$0xff]  ;;  %479 = vadd.xlane.f32.xlu1 %v478_v16  ;;  %v4317_v23 = vld [vmem:[%s6933_s1 + $0x10] sm:$0xff]  ;;  %v481_v24 = vsel %vm317_vm2, %v383_v18, 0.0  ;;  %v384_v27 = vmul.f32 %v4312_v22, %v4312_v22  ;;  %v4351_v31 = vld [vmem:[%s6933_s1 + $0x18] sm:$0xff]  ;;  %v385_v37 = vmul.f32 %v4346_v30, %v4346_v30  ;;  %vm1315_vm11 = vcmask 654912   ;;  %s3679_s8 = sshll.u32 %s4173_s19, 7 }
  0x26   : > { %431 = vadd.xlane.f32.xlu0 %v430_v17  ;;  %v433_v25 = vsel %vm317_vm2, %v367_v19, 0.0  ;;  %v4328_v26 = vld [vmem:[%s6933_s1 + $0x68] sm:$0xff]  ;;  %v368_v28 = vmul.f32 %v4317_v23, %v4317_v23  ;;  %v4356_v32 = vld [vmem:[%s6933_s1 + $0xe0] sm:$0xff]  ;;  %v369_v38 = vmul.f32 %v4351_v31, %v4351_v31  ;;  %v4400_v42 = vld [vmem:[%s6933_s1 + $0xd8] sm:$0xff]  ;;  %vm1322_vm12 = vcmask 720512   ;;  %p3696_p12 = scmp.ne.s32.totalorder %s4173_s19, 3 }
  0x27   : > { %3708 = vmatpush3.xpose.msk.msra.mxu0 %vm317_vm2, %v4272_v12  ;;  %v4341_v29 = vld [vmem:[%s6933_s1 + $0x168] sm:$0xff]  ;;  %v4361_v33 = vld [vmem:[%s6933_s1 + $0x1e0] sm:$0xff]  ;;  %v484_v34 = vsel %vm317_vm2, %v384_v27, 0.0  ;;  %v4405_v43 = vld [vmem:[%s6933_s1 + $0x1d8] sm:$0xff]  ;;  %v487_v44 = vsel %vm317_vm2, %v385_v37, 0.0  ;;  %vm1329_vm13 = vcmask 786112  }
  0x28   : > { %3772 = vmatpush3.xpose.msk.msra.mxu1 %vm317_vm2, %v4281_v13  ;;  %3709 = vmatprep.subr.msk.mxu0 %vm317_vm2, %v4302_v20  ;;  %v436_v35 = vsel %vm317_vm2, %v368_v28, 0.0  ;;  %v4372_v36 = vld [vmem:[%s6933_s1 + $0x60] sm:$0xff]  ;;  %v4390_v40 = vld [vmem:[%s6933_s1 + $0x108] sm:$0xff]  ;;  %6998 = vst [vmem:[#allocation14_spill] sm:$0xff] %v4405_v43  ;;  %v439_v45 = vsel %vm317_vm2, %v369_v38, 0.0  ;;  %v4416_v46 = vld [vmem:[%s6933_s1 + $0x58] sm:$0xff] }
  0x29   : > { %3773 = vmatprep.subr.msk.mxu1 %vm317_vm2, %v4307_v21  ;;  %482 = vadd.xlane.f32.xlu1 %v481_v24  ;;  %v4385_v39 = vld [vmem:[%s6933_s1 + $0x160] sm:$0xff]  ;;  %6996 = vst [vmem:[#allocation12_spill] sm:$0xff] %v4390_v40  ;;  %v399_v47 = vmul.f32 %v4390_v40, %v4390_v40  ;;  %v4429_v49 = vld [vmem:[%s6933_s1 + $0x158] sm:$0xff]  ;;  %v4444_v52 = vld [vmem:[%s6933_s1 + $0xd0] sm:$0xff]  ;;  %vm1336_vm14 = vcmask 851712   ;;  %vm1343_vm15 = vcmask 917312  }
  0x2a   : > { %434 = vadd.xlane.f32.xlu0 %v433_v25  ;;  %6995 = vst [vmem:[#allocation11_spill] sm:$0xff] %v4385_v39  ;;  %v4395_v41 = vld [vmem:[%s6933_s1 + $0x100] sm:$0xff]  ;;  %6999 = vst [vmem:[#allocation15_spill] sm:$0xff] %v4429_v49  ;;  %v4449_v53 = vld [vmem:[%s6933_s1 + $0x1d0] sm:$0xff]  ;;  %vm1350_vm0 = vcmask 982912   ;;  %vm1357_vm1 = vcmask 1048512  }
  0x2b   : > { %3710 = vmatpush3.xpose.msk.msra.mxu0 %vm317_vm2, %v4328_v26  ;;  %6997 = vst [vmem:[#allocation13_spill] sm:$0xff] %v4395_v41  ;;  %v398_v48 = vmul.f32 %v4395_v41, %v4395_v41  ;;  %v4434_v50 = vld [vmem:[%s6933_s1 + $0xa0] sm:$0xff]  ;;  %7001 = vst [vmem:[#allocation17_spill] sm:$0xff] %v4449_v53  ;;  %v529_v54 = vsel %vm317_vm2, %v399_v47, 0.0  ;;  %v4460_v56 = vld [vmem:[%s6933_s1 + $0x50] sm:$0xff] }
  0x2c   : > { %3774 = vmatpush3.xpose.msk.msra.mxu1 %vm317_vm2, %v4341_v29  ;;  %3711 = vmatprep.subr.msk.mxu0 %vm317_vm2, %v4356_v32  ;;  %7000 = vst [vmem:[#allocation16_spill] sm:$0xff] %v4434_v50  ;;  %v4439_v51 = vld [vmem:[%s6933_s1 + $0x20] sm:$0xff]  ;;  %v386_v57 = vmul.f32 %v4434_v50, %v4434_v50  ;;  %v4473_v59 = vld [vmem:[%s6933_s1 + $0x150] sm:$0xff]  ;;  %v4478_v60 = vld [vmem:[%s6933_s1 + $0x28] sm:$0xff] }
  0x2d   : > { %3775 = vmatprep.subr.msk.mxu1 %vm317_vm2, %v4361_v33  ;;  %485 = vadd.xlane.f32.xlu1 %v484_v34  ;;  %v526_v55 = vsel %vm317_vm2, %v398_v48, 0.0  ;;  %v370_v58 = vmul.f32 %v4439_v51, %v4439_v51  ;;  %v4483_v61 = vld [vmem:[%s6933_s1 + $0x110] sm:$0xff]  ;;  %v4488_v62 = vld [vmem:[%s6933_s1 + $0xc8] sm:$0xff]  ;;  %v4496_v0 = vld [vmem:[%s4207_s7] sm:$0xff]  ;;  %v371_v16 = vmul.f32 %v4478_v60, %v4478_v60 }
  0x2e   : > { %437 = vadd.xlane.f32.xlu0 %v436_v35  ;;  %v4493_v63 = vld [vmem:[%s6933_s1 + $0x1c8] sm:$0xff]  ;;  %v490_v1 = vsel %vm317_vm2, %v386_v57, 0.0  ;;  %v400_v17 = vmul.f32 %v4483_v61, %v4483_v61  ;;  %v4525_v19 = vld [vmem:[%s6933_s1 + $0x118] sm:$0xff]  ;;  %v4535_v25 = vld [vmem:[%s6933_s1 + $0xc0] sm:$0xff]  ;;  %3737 = vmatprep.mubr.msk.f32.mxu0 %vm317_vm2, %v4496_v0 }
  0x2f   : > { %3712 = vmatpush3.xpose.msk.msra.mxu0 %vm317_vm2, %v4372_v36  ;;  %7002 = vst [vmem:[#allocation18_spill] sm:$0xff] %v4493_v63  ;;  %v442_v8 = vsel %vm317_vm2, %v370_v58, 0.0  ;;  %v4507_v9 = vld [vmem:[%s6933_s1 + $0x48] sm:$0xff]  ;;  %v4540_v27 = vld [vmem:[%s6933_s1 + $0x1c0] sm:$0xff]  ;;  %3801 = vmatprep.mubr.msk.f32.mxu1 %vm317_vm2, %v4496_v0  ;;  %v445_v28 = vsel %vm317_vm2, %v371_v16, 0.0  ;;  %v401_v37 = vmul.f32 %v4525_v19, %v4525_v19  ;;  %v4583_v48 = vld [vmem:[%s6933_s1 + $0xb8] sm:$0xff] }
  0x30   : > { %3776 = vmatpush3.xpose.msk.msra.mxu1 %vm317_vm2, %v4385_v39  ;;  %3713 = vmatprep.subr.msk.mxu0 %vm317_vm2, %v4400_v42  ;;  %v4520_v18 = vld [vmem:[%s6933_s1 + $0x148] sm:$0xff]  ;;  %v532_v34 = vsel %vm317_vm2, %v400_v17, 0.0  ;;  %v4555_v35 = vld [vmem:[%s6933_s1 + $0x40] sm:$0xff]  ;;  %v4599_v58 = vld [vmem:[%s6933_s1 + $0x38] sm:$0xff] }
  0x31   : > { %3777 = vmatprep.subr.msk.mxu1 %vm317_vm2, %v4405_v43  ;;  %488 = vadd.xlane.f32.xlu1 %v487_v44  ;;  %v4530_v24 = vld [vmem:[%s6933_s1 + $0xa8] sm:$0xff]  ;;  %v4568_v44 = vld [vmem:[%s6933_s1 + $0x140] sm:$0xff]  ;;  %v4612_v16 = vld [vmem:[%s6933_s1 + $0x138] sm:$0xff] }
  0x32   : > { %440 = vadd.xlane.f32.xlu0 %v439_v45  ;;  %7003 = vst [vmem:[#allocation19_spill] sm:$0xff] %v4530_v24  ;;  %v387_v38 = vmul.f32 %v4530_v24, %v4530_v24  ;;  %v4573_v45 = vld [vmem:[%s6933_s1 + $0x188] sm:$0xff]  ;;  %v4578_v47 = vld [vmem:[%s6933_s1 + $0x180] sm:$0xff]  ;;  %v4617_v17 = vld [vmem:[%s6933_s1 + $0xb0] sm:$0xff] }
  0x33   : > { %3714 = vmatpush3.xpose.msk.msra.mxu0 %vm317_vm2, %v4416_v46  ;;  %7004 = vst [vmem:[#allocation20_spill] sm:$0xff] %v4573_v45  ;;  %7005 = vst [vmem:[#allocation21_spill] sm:$0xff] %v4578_v47 }
  0x34   : > { %3778 = vmatpush3.xpose.msk.msra.mxu1 %vm317_vm2, %v4429_v49  ;;  %3715 = vmatprep.subr.msk.mxu0 %vm317_vm2, %v4444_v52  ;;  %v493_v57 = vsel %vm317_vm2, %v387_v38, 0.0  ;;  %7006 = vst [vmem:[#allocation22_spill] sm:$0xff] %v4617_v17 }
  0x35   : > { %3779 = vmatprep.subr.msk.mxu1 %vm317_vm2, %v4449_v53  ;;  %530 = vadd.xlane.f32.xlu1 %v529_v54  ;;  %v4588_v54 = vld [vmem:[%s6933_s1 + $0x1b8] sm:$0xff]  ;;  %v388_v53 = vmul.f32 %v4617_v17, %v4617_v17 }
  0x36   : > { %527 = vadd.xlane.f32.xlu0 %v526_v55  ;;  %v535_v55 = vsel %vm317_vm2, %v401_v37, 0.0 }
  0x37   : > { %3716 = vmatpush3.xpose.msk.msra.mxu0 %vm317_vm2, %v4460_v56 }
  0x38   : > { %3780 = vmatpush3.xpose.msk.msra.mxu1 %vm317_vm2, %v4473_v59  ;;  %3717 = vmatprep.subr.msk.mxu0 %vm317_vm2, %v4488_v62 }
  0x39   : > { %3781 = vmatprep.subr.msk.mxu1 %vm317_vm2, %v4493_v63  ;;  %491 = vadd.xlane.f32.xlu1 %v490_v1  ;;  %v415_v1 = vmul.f32 %v4573_v45, %v4573_v45 }
  0x3a   : > { %443 = vadd.xlane.f32.xlu0 %v442_v8  ;;  %v414_v8 = vmul.f32 %v4578_v47, %v4578_v47 }
  0x3b   : > { %3718 = vmatpush3.xpose.msk.msra.mxu0 %vm317_vm2, %v4507_v9  ;;  %v577_v37 = vsel %vm317_vm2, %v415_v1, 0.0  ;;  %v4656_v1 = vld [vmem:[%s6933_s1 + $0x120] sm:$0xff] }
  0x3c   : > { %3782 = vmatpush3.xpose.msk.msra.mxu1 %vm317_vm2, %v4520_v18  ;;  %3719 = vmatprep.subr.msk.mxu0 %vm317_vm2, %v4535_v25  ;;  %v574_v38 = vsel %vm317_vm2, %v414_v8, 0.0  ;;  %v4661_v8 = vld [vmem:[%s6933_s1 + $0x1a8] sm:$0xff]  ;;  %v402_v39 = vmul.f32 %v4656_v1, %v4656_v1 }
  0x3d   : > { %3783 = vmatprep.subr.msk.mxu1 %vm317_vm2, %v4540_v27  ;;  %446 = vadd.xlane.f32.xlu1 %v445_v28  ;;  %v4622_v28 = vld [vmem:[%s6933_s1 + $0x30] sm:$0xff] }
  0x3e   : > { %533 = vadd.xlane.f32.xlu0 %v532_v34  ;;  %7007 = vst [vmem:[#allocation23_spill] sm:$0xff] %v4622_v28  ;;  %v4627_v34 = vld [vmem:[%s6933_s1 + $0x1b0] sm:$0xff]  ;;  %v372_v43 = vmul.f32 %v4622_v28, %v4622_v28 }
  0x3f   : > { %3720 = vmatpush3.xpose.msk.msra.mxu0 %vm317_vm2, %v4555_v35 }
  0x40   : > { %3784 = vmatpush3.xpose.msk.msra.mxu1 %vm317_vm2, %v4568_v44  ;;  %3721 = vmatprep.subr.msk.mxu0 %vm317_vm2, %v4583_v48  ;;  %v448_v49 = vsel %vm317_vm2, %v372_v43, 0.0  ;;  %v4685_v43 = vld [vmem:[%s6933_s1 + $0x1a0] sm:$0xff] }
  0x41   : > { %3785 = vmatprep.subr.msk.mxu1 %vm317_vm2, %v4588_v54  ;;  %536 = vadd.xlane.f32.xlu1 %v535_v55  ;;  %v4646_v55 = vld [vmem:[%s6933_s1 + $0x130] sm:$0xff] }
  0x42   : > { %494 = vadd.xlane.f32.xlu0 %v493_v57  ;;  %v4651_v57 = vld [vmem:[%s6933_s1 + $0x190] sm:$0xff] }
  0x43   : > { %3722 = vmatpush3.xpose.msk.msra.mxu0 %vm317_vm2, %v4599_v58  ;;  %v416_v63 = vmul.f32 %v4651_v57, %v4651_v57 }
  0x44   : > { %3786 = vmatpush3.xpose.msk.msra.mxu1 %vm317_vm2, %v4612_v16  ;;  %3723 = vmatprep.subr.msk.mxu0 %vm317_vm2, %v4617_v17  ;;  %v496_v17 = vsel %vm317_vm2, %v388_v53, 0.0 }
  0x45   : > { %3787 = vmatprep.subr.msk.mxu1 %vm317_vm2, %v4627_v34  ;;  %578 = vadd.xlane.f32.xlu1 %v577_v37  ;;  %v4680_v37 = vld [vmem:[%s6933_s1 + $0x128] sm:$0xff]  ;;  %v580_v53 = vsel %vm317_vm2, %v416_v63, 0.0 }
  0x46   : > { %575 = vadd.xlane.f32.xlu0 %v574_v38  ;;  %v538_v38 = vsel %vm317_vm2, %v402_v39, 0.0 }
  0x47   : > { %3724 = vmatpush3.xpose.msk.msra.mxu0 %vm317_vm2, %v4622_v28  ;;  %v373_v28 = vmul.f32 %v4599_v58, %v4599_v58 }
  0x48   : > { %3788 = vmatpush3.xpose.msk.msra.mxu1 %vm317_vm2, %v4646_v55  ;;  %3725 = vmatprep.subr.msk.mxu0 %vm317_vm2, %v4530_v24  ;;  %v389_v24 = vmul.f32 %v4583_v48, %v4583_v48 }
  0x49   : > { %3789 = vmatprep.subr.msk.mxu1 %vm317_vm2, %v4661_v8  ;;  %497 = vadd.xlane.f32.xlu1 %v496_v17  ;;  %v451_v63 = vsel %vm317_vm2, %v373_v28, 0.0 }
  0x4a   : > { %449 = vadd.xlane.f32.xlu0 %v448_v49  ;;  %v4704_v49 = vld [vmem:[%s6933_s1 + $0x198] sm:$0xff]  ;;  %v499_v39 = vsel %vm317_vm2, %v389_v24, 0.0 }
  0x4b   : > { %3726 = vmatpush3.xpose.msk.msra.mxu0 %vm317_vm2, %v4478_v60  ;;  %v417_v17 = vmul.f32 %v4704_v49, %v4704_v49 }
  0x4c   : > { %3790 = vmatpush3.xpose.msk.msra.mxu1 %vm317_vm2, %v4680_v37  ;;  %3727 = vmatprep.subr.msk.mxu0 %vm317_vm2, %v4434_v50  ;;  %v403_v50 = vmul.f32 %v4680_v37, %v4680_v37 }
  0x4d   : > { %3791 = vmatprep.subr.msk.mxu1 %vm317_vm2, %v4685_v43  ;;  %581 = vadd.xlane.f32.xlu1 %v580_v53  ;;  %v583_v24 = vsel %vm317_vm2, %v417_v17, 0.0  ;;  %v390_v53 = vmul.f32 %v4535_v25, %v4535_v25  ;;  %v404_v17 = vmul.f32 %v4646_v55, %v4646_v55 }
  0x4e   : > { %539 = vadd.xlane.f32.xlu0 %v538_v38  ;;  %v541_v28 = vsel %vm317_vm2, %v403_v50, 0.0  ;;  %v374_v38 = vmul.f32 %v4555_v35, %v4555_v35 }
  0x4f   : > { %3728 = vmatpush3.xpose.msk.msra.mxu0 %vm317_vm2, %v4439_v51  ;;  %v502_v50 = vsel %vm317_vm2, %v390_v53, 0.0  ;;  %v391_v53 = vmul.f32 %v4488_v62, %v4488_v62 }
  0x50   : > { %3792 = vmatpush3.xpose.msk.msra.mxu1 %vm317_vm2, %v4656_v1  ;;  %3729 = vmatprep.subr.msk.mxu0 %vm317_vm2, %v4346_v30 }
  0x51   : > { %3793 = vmatprep.subr.msk.mxu1 %vm317_vm2, %v4704_v49  ;;  %500 = vadd.xlane.f32.xlu1 %v499_v39  ;;  %v454_v39 = vsel %vm317_vm2, %v374_v38, 0.0  ;;  %v375_v38 = vmul.f32 %v4507_v9, %v4507_v9 }
  0x52   : > { %452 = vadd.xlane.f32.xlu0 %v451_v63  ;;  %v418_v63 = vmul.f32 %v4685_v43, %v4685_v43 }
  0x53   : > { %3730 = vmatpush3.xpose.msk.msra.mxu0 %vm317_vm2, %v4351_v31 }
  0x54   : > { %3794 = vmatpush3.xpose.msk.msra.mxu1 %vm317_vm2, %v4525_v19  ;;  %3731 = vmatprep.subr.msk.mxu0 %vm317_vm2, %v4312_v22 }
  0x55   : > { %3795 = vmatprep.subr.msk.mxu1 %vm317_vm2, %v4651_v57  ;;  %584 = vadd.xlane.f32.xlu1 %v583_v24  ;;  %v586_v24 = vsel %vm317_vm2, %v418_v63, 0.0  ;;  %v419_v63 = vmul.f32 %v4661_v8, %v4661_v8 }
  0x56   : > { %542 = vadd.xlane.f32.xlu0 %v541_v28  ;;  %v544_v28 = vsel %vm317_vm2, %v404_v17, 0.0  ;;  %v405_v17 = vmul.f32 %v4612_v16, %v4612_v16 }
  0x57   : > { %3732 = vmatpush3.xpose.msk.msra.mxu0 %vm317_vm2, %v4317_v23 }
  0x58   : > { %3796 = vmatpush3.xpose.msk.msra.mxu1 %vm317_vm2, %v4483_v61  ;;  %3733 = vmatprep.subr.msk.mxu0 %vm317_vm2, %v4286_v14  ;;  %v396_v14 = vmul.f32 %v4262_v10, %v4262_v10 }
  0x59   : > { %3797 = vmatprep.subr.msk.mxu1 %vm317_vm2, %v4573_v45  ;;  %503 = vadd.xlane.f32.xlu1 %v502_v50  ;;  %v505_v50 = vsel %vm317_vm2, %v391_v53, 0.0  ;;  %v547_v53 = vsel %vm317_vm2, %v405_v17, 0.0  ;;  %v420_v17 = vmul.f32 %v4627_v34, %v4627_v34  ;;  %v7010_v45 = vld [vmem:[#allocation15_spill] sm:$0xff] }
  0x5a   : > { %455 = vadd.xlane.f32.xlu0 %v454_v39  ;;  %v457_v39 = vsel %vm317_vm2, %v375_v38, 0.0  ;;  %v392_v38 = vmul.f32 %v4444_v52, %v4444_v52 }
  0x5b   : > { %3734 = vmatpush3.xpose.msk.msra.mxu0 %vm317_vm2, %v4291_v15  ;;  %v408_v15 = vmul.f32 %v4473_v59, %v4473_v59 }
  0x5c   : > { %3798 = vmatpush3.xpose.msk.msra.mxu1 %vm317_vm2, %v4390_v40  ;;  %3735 = vmatprep.subr.msk.mxu0 %vm317_vm2, %v4244_v6  ;;  %v407_v6 = vmul.f32 %v4520_v18, %v4520_v18  ;;  %v378_v40 = vmul.f32 %v4372_v36, %v4372_v36 }
  0x5d   : > { %3799 = vmatprep.subr.msk.mxu1 %vm317_vm2, %v4578_v47  ;;  %587 = vadd.xlane.f32.xlu1 %v586_v24  ;;  %v4775_v24 = vld [vmem:[%s4207_s7 + $0x8] sm:$0xff]  ;;  %v377_v47 = vmul.f32 %v4416_v46, %v4416_v46 }
  0x5e   : > { %545 = vadd.xlane.f32.xlu0 %v544_v28  ;;  %v589_v28 = vsel %vm317_vm2, %v419_v63, 0.0 }
  0x5f   : > { %3736 = vmatpush3.xpose.msk.msra.mxu0 %vm317_vm2, %v4249_v7  ;;  %v406_v7 = vmul.f32 %v4568_v44, %v4568_v44 }
  0x60   : > { %3800 = vmatpush3.xpose.msk.msra.mxu1 %vm317_vm2, %v4395_v41  ;;  %3833 = vmatprep.subr.mxu0 %v4220_v2  ;;  %v376_v41 = vmul.f32 %v4460_v56, %v4460_v56 }
  0x61   : > { %3913 = vmatprep.subr.mxu1 %v4225_v3  ;;  %506 = vadd.xlane.f32.xlu1 %v505_v50  ;;  %v4792_v50 = vld [vmem:[%s4207_s7 + $0x10] sm:$0xff] }
  0x62   : > { %458 = vadd.xlane.f32.xlu0 %v457_v39  ;;  %3738 = vmatmul.mubr.msk.f32.vlgmr.msra.gmra.mxu0 %vm317_vm2, %v4496_v0  ;;  %v508_v39 = vsel %vm317_vm2, %v392_v38, 0.0  ;;  %v460_v63 = vsel %vm317_vm2, %v376_v41, 0.0  ;;  %v592_v41 = vsel %vm317_vm2, %v420_v17, 0.0  ;;  %v393_v38 = vmul.f32 %v4400_v42, %v4400_v42 }
  0x63   : > { %3802 = vmatmul.mubr.msk.f32.vlgmr.msra.gmra.mxu1 %vm317_vm2, %v4496_v0  ;;  %3739 = vmatprep.mubr.msk.f32.mxu0 %vm317_vm2, %v4775_v24  ;;  %v421_v17 = vmul.f32 %v4588_v54, %v4588_v54 }
  0x64   : > { %3803 = vmatprep.mubr.msk.f32.mxu1 %vm317_vm2, %v4775_v24  ;;  %3834 = vmatpush3.msra.mxu0 %v4230_v4 }
  0x65   : > { %3914 = vmatpush3.msra.mxu1 %v4239_v5  ;;  %590 = vadd.xlane.f32.xlu1 %v589_v28  ;;  %v4811_v28 = vld [vmem:[%s4207_s7 + $0x18] sm:$0xff] }
  0x66   : > { %548 = vadd.xlane.f32.xlu0 %v547_v53  ;;  %3740 = vmatmul.mubr.msk.f32.gmra.mxu0 %vm317_vm2, %v4775_v24  ;;  %v550_v53 = vsel %vm317_vm2, %v406_v7, 0.0  ;;  %v511_v7 = vsel %vm317_vm2, %v393_v38, 0.0  ;;  %v394_v38 = vmul.f32 %v4356_v32, %v4356_v32 }
  0x67   : > { %3804 = vmatmul.mubr.msk.f32.gmra.mxu1 %vm317_vm2, %v4775_v24  ;;  %3741 = vmatprep.mubr.msk.f32.mxu0 %vm317_vm2, %v4792_v50 }
  0x68   : > { %3805 = vmatprep.mubr.msk.f32.mxu1 %vm317_vm2, %v4792_v50  ;;  %3835 = vmatprep.subr.mxu0 %v4262_v10  ;;  %v520_v10 = vsel %vm317_vm2, %v396_v14, 0.0 }
  0x69   : > { %3915 = vmatprep.subr.mxu1 %v4267_v11  ;;  %509 = vadd.xlane.f32.xlu1 %v508_v39  ;;  %v4830_v39 = vld [vmem:[%s4207_s7 + $0x20] sm:$0xff] }
  0x6a   : > { %461 = vadd.xlane.f32.xlu0 %v460_v63  ;;  %3742 = vmatmul.mubr.msk.f32.gmra.mxu0 %vm317_vm2, %v4792_v50  ;;  %v463_v63 = vsel %vm317_vm2, %v377_v47, 0.0  ;;  %v595_v47 = vsel %vm317_vm2, %v421_v17, 0.0  ;;  %v422_v17 = vmul.f32 %v4540_v27, %v4540_v27 }
  0x6b   : > { %3806 = vmatmul.mubr.msk.f32.gmra.mxu1 %vm317_vm2, %v4792_v50  ;;  %3743 = vmatprep.mubr.msk.f32.mxu0 %vm317_vm2, %v4811_v28 }
  0x6c   : > { %3807 = vmatprep.mubr.msk.f32.mxu1 %vm317_vm2, %v4811_v28  ;;  %3836 = vmatpush3.msra.mxu0 %v4272_v12 }
  0x6d   : > { %3916 = vmatpush3.msra.mxu1 %v4281_v13  ;;  %593 = vadd.xlane.f32.xlu1 %v592_v41  ;;  %v4849_v41 = vld [vmem:[%s4207_s7 + $0x28] sm:$0xff] }
  0x6e   : > { %551 = vadd.xlane.f32.xlu0 %v550_v53  ;;  %3744 = vmatmul.mubr.msk.f32.gmra.mxu0 %vm317_vm2, %v4811_v28  ;;  %v553_v53 = vsel %vm317_vm2, %v407_v6, 0.0  ;;  %v514_v6 = vsel %vm317_vm2, %v394_v38, 0.0  ;;  %v395_v38 = vmul.f32 %v4302_v20, %v4302_v20 }
  0x6f   : > { %3808 = vmatmul.mubr.msk.f32.gmra.mxu1 %vm317_vm2, %v4811_v28  ;;  %3745 = vmatprep.mubr.msk.f32.mxu0 %vm317_vm2, %v4830_v39 }
  0x70   : > { %3809 = vmatprep.mubr.msk.f32.mxu1 %vm317_vm2, %v4830_v39  ;;  %3837 = vmatprep.subr.mxu0 %v4302_v20 }
  0x71   : > { %3917 = vmatprep.subr.mxu1 %v4307_v21  ;;  %512 = vadd.xlane.f32.xlu1 %v511_v7  ;;  %v4868_v7 = vld [vmem:[%s4207_s7 + $0x30] sm:$0xff] }
  0x72   : > { %464 = vadd.xlane.f32.xlu0 %v463_v63  ;;  %3746 = vmatmul.mubr.msk.f32.gmra.mxu0 %vm317_vm2, %v4830_v39  ;;  %v466_v63 = vsel %vm317_vm2, %v378_v40, 0.0  ;;  %v598_v40 = vsel %vm317_vm2, %v422_v17, 0.0 }
  0x73   : > { %3810 = vmatmul.mubr.msk.f32.gmra.mxu1 %vm317_vm2, %v4830_v39  ;;  %3747 = vmatprep.mubr.msk.f32.mxu0 %vm317_vm2, %v4849_v41 }
  0x74   : > { %3811 = vmatprep.mubr.msk.f32.mxu1 %vm317_vm2, %v4849_v41  ;;  %3838 = vmatpush3.msra.mxu0 %v4328_v26 }
  0x75   : > { %3918 = vmatpush3.msra.mxu1 %v4341_v29  ;;  %596 = vadd.xlane.f32.xlu1 %v595_v47  ;;  %v4887_v47 = vld [vmem:[%s4207_s7 + $0x38] sm:$0xff] }
  0x76   : > { %554 = vadd.xlane.f32.xlu0 %v553_v53  ;;  %3748 = vmatmul.mubr.msk.f32.gmra.mxu0 %vm317_vm2, %v4849_v41  ;;  %v556_v53 = vsel %vm317_vm2, %v408_v15, 0.0  ;;  %v517_v15 = vsel %vm317_vm2, %v395_v38, 0.0 }
  0x77   : > { %3812 = vmatmul.mubr.msk.f32.gmra.mxu1 %vm317_vm2, %v4849_v41  ;;  %3749 = vmatprep.mubr.msk.f32.mxu0 %vm317_vm2, %v4868_v7 }
  0x78   : > { %3813 = vmatprep.mubr.msk.f32.mxu1 %vm317_vm2, %v4868_v7  ;;  %3839 = vmatprep.subr.mxu0 %v4356_v32  ;;  %v379_v32 = vmul.f32 %v4328_v26, %v4328_v26  ;;  %v7009_v26 = vld [vmem:[#allocation18_spill] sm:$0xff] }
  0x79   : > { %3919 = vmatprep.subr.mxu1 %v4361_v33  ;;  %515 = vadd.xlane.f32.xlu1 %v514_v6  ;;  %v4906_v6 = vld [vmem:[%s4207_s7 + $0x40] sm:$0xff]  ;;  %v423_v17 = vmul.f32 %v7009_v26, %v7009_v26 }
  0x7a   : > { %467 = vadd.xlane.f32.xlu0 %v466_v63  ;;  %3750 = vmatmul.mubr.msk.f32.gmra.mxu0 %vm317_vm2, %v4868_v7  ;;  %v7008_v63 = vld [vmem:[#allocation11_spill] sm:$0xff]  ;;  %v469_v20 = vsel %vm317_vm2, %v379_v32, 0.0 }
  0x7b   : > { %3814 = vmatmul.mubr.msk.f32.gmra.mxu1 %vm317_vm2, %v4868_v7  ;;  %3751 = vmatprep.mubr.msk.f32.mxu0 %vm317_vm2, %v4887_v47  ;;  %v601_v38 = vsel %vm317_vm2, %v423_v17, 0.0 }
  0x7c   : > { %3815 = vmatprep.mubr.msk.f32.mxu1 %vm317_vm2, %v4887_v47  ;;  %3840 = vmatpush3.msra.mxu0 %v4372_v36  ;;  %v409_v36 = vmul.f32 %v7010_v45, %v7010_v45 }
  0x7d   : > { %3920 = vmatpush3.msra.mxu1 %v7008_v63  ;;  %599 = vadd.xlane.f32.xlu1 %v598_v40  ;;  %v4925_v40 = vld [vmem:[%s4207_s7 + $0x48] sm:$0xff] }
  0x7e   : > { %557 = vadd.xlane.f32.xlu0 %v556_v53  ;;  %3752 = vmatmul.mubr.msk.f32.gmra.mxu0 %vm317_vm2, %v4887_v47  ;;  %v7011_v53 = vld [vmem:[#allocation14_spill] sm:$0xff]  ;;  %v559_v32 = vsel %vm317_vm2, %v409_v36, 0.0  ;;  %v397_v36 = vmul.f32 %v4220_v2, %v4220_v2 }
  0x7f   : > { %3816 = vmatmul.mubr.msk.f32.gmra.mxu1 %vm317_vm2, %v4887_v47  ;;  %3753 = vmatprep.mubr.msk.f32.mxu0 %vm317_vm2, %v4906_v6 }
  0x80   : > { %3817 = vmatprep.mubr.msk.f32.mxu1 %vm317_vm2, %v4906_v6  ;;  %3841 = vmatprep.subr.mxu0 %v4400_v42  ;;  %v380_v42 = vmul.f32 %v4272_v12, %v4272_v12  ;;  %v523_v2 = vsel %vm317_vm2, %v397_v36, 0.0 }
  0x81   : > { %3921 = vmatprep.subr.mxu1 %v7011_v53  ;;  %518 = vadd.xlane.f32.xlu1 %v517_v15  ;;  %v4944_v15 = vld [vmem:[%s4207_s7 + $0x50] sm:$0xff] }
  0x82   : > { %470 = vadd.xlane.f32.xlu0 %v469_v20  ;;  %3754 = vmatmul.mubr.msk.f32.gmra.mxu0 %vm317_vm2, %v4906_v6  ;;  %v472_v12 = vsel %vm317_vm2, %v380_v42, 0.0  ;;  %v7012_v20 = vld [vmem:[#allocation17_spill] sm:$0xff]  ;;  %v426_v42 = vmul.f32 %v4361_v33, %v4361_v33 }
  0x83   : > { %3818 = vmatmul.mubr.msk.f32.gmra.mxu1 %vm317_vm2, %v4906_v6  ;;  %3755 = vmatprep.mubr.msk.f32.mxu0 %vm317_vm2, %v4925_v40  ;;  %v424_v17 = vmul.f32 %v7012_v20, %v7012_v20 }
  0x84   : > { %3819 = vmatprep.mubr.msk.f32.mxu1 %vm317_vm2, %v4925_v40  ;;  %3842 = vmatpush3.msra.mxu0 %v4416_v46  ;;  %v410_v46 = vmul.f32 %v7008_v63, %v7008_v63 }
  0x85   : > { %3922 = vmatpush3.msra.mxu1 %v7010_v45  ;;  %602 = vadd.xlane.f32.xlu1 %v601_v38  ;;  %v4963_v45 = vld [vmem:[%s4207_s7 + $0x58] sm:$0xff]  ;;  %v604_v14 = vsel %vm317_vm2, %v424_v17, 0.0  ;;  %v4982_v38 = vld [vmem:[%s4207_s7 + $0x60] sm:$0xff] }
  0x86   : > { %560 = vadd.xlane.f32.xlu0 %v559_v32  ;;  %3756 = vmatmul.mubr.msk.f32.gmra.mxu0 %vm317_vm2, %v4925_v40  ;;  %v562_v63 = vsel %vm317_vm2, %v410_v46, 0.0  ;;  %v425_v32 = vmul.f32 %v7011_v53, %v7011_v53  ;;  %v7013_v17 = vld [vmem:[#allocation22_spill] sm:$0xff]  ;;  %v7022_v46 = vld [vmem:[#allocation21_spill] sm:$0xff] }
  0x87   : > { %3820 = vmatmul.mubr.msk.f32.gmra.mxu1 %vm317_vm2, %v4925_v40  ;;  %3757 = vmatprep.mubr.msk.f32.mxu0 %vm317_vm2, %v4944_v15 }
  0x88   : > { %3821 = vmatprep.mubr.msk.f32.mxu1 %vm317_vm2, %v4944_v15  ;;  %3843 = vmatprep.subr.mxu0 %v4444_v52  ;;  %v381_v52 = vmul.f32 %v4230_v4, %v4230_v4 }
  0x89   : > { %3923 = vmatprep.subr.mxu1 %v7012_v20  ;;  %521 = vadd.xlane.f32.xlu1 %v520_v10  ;;  %v427_v10 = vmul.f32 %v4307_v21, %v4307_v21 }
  0x8a   : > { %473 = vadd.xlane.f32.xlu0 %v472_v12  ;;  %3758 = vmatmul.mubr.msk.f32.gmra.mxu0 %vm317_vm2, %v4944_v15  ;;  %v475_v4 = vsel %vm317_vm2, %v381_v52, 0.0  ;;  %v428_v12 = vmul.f32 %v4267_v11, %v4267_v11 }
  0x8b   : > { %3822 = vmatmul.mubr.msk.f32.gmra.mxu1 %vm317_vm2, %v4944_v15  ;;  %3759 = vmatprep.mubr.msk.f32.mxu0 %vm317_vm2, %v4963_v45 }
  0x8c   : > { %3823 = vmatprep.mubr.msk.f32.mxu1 %vm317_vm2, %v4963_v45  ;;  %3844 = vmatpush3.msra.mxu0 %v4460_v56  ;;  %v411_v56 = vmul.f32 %v4341_v29, %v4341_v29  ;;  %v607_v29 = vsel %vm317_vm2, %v425_v32, 0.0  ;;  %v616_v11 = vsel %vm317_vm2, %v428_v12, 0.0 }
  0x8d   : > { %3924 = vmatpush3.msra.mxu1 %v4473_v59  ;;  %605 = vadd.xlane.f32.xlu1 %v604_v14  ;;  %v5001_v59 = vld [vmem:[%s4207_s7 + $0x68] sm:$0xff] }
  0x8e   : > { %563 = vadd.xlane.f32.xlu0 %v562_v63  ;;  %3760 = vmatmul.mubr.msk.f32.gmra.mxu0 %vm317_vm2, %v4963_v45  ;;  %v565_v53 = vsel %vm317_vm2, %v411_v56, 0.0  ;;  %v7023_v14 = vld [vmem:[#allocation8_spill] sm:$0xff]  ;;  %v7024_v63 = vld [vmem:[#allocation13_spill] sm:$0xff] }
  0x8f   : > { %3824 = vmatmul.mubr.msk.f32.gmra.mxu1 %vm317_vm2, %v4963_v45  ;;  %3761 = vmatprep.mubr.msk.f32.mxu0 %vm317_vm2, %v4982_v38 }
  0x90   : > { %3825 = vmatprep.mubr.msk.f32.mxu1 %vm317_vm2, %v4982_v38  ;;  %3845 = vmatprep.subr.mxu0 %v4488_v62  ;;  %v412_v62 = vmul.f32 %v4281_v13, %v4281_v13  ;;  %v610_v13 = vsel %vm317_vm2, %v426_v42, 0.0 }
  0x91   : > { %3925 = vmatprep.subr.mxu1 %v7009_v26  ;;  %524 = vadd.xlane.f32.xlu1 %v523_v2  ;;  %v5020_v26 = vld [vmem:[%s4207_s7 + $0x70] sm:$0xff] }
  0x92   : > { %476 = vadd.xlane.f32.xlu0 %v475_v4  ;;  %3762 = vmatmul.mubr.msk.f32.gmra.mxu0 %vm317_vm2, %v4982_v38  ;;  %v568_v33 = vsel %vm317_vm2, %v412_v62, 0.0  ;;  %v313_v4 = vmul.f32 %v4982_v38, %v4982_v38  ;;  %v315_v62 = vmul.f32 %v5020_v26, %v5020_v26 }
  0x93   : > { %3826 = vmatmul.mubr.msk.f32.gmra.mxu1 %vm317_vm2, %v4982_v38  ;;  %3763 = vmatprep.mubr.msk.f32.mxu0 %vm317_vm2, %v5001_v59 }
  0x94   : > { %3827 = vmatprep.mubr.msk.f32.mxu1 %vm317_vm2, %v5001_v59  ;;  %3846 = vmatpush3.msra.mxu0 %v4507_v9  ;;  %v413_v9 = vmul.f32 %v4239_v5, %v4239_v5  ;;  %v613_v5 = vsel %vm317_vm2, %v427_v10, 0.0 }
  0x95   : > { %3926 = vmatpush3.msra.mxu1 %v4520_v18  ;;  %608 = vadd.xlane.f32.xlu1 %v607_v29  ;;  %v5039_v18 = vld [vmem:[%s4207_s7 + $0x78] sm:$0xff] }
  0x96   : > { %566 = vadd.xlane.f32.xlu0 %v565_v53  ;;  %3764 = vmatmul.mubr.msk.f32.gmra.mxu0 %vm317_vm2, %v5001_v59  ;;  %v571_v21 = vsel %vm317_vm2, %v413_v9, 0.0  ;;  %v354_v53 = vsel %vm317_vm2, %v313_v4, 0.0  ;;  %v316_v42 = vmul.f32 %v5039_v18, %v5039_v18 }
  0x97   : > { %3828 = vmatmul.mubr.msk.f32.gmra.mxu1 %vm317_vm2, %v5001_v59  ;;  %3765 = vmatprep.mubr.msk.f32.mxu0 %vm317_vm2, %v5020_v26 }
  0x98   : > { %3829 = vmatprep.mubr.msk.f32.mxu1 %vm317_vm2, %v5020_v26  ;;  %3847 = vmatprep.subr.mxu0 %v4535_v25  ;;  %v301_v25 = vmul.f32 %v4496_v0, %v4496_v0 }
  0x99   : > { %3927 = vmatprep.subr.mxu1 %v4540_v27  ;;  %611 = vadd.xlane.f32.xlu1 %v610_v13  ;;  %v302_v27 = vmul.f32 %v4775_v24, %v4775_v24  ;;  %v304_v24 = vmul.f32 %v4811_v28, %v4811_v28  ;;  %v363_v13 = vsel %vm317_vm2, %v316_v42, 0.0 }
  0x9a   : > { %569 = vadd.xlane.f32.xlu0 %v568_v33  ;;  %3766 = vmatmul.mubr.msk.f32.gmra.mxu0 %vm317_vm2, %v5020_v26  ;;  %v318_v0 = vsel %vm317_vm2, %v301_v25, 0.0  ;;  %v360_v33 = vsel %vm317_vm2, %v315_v62, 0.0 }
  0x9b   : > { %3830 = vmatmul.mubr.msk.f32.gmra.mxu1 %vm317_vm2, %v5020_v26  ;;  %3767 = vmatprep.mubr.msk.f32.mxu0 %vm317_vm2, %v5039_v18 }
  0x9c   : > { %3831 = vmatprep.mubr.msk.f32.mxu1 %vm317_vm2, %v5039_v18  ;;  %3848 = vmatpush3.msra.mxu0 %v4555_v35  ;;  %v429_v35 = vmul.f32 %v4225_v3, %v4225_v3  ;;  %v303_v3 = vmul.f32 %v4792_v50, %v4792_v50  ;;  %v306_v50 = vmul.f32 %v4849_v41, %v4849_v41 }
  0x9d   : > { %3928 = vmatpush3.msra.mxu1 %v4568_v44  ;;  %614 = vadd.xlane.f32.xlu1 %v613_v5  ;;  %v321_v44 = vsel %vm317_vm2, %v302_v27, 0.0 }
  0x9e   : > { %572 = vadd.xlane.f32.xlu0 %v571_v21  ;;  %3768 = vmatmul.mubr.msk.f32.gmra.mxu0 %vm317_vm2, %v5039_v18  ;;  %v619_v20 = vsel %vm317_vm2, %v429_v35, 0.0 }
  0x9f   : > { %3832 = vmatmul.mubr.msk.f32.gmra.mxu1 %vm317_vm2, %v5039_v18  ;;  %3849 = vmatprep.subr.mxu0 %v4583_v48  ;;  %v7014_v48 = vld [vmem:[#allocation23_spill] sm:$0xff] }
  0xa0   : > { %3929 = vmatprep.subr.mxu1 %v4588_v54  ;;  %3850 = vmatpush3.msra.mxu0 %v4599_v58  ;;  %v7015_v54 = vld [vmem:[#allocation19_spill] sm:$0xff]  ;;  %v327_v58 = vsel %vm317_vm2, %v304_v24, 0.0 }
  0xa1   : > { %3930 = vmatpush3.msra.mxu1 %v4612_v16  ;;  %617 = vadd.xlane.f32.xlu1 %v616_v11  ;;  %v324_v16 = vsel %vm317_vm2, %v303_v3, 0.0 }
  0xa2   : > { %319 = vadd.xlane.f32.xlu0 %v318_v0  ;;  %3851 = vmatprep.subr.mxu0 %v7013_v17 }
  0xa3   : > { %3931 = vmatprep.subr.mxu1 %v4627_v34  ;;  %3852 = vmatpush3.msra.mxu0 %v7014_v48  ;;  %v305_v34 = vmul.f32 %v4830_v39, %v4830_v39  ;;  %v308_v39 = vmul.f32 %v4887_v47, %v4887_v47 }
  0xa4   : > { %3932 = vmatpush3.msra.mxu1 %v4646_v55  ;;  %3853 = vmatprep.subr.mxu0 %v7015_v54  ;;  %v7016_v55 = vld [vmem:[#allocation16_spill] sm:$0xff] }
  0xa5   : > { %3933 = vmatprep.subr.mxu1 %v4661_v8  ;;  %322 = vadd.xlane.f32.xlu1 %v321_v44  ;;  %v333_v8 = vsel %vm317_vm2, %v306_v50, 0.0  ;;  %v330_v28 = vsel %vm317_vm2, %v305_v34, 0.0 }
  0xa6   : > { %620 = vadd.xlane.f32.xlu0 %v619_v20  ;;  %3854 = vmatpush3.msra.mxu0 %v4478_v60  ;;  %v307_v60 = vmul.f32 %v4868_v7, %v4868_v7 }
  0xa7   : > { %3934 = vmatpush3.msra.mxu1 %v4680_v37  ;;  %3855 = vmatprep.subr.mxu0 %v7016_v55  ;;  %v339_v37 = vsel %vm317_vm2, %v308_v39, 0.0 }
  0xa8   : > { %3935 = vmatprep.subr.mxu1 %v4685_v43  ;;  %3856 = vmatpush3.msra.mxu0 %v4439_v51  ;;  %v310_v43 = vmul.f32 %v4925_v40, %v4925_v40  ;;  %v7021_v40 = vld [vmem:[#allocation7_spill] sm:$0xff] }
  0xa9   : > { %3936 = vmatpush3.msra.mxu1 %v4656_v1  ;;  %328 = vadd.xlane.f32.xlu1 %v327_v58 }
  0xaa   : > { %325 = vadd.xlane.f32.xlu0 %v324_v16  ;;  %3857 = vmatprep.subr.mxu0 %v4346_v30  ;;  %v336_v30 = vsel %vm317_vm2, %v307_v60, 0.0  ;;  %v345_v47 = vsel %vm317_vm2, %v310_v43, 0.0  ;;  %v6959_v43 = vlaneseq }
  0xab   : > { %3937 = vmatprep.subr.mxu1 %v4704_v49  ;;  %3858 = vmatpush3.msra.mxu0 %v4351_v31  ;;  %v309_v31 = vmul.f32 %v4906_v6, %v4906_v6  ;;  %v7020_v49 = vld [vmem:[#allocation12_spill] sm:$0xff]  ;;  %v311_v6 = vmul.f32 %v4944_v15, %v4944_v15  ;;  %v314_v15 = vmul.f32 %v5001_v59, %v5001_v59 }
  0xac   : > { %3938 = vmatpush3.msra.mxu1 %v4525_v19  ;;  %3859 = vmatprep.subr.mxu0 %v4312_v22  ;;  %v7017_v22 = vld [vmem:[#allocation9_spill] sm:$0xff]  ;;  %v7018_v19 = vld [vmem:[#allocation20_spill] sm:$0xff] }
  0xad   : > { %3939 = vmatprep.subr.mxu1 %v4651_v57  ;;  %334 = vadd.xlane.f32.xlu1 %v333_v8  ;;  %v7019_v57 = vld [vmem:[#allocation10_spill] sm:$0xff]  ;;  %v357_v29 = vsel %vm317_vm2, %v314_v15, 0.0 }
  0xae   : > { %331 = vadd.xlane.f32.xlu0 %v330_v28  ;;  %v5109_v51 = vpop.xlane.xlu1 %479  ;;  %3860 = vmatpush3.msra.mxu0 %v4317_v23  ;;  %v342_v23 = vsel %vm317_vm2, %v309_v31, 0.0 }
  0xaf   : > { %v5111_v1 = vpop.xlane.xlu0 %431  ;;  %3940 = vmatpush3.msra.mxu1 %v4483_v61  ;;  %3861 = vmatprep.subr.mxu0 %v7017_v22  ;;  %v312_v61 = vmul.f32 %v4963_v45, %v4963_v45  ;;  %v348_v45 = vsel %vm317_vm2, %v311_v6, 0.0 }
  0xb0   : > { %3941 = vmatprep.subr.mxu1 %v7018_v19  ;;  %3862 = vmatpush3.msra.mxu0 %v7019_v57  ;;  %v5230_v19 = vand.u32 127, %v6959_v43 }
  0xb1   : > { %3942 = vmatpush3.msra.mxu1 %v7020_v49  ;;  %340 = vadd.xlane.f32.xlu1 %v339_v37  ;;  %v351_v2 = vsel %vm317_vm2, %v312_v61, 0.0 }
  0xb2   : > { %337 = vadd.xlane.f32.xlu0 %v336_v30  ;;  %v5125_v41 = vpop.xlane.xlu1 %482  ;;  %3863 = vmatprep.subr.mxu0 %v7021_v40  ;;  %7028 = vst [vmem:[#allocation14_spill] sm:$0xff] %v5230_v19  ;;  %v1261_v61 = vadd.s32 4294967280, %v5230_v19  ;;  %v1268_v6 = vadd.s32 4294967272, %v5230_v19  ;;  %v1275_v40 = vadd.s32 4294967264, %v5230_v19  ;;  %v1317_v15 = vadd.s32 4294967216, %v5230_v19 }
  0xb3   : > { %v5127_v7 = vpop.xlane.xlu0 %434  ;;  %3943 = vmatprep.subr.mxu1 %v7022_v46  ;;  %3864 = vmatpush3.msra.mxu0 %v7023_v14  ;;  %v1282_v46 = vadd.s32 4294967256, %v5230_v19  ;;  %v1289_v14 = vadd.s32 4294967248, %v5230_v19 }
  0xb4   : > { %3944 = vmatpush3.msra.mxu1 %v7024_v63  ;;  %v1296_v63 = vadd.s32 4294967240, %v5230_v19 }
  0xb5   : > { %346 = vadd.xlane.f32.xlu1 %v345_v47  ;;  %v5237_v47 = vshrl.u32 %v6959_v43, 7 }
  0xb6   : > { %343 = vadd.xlane.f32.xlu0 %v342_v23  ;;  %v5139_v36 = vpop.xlane.xlu1 %485  ;;  %v1254_v23 = vadd.s32 4294967288, %v5230_v19 }
  0xb7   : > { %v5141_v52 = vpop.xlane.xlu0 %437  ;;  %7031 = vst [vmem:[#allocation23_spill] sm:$0xff] %v5237_v47  ;;  %v5261_v62 = vsub.s32 %v1261_v61, %v5237_v47  ;;  %v5270_v43 = vsub.s32 %v1282_v46, %v5237_v47  ;;  %v5278_v61 = vsub.s32 %v1296_v63, %v5237_v47  ;;  %v5287_v46 = vsub.s32 %v1317_v15, %v5237_v47 }
  0xb8   : > { %v5258_v42 = vsub.s32 %v1254_v23, %v5237_v47  ;;  %v1324_v23 = vadd.s32 4294967208, %v5230_v19 }
  0xb9   : > { %352 = vadd.xlane.f32.xlu1 %v351_v2  ;;  %v1303_v2 = vadd.s32 4294967232, %v5230_v19  ;;  %v1265_v15 = vrot.slane %v5141_v52, %v5261_v62 }
  0xba   : > { %349 = vadd.xlane.f32.xlu0 %v348_v45  ;;  %v5149_v32 = vpop.xlane.xlu1 %488  ;;  %v1310_v45 = vadd.s32 4294967224, %v5230_v19  ;;  %v1366_v63 = vrot.slane %v5125_v41, %v5258_v42 }
  0xbb   : > { %v5151_v56 = vpop.xlane.xlu0 %440 }
  0xbd   : > { %358 = vadd.xlane.f32.xlu1 %v357_v29 }
  0xbe   : > { %355 = vadd.xlane.f32.xlu0 %v354_v53  ;;  %v5159_v59 = vpop.xlane.xlu1 %530  ;;  %v5255_v53 = vsub.s32 %v5230_v19, %v5237_v47 }
  0xbf   : > { %v5161_v38 = vpop.xlane.xlu0 %527 }
  0xc1   : > { %364 = vadd.xlane.f32.xlu1 %v363_v13  ;;  %v5264_v13 = vsub.s32 %v1268_v6, %v5237_v47  ;;  %v5281_v6 = vsub.s32 %v1303_v2, %v5237_v47  ;;  %v1258_v2 = vrot.slane %v5127_v7, %v5258_v42  ;;  %v5311_v7 = vsub.s32 %v1324_v23, %v5237_v47 }
  0xc2   : > { %361 = vadd.xlane.f32.xlu0 %v360_v33  ;;  %v5165_v10 = vpop.xlane.xlu1 %491  ;;  %v5267_v33 = vsub.s32 %v1275_v40, %v5237_v47  ;;  %v5284_v40 = vsub.s32 %v1310_v45, %v5237_v47  ;;  %v1371_v45 = vrot.slane %v5139_v36, %v5261_v62 }
  0xc3   : > { %v5167_v9 = vpop.xlane.xlu0 %443  ;;  %v1272_v41 = vrot.slane %v5151_v56, %v5264_v13  ;;  %v1376_v52 = vrot.slane %v5149_v32, %v5264_v13 }
  0xc6   : > { %v5169_v18 = vpop.xlane.xlu1 %446 }
  0xc7   : > { %v5171_v5 = vpop.xlane.xlu0 %533 }
  0xc8   : > { %v1450_v32 = vrot.slane %v5171_v5, %v5261_v62  ;;  %v1286_v5 = vrot.slane %v5169_v18, %v5270_v43 }
  0xca   : > { %v5173_v26 = vpop.xlane.xlu1 %536 }
  0xcb   : > { %v5175_v21 = vpop.xlane.xlu0 %494 }
  0xce   : > { %v5177_v12 = vpop.xlane.xlu1 %578 }
  0xcf   : > { %v5179_v25 = vpop.xlane.xlu0 %575  ;;  %v1524_v18 = vrot.slane %v5177_v12, %v5258_v42 }
  0xd2   : > { %v5181_v11 = vpop.xlane.xlu1 %497 }
  0xd3   : > { %v5183_v0 = vpop.xlane.xlu0 %449 }
  0xd6   : > { %v5185_v27 = vpop.xlane.xlu1 %581 }
  0xd7   : > { %v5187_v35 = vpop.xlane.xlu0 %539 }
  0xda   : > { %v5189_v44 = vpop.xlane.xlu1 %500 }
  0xdb   : > { %v5191_v20 = vpop.xlane.xlu0 %452 }
  0xde   : > { %v5193_v24 = vpop.xlane.xlu1 %584 }
  0xdf   : > { %v5195_v3 = vpop.xlane.xlu0 %542 }
  0xe2   : > { %v5197_v17 = vpop.xlane.xlu1 %503 }
  0xe3   : > { %v5199_v48 = vpop.xlane.xlu0 %455 }
  0xe6   : > { %v5201_v54 = vpop.xlane.xlu1 %587 }
  0xe7   : > { %v5203_v58 = vpop.xlane.xlu0 %545 }
  0xea   : > { %v5205_v16 = vpop.xlane.xlu1 %506 }
  0xeb   : > { %v5207_v50 = vpop.xlane.xlu0 %458 }
  0xee   : > { %v5209_v34 = vpop.xlane.xlu1 %590 }
  0xef   : > { %v5211_v55 = vpop.xlane.xlu0 %548 }
  0xf2   : > { %v5213_v8 = vpop.xlane.xlu1 %509 }
  0xf3   : > { %v5215_v28 = vpop.xlane.xlu0 %461 }
  0xf6   : > { %v5217_v39 = vpop.xlane.xlu1 %593 }
  0xf7   : > { %v5219_v60 = vpop.xlane.xlu0 %551 }
  0xfa   : > { %v5221_v37 = vpop.xlane.xlu1 %512 }
  0xfb   : > { %v5223_v30 = vpop.xlane.xlu0 %464 }
  0xfc   : > { %7025 = vst [vmem:[#allocation11_spill] sm:$0xff] %v5223_v30 }
  0xfe   : > { %v5225_v31 = vpop.xlane.xlu1 %596 }
  0xff   : > { %7026 = vst [vmem:[#allocation18_spill] sm:$0xff] %v5225_v31  ;;  %v5227_v22 = vpop.xlane.xlu0 %554  ;;  %v1445_v31 = vrot.slane %v5159_v59, %v5258_v42 }
 0x100   : > { %7027 = vst [vmem:[#allocation15_spill] sm:$0xff] %v5227_v22  ;;  %v1338_v22 = vadd.s32 4294967192, %v5230_v19 }
 0x102   : > { %v5232_v57 = vpop.xlane.xlu1 %515  ;;  %v5333_v59 = vsub.s32 %v1338_v22, %v5237_v47  ;;  %v1455_v22 = vrot.slane %v5173_v26, %v5264_v13  ;;  %v1520_v26 = vrot.slane %v5179_v25, %v5255_v53 }
 0x103   : > { %7029 = vst [vmem:[#allocation17_spill] sm:$0xff] %v5232_v57  ;;  %v5234_v49 = vpop.xlane.xlu0 %467  ;;  %v1362_v57 = vrot.slane %v5109_v51, %v5255_v53  ;;  %v1253_v51 = vrot.slane %v5111_v1, %v5255_v53  ;;  %v1279_v1 = vrot.slane %v5167_v9, %v5267_v33 }
 0x104   : > { %7030 = vst [vmem:[#allocation22_spill] sm:$0xff] %v5234_v49 }
 0x105   : > { %v1367_v23 = vsel %vm1259_vm3, %v1366_v63, %v1362_v57  ;;  %v1381_v63 = vrot.slane %v5165_v10, %v5267_v33 }
 0x106   : > { %v5249_v4 = vpop.xlane.xlu1 %599 }
 0x107   : > { %7032 = vst [vmem:[#allocation19_spill] sm:$0xff] %v5249_v4  ;;  %v5251_v29 = vpop.xlane.xlu0 %557  ;;  %v5273_v4 = vsub.s32 %v1289_v14, %v5237_v47 }
 0x108   : > { %7033 = vst [vmem:[#allocation16_spill] sm:$0xff] %v5251_v29  ;;  %v1331_v29 = vadd.s32 4294967200, %v5230_v19 }
 0x10a   : > { %v5289_v49 = vpop.xlane.xlu1 %518  ;;  %v5314_v36 = vsub.s32 %v1331_v29, %v5237_v47  ;;  %v1260_v29 = vsel %vm1259_vm3, %v1258_v2, %v1253_v51 }
 0x10b   : > { %7034 = vst [vmem:[#allocation9_spill] sm:$0xff] %v5289_v49  ;;  %v5291_v14 = vpop.xlane.xlu0 %470  ;;  %v1352_v49 = vadd.s32 4294967176, %v5230_v19 }
 0x10c   : > { %7035 = vst [vmem:[#allocation20_spill] sm:$0xff] %v5291_v14  ;;  %v1345_v14 = vadd.s32 4294967184, %v5230_v19  ;;  %7036 = vst [vmem:[#allocation10_spill] sm:$0xff] %v5314_v36  ;;  %v1441_v19 = vrot.slane %v5161_v38, %v5255_v53  ;;  %v1372_v38 = vsel %vm1266_vm4, %v1371_v45, %v1367_v23  ;;  %v1267_v36 = vsel %vm1266_vm4, %v1265_v15, %v1260_v29 }
 0x10d   : > { %v1274_v57 = vsel %vm1273_vm5, %v1272_v41, %v1267_v36  ;;  %v1377_v2 = vsel %vm1273_vm5, %v1376_v52, %v1372_v38  ;;  %v1460_v41 = vrot.slane %v5187_v35, %v5267_v33  ;;  %v1396_v36 = vrot.slane %v5189_v44, %v5278_v61 }
 0x10e   : > { %v5324_v56 = vpop.xlane.xlu1 %602  ;;  %v5338_v9 = vsub.s32 %v1345_v14, %v5237_v47  ;;  %v1446_v45 = vsel %vm1259_vm3, %v1445_v31, %v1441_v19  ;;  %v1281_v14 = vsel %vm1280_vm6, %v1279_v1, %v1274_v57  ;;  %v1391_v31 = vrot.slane %v5181_v11, %v5273_v4 }
 0x10f   : > { %7037 = vst [vmem:[#allocation12_spill] sm:$0xff] %v5324_v56  ;;  %v5326_v30 = vpop.xlane.xlu0 %560  ;;  %v5341_v56 = vsub.s32 %v1352_v49, %v5237_v47  ;;  %v1386_v49 = vrot.slane %v5175_v21, %v5270_v43  ;;  %v1451_v10 = vsel %vm1266_vm4, %v1450_v32, %v1446_v45  ;;  %v1293_v19 = vrot.slane %v5183_v0, %v5273_v4 }
 0x110   : > { %v1529_v21 = vrot.slane %v5185_v27, %v5261_v62  ;;  %v1382_v12 = vsel %vm1280_vm6, %v1381_v63, %v1377_v2  ;;  %v1288_v25 = vsel %vm1287_vm7, %v1286_v5, %v1281_v14  ;;  %v1456_v53 = vsel %vm1273_vm5, %v1455_v22, %v1451_v10 }
 0x111   : > { %v1300_v11 = vrot.slane %v5191_v20, %v5278_v61  ;;  %v1387_v0 = vsel %vm1287_vm7, %v1386_v49, %v1382_v12  ;;  %v1534_v27 = vrot.slane %v5193_v24, %v5264_v13  ;;  %v1465_v35 = vrot.slane %v5195_v3, %v5270_v43 }
 0x112   : > { %v5355_v15 = vpop.xlane.xlu1 %521  ;;  %v1401_v44 = vrot.slane %v5197_v17, %v5281_v6  ;;  %v1525_v52 = vsel %vm1259_vm3, %v1524_v18, %v1520_v26  ;;  %v1392_v20 = vsel %vm1294_vm8, %v1391_v31, %v1387_v0  ;;  %v1307_v1 = vrot.slane %v5199_v48, %v5281_v6 }
 0x113   : > { %v5357_v51 = vpop.xlane.xlu0 %473  ;;  %v1539_v24 = vrot.slane %v5201_v54, %v5267_v33  ;;  %v1295_v3 = vsel %vm1294_vm8, %v1293_v19, %v1288_v25  ;;  %v1530_v13 = vsel %vm1266_vm4, %v1529_v21, %v1525_v52  ;;  %v1461_v17 = vsel %vm1280_vm6, %v1460_v41, %v1456_v53  ;;  %v7041_v31 = vld [vmem:[#allocation10_spill] sm:$0xff] }
 0x114   : > { %v1397_v23 = vsel %vm1301_vm9, %v1396_v36, %v1392_v20  ;;  %v1302_v29 = vsel %vm1301_vm9, %v1300_v11, %v1295_v3  ;;  %v1470_v32 = vrot.slane %v5203_v58, %v5273_v4  ;;  %v1406_v48 = vrot.slane %v5205_v16, %v5284_v40  ;;  %v7043_v25 = vld [vmem:[#allocation22_spill] sm:$0xff]  ;;  %v7044_v11 = vld [vmem:[#allocation16_spill] sm:$0xff]  ;;  %v7045_v20 = vld [vmem:[#allocation19_spill] sm:$0xff] }
 0x115   : > { %v1314_v54 = vrot.slane %v5207_v50, %v5284_v40  ;;  %v1535_v33 = vsel %vm1273_vm5, %v1534_v27, %v1530_v13  ;;  %v1466_v38 = vsel %vm1287_vm7, %v1465_v35, %v1461_v17  ;;  %v1402_v57 = vsel %vm1308_vm10, %v1401_v44, %v1397_v23 }
 0x116   : > { %v5386_v42 = vpop.xlane.xlu1 %605  ;;  %v1544_v63 = vrot.slane %v5209_v34, %v5270_v43  ;;  %v1309_v58 = vsel %vm1308_vm10, %v1307_v1, %v1302_v29  ;;  %v1540_v16 = vsel %vm1280_vm6, %v1539_v24, %v1535_v33  ;;  %v1475_v50 = vrot.slane %v5211_v55, %v5278_v61  ;;  %v7046_v24 = vld [vmem:[#allocation9_spill] sm:$0xff] }
 0x117   : > { %v5388_v62 = vpop.xlane.xlu0 %563  ;;  %v1411_v2 = vrot.slane %v5213_v8, %v5287_v46  ;;  %v1321_v45 = vrot.slane %v5215_v28, %v5287_v46  ;;  %v1549_v34 = vrot.slane %v5217_v39, %v5273_v4  ;;  %v1480_v43 = vrot.slane %v5219_v60, %v5281_v6  ;;  %v7038_v8 = vld [vmem:[#allocation11_spill] sm:$0xff]  ;;  %v7039_v39 = vld [vmem:[#allocation18_spill] sm:$0xff] }
 0x118   : > { %v1416_v14 = vrot.slane %v5221_v37, %v5311_v7  ;;  %v1471_v49 = vsel %vm1294_vm8, %v1470_v32, %v1466_v38  ;;  %v1407_v10 = vsel %vm1315_vm11, %v1406_v48, %v1402_v57  ;;  %v1316_v55 = vsel %vm1315_vm11, %v1314_v54, %v1309_v58  ;;  %v7040_v60 = vld [vmem:[#allocation15_spill] sm:$0xff]  ;;  %v7042_v37 = vld [vmem:[#allocation17_spill] sm:$0xff]  ;;  %v7047_v38 = vld [vmem:[#allocation20_spill] sm:$0xff] }
 0x119   : > { %v1328_v18 = vrot.slane %v7038_v8, %v5311_v7  ;;  %v1545_v28 = vsel %vm1287_vm7, %v1544_v63, %v1540_v16  ;;  %v1554_v4 = vrot.slane %v7039_v39, %v5278_v61  ;;  %v1485_v26 = vrot.slane %v7040_v60, %v5284_v40  ;;  %v7048_v16 = vld [vmem:[#allocation12_spill] sm:$0xff] }
 0x11a   : > { %v5412_v5 = vpop.xlane.xlu1 %524  ;;  %v1421_v19 = vrot.slane %v7042_v37, %v7041_v31  ;;  %v1476_v36 = vsel %vm1301_vm9, %v1475_v50, %v1471_v49  ;;  %v1412_v12 = vsel %vm1322_vm12, %v1411_v2, %v1407_v10  ;;  %v1335_v53 = vrot.slane %v7043_v25, %v7041_v31 }
 0x11b   : > { %v5414_v22 = vpop.xlane.xlu0 %476  ;;  %v1490_v0 = vrot.slane %v7044_v11, %v5287_v46  ;;  %v1323_v61 = vsel %vm1322_vm12, %v1321_v45, %v1316_v55  ;;  %v1550_v27 = vsel %vm1294_vm8, %v1549_v34, %v1545_v28  ;;  %v1481_v35 = vsel %vm1308_vm10, %v1480_v43, %v1476_v36 }
 0x11c   : > { %v1417_v44 = vsel %vm1329_vm13, %v1416_v14, %v1412_v12  ;;  %v1330_v52 = vsel %vm1329_vm13, %v1328_v18, %v1323_v61  ;;  %v1559_v1 = vrot.slane %v7045_v20, %v5281_v6  ;;  %v1426_v3 = vrot.slane %v7046_v24, %v5333_v59 }
 0x11d   : > { %v1495_v13 = vrot.slane %v5326_v30, %v5311_v7  ;;  %v1555_v17 = vsel %vm1301_vm9, %v1554_v4, %v1550_v27  ;;  %v1486_v23 = vsel %vm1315_vm11, %v1485_v26, %v1481_v35  ;;  %v1422_v29 = vsel %vm1336_vm14, %v1421_v19, %v1417_v44 }
 0x11e   : > { %v5442_v21 = vpop.xlane.xlu1 %608  ;;  %v1500_v32 = vrot.slane %v5388_v62, %v7041_v31  ;;  %v1337_v33 = vsel %vm1336_vm14, %v1335_v53, %v1330_v52  ;;  %v1491_v6 = vsel %vm1322_vm12, %v1490_v0, %v1486_v23  ;;  %v1342_v57 = vrot.slane %v7047_v38, %v5333_v59 }
 0x11f   : > { %v567_v41 = vpop.xlane.xlu0 %566  ;;  %v1564_v50 = vrot.slane %v7048_v16, %v5284_v40  ;;  %v1431_v2 = vrot.slane %v5355_v15, %v5338_v9  ;;  %v1349_v62 = vrot.slane %v5357_v51, %v5338_v9  ;;  %v1560_v34 = vsel %vm1308_vm10, %v1559_v1, %v1555_v17 }
 0x120   : > { %v1505_v30 = vrot.slane %v567_v41, %v5333_v59  ;;  %v1427_v43 = vsel %vm1343_vm15, %v1426_v3, %v1422_v29  ;;  %v1496_v14 = vsel %vm1329_vm13, %v1495_v13, %v1491_v6  ;;  %v1569_v49 = vrot.slane %v5386_v42, %v5287_v46 }
 0x121   : > { %v1501_v40 = vsel %vm1336_vm14, %v1500_v32, %v1496_v14  ;;  %v1436_v15 = vrot.slane %v5412_v5, %v5341_v56  ;;  %v1356_v51 = vrot.slane %v5414_v22, %v5341_v56  ;;  %v1574_v8 = vrot.slane %v5442_v21, %v5311_v7 }
 0x122   : > { %v612_v48 = vpop.xlane.xlu1 %611  ;;  %v928_v63 = vpop.f32.mrf.mxu0  ;;  %v1344_v39 = vsel %vm1343_vm15, %v1342_v57, %v1337_v33  ;;  %v1506_v4 = vsel %vm1343_vm15, %v1505_v30, %v1501_v40  ;;  %v1565_v5 = vsel %vm1315_vm11, %v1564_v50, %v1560_v34  ;;  %v1432_v37 = vsel %vm1350_vm0, %v1431_v2, %v1427_v43 }
 0x123   : > { %v570_v54 = vpop.xlane.xlu0 %569  ;;  %v1089_v58 = vpop.f32.mrf.mxu1  ;;  %v1579_v46 = vrot.slane %v612_v48, %v7041_v31  ;;  %v1351_v22 = vsel %vm1350_vm0, %v1349_v62, %v1344_v39  ;;  %v1570_v19 = vsel %vm1322_vm12, %v1569_v49, %v1565_v5  ;;  %v1694_v21 = vmul.f32 2.0, %v928_v63 }
 0x124   : > { %v1510_v45 = vrot.slane %v570_v54, %v5338_v9  ;;  %v930_v10 = vpop.f32.mrf.mxu0  ;;  %v5503_v25 = vsel %vm1357_vm1, %v1436_v15, %v1432_v37  ;;  %v5506_v53 = vsel %vm1357_vm1, %v1356_v51, %v1351_v22  ;;  %v1575_v11 = vsel %vm1329_vm13, %v1574_v8, %v1570_v19 }
 0x125   : > { %v1091_v55 = vpop.f32.mrf.mxu1  ;;  %v1695_v41 = vmul.f32 2.0, %v930_v10  ;;  %v1580_v35 = vsel %vm1336_vm14, %v1579_v46, %v1575_v11  ;;  %v1696_v44 = vmul.f32 2.0, %v1089_v58 }
 0x126   : > { %v615_v18 = vpop.xlane.xlu1 %614  ;;  %v934_v60 = vpop.f32.mrf.mxu0  ;;  %v1511_v7 = vsel %vm1350_vm0, %v1510_v45, %v1506_v4  ;;  %v1697_v3 = vmul.f32 2.0, %v1091_v55 }
 0x127   : > { %v573_v28 = vpop.xlane.xlu0 %572  ;;  %v1095_v26 = vpop.f32.mrf.mxu1  ;;  %v1584_v0 = vrot.slane %v615_v18, %v5333_v59  ;;  %v1698_v13 = vmul.f32 2.0, %v934_v60 }
 0x128   : > { %v1515_v42 = vrot.slane %v573_v28, %v5341_v56  ;;  %v936_v31 = vpop.f32.mrf.mxu0  ;;  %v1700_v29 = vmul.f32 2.0, %v1095_v26 }
 0x129   : > { %v1097_v12 = vpop.f32.mrf.mxu1  ;;  %v1699_v32 = vmul.f32 2.0, %v936_v31  ;;  %v1585_v6 = vsel %vm1343_vm15, %v1584_v0, %v1580_v35 }
 0x12a   : > { %v5500_v36 = vsel %vm1357_vm1, %v1515_v42, %v1511_v7  ;;  %v618_v61 = vpop.xlane.xlu1 %617  ;;  %v940_v52 = vpop.f32.mrf.mxu0  ;;  %v5520_v38 = vmul.f32 2.0, %v1097_v12 }
 0x12b   : > { %v320_v27 = vpop.xlane.xlu0 %319  ;;  %v1101_v20 = vpop.f32.mrf.mxu1  ;;  %v1589_v17 = vrot.slane %v618_v61, %v5338_v9  ;;  %v5522_v57 = vmul.f32 2.0, %v940_v52 }
 0x12c   : > { %v1630_v1 = vadd.f32 %v5506_v53, %v320_v27  ;;  %v1631_v24 = vadd.f32 %v5503_v25, %v320_v27  ;;  %v1632_v23 = vadd.f32 %v5500_v36, %v320_v27  ;;  %v942_v59 = vpop.f32.mrf.mxu0  ;;  %v5524_v30 = vmul.f32 2.0, %v1101_v20 }
 0x12d   : > { %v1103_v48 = vpop.f32.mrf.mxu1  ;;  %v1590_v34 = vsel %vm1350_vm0, %v1589_v17, %v1585_v6  ;;  %v5531_v43 = vmul.f32 2.0, %v942_v59 }
 0x12e   : > { %v5515_v54 = vsub.f32 %v1630_v1, %v1694_v21  ;;  %v5517_v33 = vsub.f32 %v1631_v24, %v1695_v41  ;;  %v323_v63 = vpop.xlane.xlu1 %322  ;;  %v946_v2 = vpop.f32.mrf.mxu0  ;;  %v5533_v14 = vsub.f32 %v1632_v23, %v1696_v44  ;;  %v5537_v10 = vmul.f32 2.0, %v1103_v48 }
 0x12f   : > { %v621_v9 = vpop.xlane.xlu0 %620  ;;  %v1634_v58 = vadd.f32 %v5506_v53, %v323_v63  ;;  %v1635_v16 = vadd.f32 %v5503_v25, %v323_v63  ;;  %v1636_v50 = vadd.f32 %v5500_v36, %v323_v63  ;;  %v1107_v62 = vpop.f32.mrf.mxu1 }
 0x130   : > { %v1594_v45 = vrot.slane %v621_v9, %v5341_v56  ;;  %v1825_v49 = vmin.f32 %v5515_v54, %v5517_v33  ;;  %v948_v40 = vpop.f32.mrf.mxu0  ;;  %v1706_v56 = vmul.f32 2.0, %v946_v2  ;;  %v5546_v18 = vmul.f32 2.0, %v1107_v62 }
 0x131   : > { %v1109_v15 = vpop.f32.mrf.mxu1  ;;  %v5542_v51 = vsub.f32 %v1634_v58, %v1698_v13  ;;  %v5544_v8 = vsub.f32 %v1635_v16, %v1699_v32  ;;  %v5551_v46 = vsub.f32 %v1636_v50, %v1700_v29  ;;  %v1707_v42 = vmul.f32 2.0, %v948_v40 }
 0x132   : > { %v5540_v55 = vsel %vm1357_vm1, %v1594_v45, %v1590_v34  ;;  %v329_v28 = vpop.xlane.xlu1 %328  ;;  %v5553_v60 = vmul.f32 2.0, %v1109_v15  ;;  %v952_v5 = vpop.f32.mrf.mxu0  ;;  %v1826_v22 = vmin.f32 %v1825_v49, %v5533_v14 }
 0x133   : > { %v5548_v39 = vpop.xlane.xlu0 %325  ;;  %v1633_v4 = vadd.f32 %v5540_v55, %v320_v27  ;;  %v1642_v26 = vadd.f32 %v5506_v53, %v329_v28  ;;  %v1113_v37 = vpop.f32.mrf.mxu1  ;;  %v1643_v7 = vadd.f32 %v5503_v25, %v329_v28  ;;  %v1644_v19 = vadd.f32 %v5500_v36, %v329_v28 }
 0x134   : > { %v5559_v21 = vmul.f32 2.0, %v952_v5  ;;  %v1638_v41 = vadd.f32 %v5506_v53, %v5548_v39  ;;  %v5563_v31 = vmul.f32 2.0, %v1113_v37  ;;  %v954_v12 = vpop.f32.mrf.mxu0  ;;  %v1637_v61 = vadd.f32 %v5540_v55, %v323_v63 }
 0x135   : > { %v1115_v11 = vpop.f32.mrf.mxu1  ;;  %v5565_v0 = vsub.f32 %v1633_v4, %v1697_v3  ;;  %v1830_v27 = vmin.f32 %v5542_v51, %v5544_v8  ;;  %v1639_v35 = vadd.f32 %v5503_v25, %v5548_v39  ;;  %v1640_v44 = vadd.f32 %v5500_v36, %v5548_v39 }
 0x136   : > { %v5574_v52 = vmul.f32 2.0, %v954_v12  ;;  %v335_v20 = vpop.xlane.xlu1 %334  ;;  %v1645_v24 = vadd.f32 %v5540_v55, %v329_v28  ;;  %v5579_v3 = vmul.f32 2.0, %v1115_v11  ;;  %v958_v13 = vpop.f32.mrf.mxu0  ;;  %v5583_v32 = vsub.f32 %v1642_v26, %v1706_v56 }
 0x137   : > { %v5576_v1 = vpop.xlane.xlu0 %331  ;;  %v1650_v17 = vadd.f32 %v5506_v53, %v335_v20  ;;  %v1119_v23 = vpop.f32.mrf.mxu1  ;;  %v1652_v29 = vadd.f32 %v5500_v36, %v335_v20  ;;  %v1714_v59 = vmul.f32 2.0, %v958_v13  ;;  %v5589_v63 = vsub.f32 %v1643_v7, %v1707_v42 }
 0x138   : > { %v1716_v48 = vmul.f32 2.0, %v1119_v23  ;;  %v5587_v6 = vadd.f32 %v5506_v53, %v5576_v1  ;;  %v5593_v9 = vadd.f32 %v5503_v25, %v5576_v1  ;;  %v960_v58 = vpop.f32.mrf.mxu0  ;;  %v1827_v50 = vmin.f32 %v1826_v22, %v5565_v0 }
 0x139   : > { %v1121_v16 = vpop.f32.mrf.mxu1  ;;  %v5597_v2 = vsub.f32 %v1637_v61, %v5520_v38  ;;  %v1831_v62 = vmin.f32 %v1830_v27, %v5551_v46  ;;  %v5602_v45 = vadd.f32 %v5500_v36, %v5576_v1  ;;  %v1651_v34 = vadd.f32 %v5503_v25, %v335_v20 }
 0x13a   : > { %v1715_v49 = vmul.f32 2.0, %v960_v58  ;;  %v1717_v40 = vmul.f32 2.0, %v1121_v16  ;;  %v5605_v56 = vsub.f32 %v1650_v17, %v1714_v59  ;;  %v5607_v28 = vsub.f32 %v1652_v29, %v1716_v48  ;;  %1828 = vmin.xlane.f32.xlu0 %v1827_v50  ;;  %v964_v42 = vpop.f32.mrf.mxu0  ;;  %v341_v17 = vpop.xlane.xlu1 %340 }
 0x13b   : > { %v338_v15 = vpop.xlane.xlu0 %337  ;;  %v1653_v4 = vadd.f32 %v5540_v55, %v335_v20  ;;  %v1832_v38 = vmin.f32 %v1831_v62, %v5597_v2  ;;  %v1125_v26 = vpop.f32.mrf.mxu1  ;;  %v1718_v37 = vmul.f32 2.0, %v964_v42  ;;  %v5621_v20 = vsub.f32 %v1644_v19, %v5546_v18 }
 0x13c   : > { %v5611_v5 = vsub.f32 %v1651_v34, %v1715_v49  ;;  %v1654_v22 = vadd.f32 %v5506_v53, %v338_v15  ;;  %v5615_v7 = vadd.f32 %v5500_v36, %v338_v15  ;;  %v966_v11 = vpop.f32.mrf.mxu0  ;;  %v1655_v61 = vadd.f32 %v5503_v25, %v338_v15 }
 0x13d   : > { %v5617_v12 = vsub.f32 %v1653_v4, %v1717_v40  ;;  %1833 = vmin.xlane.f32.xlu1 %v1832_v38  ;;  %v1127_v27 = vpop.f32.mrf.mxu1  ;;  %v1840_v13 = vmin.f32 %v5583_v32, %v5589_v63  ;;  %v1719_v23 = vmul.f32 2.0, %v966_v11  ;;  %v1657_v29 = vadd.f32 %v5540_v55, %v338_v15 }
 0x13e   : > { %v1721_v59 = vmul.f32 2.0, %v1127_v27  ;;  %v5627_v48 = vsub.f32 %v1645_v24, %v5553_v60  ;;  %v1641_v16 = vadd.f32 %v5540_v55, %v5548_v39  ;;  %v5633_v50 = vsub.f32 %v1638_v41, %v5522_v57  ;;  %v970_v19 = vpop.f32.mrf.mxu0 }
 0x13f   : > { %v1841_v58 = vmin.f32 %v1840_v13, %v5621_v20  ;;  %v5636_v18 = vsub.f32 %v1639_v35, %v5531_v43  ;;  %v1131_v62 = vpop.f32.mrf.mxu1  ;;  %v1850_v34 = vmin.f32 %v5605_v56, %v5611_v5  ;;  %v5640_v49 = vmul.f32 2.0, %v1125_v26 }
 0x140   : > { %v5642_v60 = vsub.f32 %v1654_v22, %v1718_v37  ;;  %v5644_v24 = vsub.f32 %v1655_v61, %v1719_v23  ;;  %v5646_v40 = vsub.f32 %v1657_v29, %v1721_v59  ;;  %v5650_v57 = vsub.f32 %v1640_v44, %v5524_v30  ;;  %v972_v41 = vpop.f32.mrf.mxu0  ;;  %v344_v61 = vpop.xlane.xlu0 %343 }
 0x141   : > { %v1842_v39 = vmin.f32 %v1841_v58, %v5627_v48  ;;  %v1835_v43 = vmin.f32 %v5633_v50, %v5636_v18  ;;  %v1133_v35 = vpop.f32.mrf.mxu1  ;;  %v5655_v15 = vsub.f32 %v1641_v16, %v5537_v10  ;;  %v1658_v4 = vadd.f32 %v5506_v53, %v341_v17 }
 0x142   : > { %v1722_v38 = vmul.f32 2.0, %v970_v19  ;;  %v1724_v42 = vmul.f32 2.0, %v1131_v62  ;;  %v1660_v37 = vadd.f32 %v5500_v36, %v341_v17  ;;  %v1659_v30 = vadd.f32 %v5503_v25, %v341_v17  ;;  %v976_v22 = vpop.f32.mrf.mxu0 }
 0x143   : > { %1843 = vmin.xlane.f32.xlu1 %v1842_v39  ;;  %v1836_v26 = vmin.f32 %v1835_v43, %v5650_v57  ;;  %v1723_v44 = vmul.f32 2.0, %v972_v41  ;;  %v1137_v11 = vpop.f32.mrf.mxu1  ;;  %v1661_v27 = vadd.f32 %v5540_v55, %v341_v17  ;;  %v1725_v13 = vmul.f32 2.0, %v1133_v35 }
 0x144   : > { %v1649_v10 = vadd.f32 %v5540_v55, %v5576_v1  ;;  %v5666_v23 = vsub.f32 %v5587_v6, %v5559_v21  ;;  %v1855_v29 = vmin.f32 %v5642_v60, %v5644_v24  ;;  %v5675_v16 = vsub.f32 %v5593_v9, %v5574_v52  ;;  %v978_v17 = vpop.f32.mrf.mxu0 }
 0x145   : > { %v1837_v59 = vmin.f32 %v1836_v26, %v5655_v15  ;;  %v5671_v58 = vsub.f32 %v1659_v30, %v1723_v44  ;;  %v1139_v19 = vpop.f32.mrf.mxu1  ;;  %v5677_v62 = vsub.f32 %v1658_v4, %v1722_v38  ;;  %v5679_v1 = vsub.f32 %v1660_v37, %v1724_v42  ;;  %v347_v4 = vpop.xlane.xlu1 %346 }
 0x146   : > { %v5681_v39 = vsub.f32 %v1661_v27, %v1725_v13  ;;  %v5685_v21 = vsub.f32 %v5602_v45, %v5563_v31  ;;  %v5688_v6 = vsub.f32 %v1649_v10, %v5579_v3  ;;  %v1845_v52 = vmin.f32 %v5666_v23, %v5675_v16  ;;  %v982_v41 = vpop.f32.mrf.mxu0 }
 0x147   : > { %7049 = vst [vmem:[#allocation7_spill] sm:$0xff] %v5671_v58  ;;  %7050 = vst [vmem:[#allocation21_spill] sm:$0xff] %v5677_v62  ;;  %1838 = vmin.xlane.f32.xlu0 %v1837_v59  ;;  %v1726_v9 = vmul.f32 2.0, %v976_v22  ;;  %v1728_v43 = vmul.f32 2.0, %v1137_v11  ;;  %v1143_v35 = vpop.f32.mrf.mxu1  ;;  %v1662_v38 = vadd.f32 %v5506_v53, %v344_v61  ;;  %v1851_v42 = vmin.f32 %v1850_v34, %v5607_v28 }
 0x148   : > { %7051 = vst [vmem:[#allocation8_spill] sm:$0xff] %v5679_v1  ;;  %7052 = vst [vmem:[#allocation13_spill] sm:$0xff] %v5681_v39  ;;  %v1663_v26 = vadd.f32 %v5503_v25, %v344_v61  ;;  %v1727_v31 = vmul.f32 2.0, %v978_v17  ;;  %v1860_v45 = vmin.f32 %v5677_v62, %v5671_v58  ;;  %v1846_v3 = vmin.f32 %v1845_v52, %v5685_v21  ;;  %v984_v44 = vpop.f32.mrf.mxu0 }
 0x149   : > { %v1664_v37 = vadd.f32 %v5500_v36, %v344_v61  ;;  %v1729_v30 = vmul.f32 2.0, %v1139_v19  ;;  %v1145_v22 = vpop.f32.mrf.mxu1  ;;  %v1852_v11 = vmin.f32 %v1851_v42, %v5617_v12  ;;  %v1665_v13 = vadd.f32 %v5540_v55, %v344_v61  ;;  %v350_v19 = vpop.xlane.xlu0 %349 }
 0x14a   : > { %v5700_v27 = vsub.f32 %v1663_v26, %v1727_v31  ;;  %v1730_v34 = vmul.f32 2.0, %v982_v41  ;;  %v1847_v10 = vmin.f32 %v1846_v3, %v5688_v6  ;;  %v5704_v59 = vsub.f32 %v1662_v38, %v1726_v9  ;;  %v988_v47 = vpop.f32.mrf.mxu0 }
 0x14b   : > { %v5706_v17 = vsub.f32 %v1664_v37, %v1728_v43  ;;  %v1666_v52 = vadd.f32 %v5506_v53, %v347_v4  ;;  %v1149_v58 = vpop.f32.mrf.mxu1  ;;  %1853 = vmin.xlane.f32.xlu1 %v1852_v11  ;;  %v5709_v62 = vsub.f32 %v1665_v13, %v1729_v30  ;;  %v1668_v42 = vadd.f32 %v5500_v36, %v347_v4 }
 0x14c   : > { %7053 = vst [vmem:[#allocation11_spill] sm:$0xff] %v5700_v27  ;;  %7054 = vst [vmem:[#allocation18_spill] sm:$0xff] %v5704_v59  ;;  %v1732_v26 = vmul.f32 2.0, %v1143_v35  ;;  %v5714_v61 = vsub.f32 %v5615_v7, %v5640_v49  ;;  %1848 = vmin.xlane.f32.xlu0 %v1847_v10  ;;  %v1865_v9 = vmin.f32 %v5704_v59, %v5700_v27  ;;  %v1731_v41 = vmul.f32 2.0, %v984_v44  ;;  %v990_v31 = vpop.f32.mrf.mxu0  ;;  %v353_v44 = vpop.xlane.xlu1 %352 }
 0x14d   : > { %7055 = vst [vmem:[#allocation15_spill] sm:$0xff] %v5706_v17  ;;  %7056 = vst [vmem:[#allocation10_spill] sm:$0xff] %v5709_v62  ;;  %v1667_v43 = vadd.f32 %v5503_v25, %v347_v4  ;;  %v1733_v38 = vmul.f32 2.0, %v1145_v22  ;;  %v1151_v3 = vpop.f32.mrf.mxu1  ;;  %v5719_v37 = vsub.f32 %v1666_v52, %v1730_v34  ;;  %v1669_v35 = vadd.f32 %v5540_v55, %v347_v4 }
 0x14e   : > { %7057 = vst [vmem:[#allocation17_spill] sm:$0xff] %v5714_v61  ;;  %v1856_v30 = vmin.f32 %v1855_v29, %v5714_v61  ;;  %v1734_v11 = vmul.f32 2.0, %v988_v47  ;;  %v1670_v7 = vadd.f32 %v5506_v53, %v350_v19  ;;  %v1736_v49 = vmul.f32 2.0, %v1149_v58  ;;  %v994_v27 = vpop.f32.mrf.mxu0 }
 0x14f   : > { %7058 = vst [vmem:[#allocation22_spill] sm:$0xff] %v5719_v37  ;;  %v5723_v13 = vsub.f32 %v1667_v43, %v1731_v41  ;;  %v1861_v10 = vmin.f32 %v1860_v45, %v5679_v1  ;;  %v1155_v59 = vpop.f32.mrf.mxu1  ;;  %v5727_v22 = vsub.f32 %v1668_v42, %v1732_v26  ;;  %v1671_v52 = vadd.f32 %v5503_v25, %v350_v19 }
 0x150   : > { %v1857_v34 = vmin.f32 %v1856_v30, %v5646_v40  ;;  %v1735_v29 = vmul.f32 2.0, %v990_v31  ;;  %v5731_v61 = vsub.f32 %v1669_v35, %v1733_v38  ;;  %v5733_v47 = vsub.f32 %v1670_v7, %v1734_v11  ;;  %v996_v43 = vpop.f32.mrf.mxu0 }
 0x151   : > { %7059 = vst [vmem:[#allocation16_spill] sm:$0xff] %v5723_v13  ;;  %7060 = vst [vmem:[#allocation19_spill] sm:$0xff] %v5727_v22  ;;  %v1672_v4 = vadd.f32 %v5500_v36, %v350_v19  ;;  %v1862_v58 = vmin.f32 %v1861_v10, %v5681_v39  ;;  %v1157_v45 = vpop.f32.mrf.mxu1  ;;  %v1870_v42 = vmin.f32 %v5719_v37, %v5723_v13  ;;  %v1737_v41 = vmul.f32 2.0, %v1151_v3  ;;  %v356_v10 = vpop.xlane.xlu0 %355 }
 0x152   : > { %7061 = vst [vmem:[#allocation9_spill] sm:$0xff] %v5731_v61  ;;  %7062 = vst [vmem:[#allocation20_spill] sm:$0xff] %v5733_v47  ;;  %1858 = vmin.xlane.f32.xlu0 %v1857_v34  ;;  %v5739_v26 = vsub.f32 %v1671_v52, %v1735_v29  ;;  %v1738_v30 = vmul.f32 2.0, %v994_v27  ;;  %v1673_v38 = vadd.f32 %v5540_v55, %v350_v19  ;;  %v1740_v31 = vmul.f32 2.0, %v1155_v59  ;;  %v1000_v11 = vpop.f32.mrf.mxu0 }
 0x153   : > { %v5741_v1 = vsub.f32 %v1672_v4, %v1736_v49  ;;  %1863 = vmin.xlane.f32.xlu1 %v1862_v58  ;;  %v1866_v35 = vmin.f32 %v1865_v9, %v5706_v17  ;;  %v1161_v7 = vpop.f32.mrf.mxu1  ;;  %v1674_v34 = vadd.f32 %v5506_v53, %v353_v44  ;;  %v1676_v39 = vadd.f32 %v5500_v36, %v353_v44 }
 0x154   : > { %7063 = vst [vmem:[#allocation12_spill] sm:$0xff] %v5739_v26  ;;  %v1675_v52 = vadd.f32 %v5503_v25, %v353_v44  ;;  %v1739_v29 = vmul.f32 2.0, %v996_v43  ;;  %v1875_v27 = vmin.f32 %v5733_v47, %v5739_v26  ;;  %v5750_v3 = vsub.f32 %v1673_v38, %v1737_v41  ;;  %v1002_v49 = vpop.f32.mrf.mxu0  ;;  %v359_v26 = vpop.xlane.xlu1 %358 }
 0x155   : > { %7064 = vst [vmem:[#allocation24_spill] sm:$0xff] %v5741_v1  ;;  %v1867_v19 = vmin.f32 %v1866_v35, %v5709_v62  ;;  %v1741_v59 = vmul.f32 2.0, %v1157_v45  ;;  %v1163_v9 = vpop.f32.mrf.mxu1  ;;  %v5753_v4 = vsub.f32 %v1674_v34, %v1738_v30  ;;  %v1677_v13 = vadd.f32 %v5540_v55, %v353_v44 }
 0x156   : > { %v5755_v58 = vsub.f32 %v1675_v52, %v1739_v29  ;;  %v1742_v37 = vmul.f32 2.0, %v1000_v11  ;;  %v5758_v17 = vsub.f32 %v1676_v39, %v1740_v31  ;;  %v1678_v43 = vadd.f32 %v5506_v53, %v356_v10  ;;  %v1006_v35 = vpop.f32.mrf.mxu0 }
 0x157   : > { %7065 = vst [vmem:[#allocation25_spill] sm:$0xff] %v5753_v4  ;;  %1868 = vmin.xlane.f32.xlu0 %v1867_v19  ;;  %v1680_v41 = vadd.f32 %v5500_v36, %v356_v10  ;;  %v1871_v38 = vmin.f32 %v1870_v42, %v5727_v22  ;;  %v1167_v45 = vpop.f32.mrf.mxu1  ;;  %v5763_v47 = vsub.f32 %v1677_v13, %v1741_v59  ;;  %v1744_v30 = vmul.f32 2.0, %v1161_v7 }
 0x158   : > { %7066 = vst [vmem:[#allocation26_spill] sm:$0xff] %v5755_v58  ;;  %7067 = vst [vmem:[#allocation27_spill] sm:$0xff] %v5758_v17  ;;  %v1679_v34 = vadd.f32 %v5503_v25, %v356_v10  ;;  %v1743_v52 = vmul.f32 2.0, %v1002_v49  ;;  %v1880_v39 = vmin.f32 %v5753_v4, %v5755_v58  ;;  %v5768_v44 = vsub.f32 %v1678_v43, %v1742_v37  ;;  %v1008_v29 = vpop.f32.mrf.mxu0 }
 0x159   : > { %v1872_v31 = vmin.f32 %v1871_v38, %v5731_v61  ;;  %v1745_v11 = vmul.f32 2.0, %v1163_v9  ;;  %v1169_v19 = vpop.f32.mrf.mxu1  ;;  %v1681_v22 = vadd.f32 %v5540_v55, %v356_v10  ;;  %v1746_v13 = vmul.f32 2.0, %v1006_v35  ;;  %v362_v38 = vpop.xlane.xlu0 %361 }
 0x15a   : > { %7068 = vst [vmem:[#allocation28_spill] sm:$0xff] %v5768_v44  ;;  %v5771_v42 = vsub.f32 %v1679_v34, %v1743_v52  ;;  %v1748_v59 = vmul.f32 2.0, %v1167_v45  ;;  %v1682_v7 = vadd.f32 %v5506_v53, %v359_v26  ;;  %v1876_v49 = vmin.f32 %v1875_v27, %v5741_v1  ;;  %v1012_v43 = vpop.f32.mrf.mxu0  ;;  %v365_v61 = vpop.xlane.xlu1 %364 }
 0x15b   : > { %1873 = vmin.xlane.f32.xlu1 %v1872_v31  ;;  %v1683_v58 = vadd.f32 %v5503_v25, %v359_v26  ;;  %v1747_v37 = vmul.f32 2.0, %v1008_v29  ;;  %v1173_v4 = vpop.f32.mrf.mxu1  ;;  %v5777_v9 = vsub.f32 %v1680_v41, %v1744_v30  ;;  %v5781_v52 = vsub.f32 %v1681_v22, %v1745_v11 }
 0x15c   : > { %7069 = vst [vmem:[#allocation29_spill] sm:$0xff] %v5771_v42  ;;  %v1885_v34 = vmin.f32 %v5768_v44, %v5771_v42  ;;  %v1684_v10 = vadd.f32 %v5500_v36, %v359_v26  ;;  %v5784_v35 = vsub.f32 %v1682_v7, %v1746_v13  ;;  %v1877_v45 = vmin.f32 %v1876_v49, %v5750_v3  ;;  %v1014_v29 = vpop.f32.mrf.mxu0 }
 0x15d   : > { %v5787_v27 = vsub.f32 %v1683_v58, %v1747_v37  ;;  %v1749_v31 = vmul.f32 2.0, %v1169_v19  ;;  %v1175_v1 = vpop.f32.mrf.mxu1  ;;  %v1685_v41 = vadd.f32 %v5540_v55, %v359_v26  ;;  %v1750_v30 = vmul.f32 2.0, %v1012_v43 }
 0x15e   : > { %v5789_v62 = vsub.f32 %v1684_v10, %v1748_v59  ;;  %v1881_v22 = vmin.f32 %v1880_v39, %v5758_v17  ;;  %1878 = vmin.xlane.f32.xlu0 %v1877_v45  ;;  %v1686_v11 = vadd.f32 %v5506_v53, %v362_v38  ;;  %v1752_v13 = vmul.f32 2.0, %v1173_v4  ;;  %v1018_v58 = vpop.f32.mrf.mxu0 }
 0x15f   : > { %7070 = vst [vmem:[#allocation30_spill] sm:$0xff] %v5787_v27  ;;  %v1687_v7 = vadd.f32 %v5503_v25, %v362_v38  ;;  %v1751_v49 = vmul.f32 2.0, %v1014_v29  ;;  %v1179_v37 = vpop.f32.mrf.mxu1  ;;  %v1890_v19 = vmin.f32 %v5784_v35, %v5787_v27  ;;  %v5797_v42 = vsub.f32 %v1685_v41, %v1749_v31 }
 0x160   : > { %v1688_v59 = vadd.f32 %v5500_v36, %v362_v38  ;;  %v1882_v26 = vmin.f32 %v1881_v22, %v5763_v47  ;;  %v5801_v43 = vsub.f32 %v1686_v11, %v1750_v30  ;;  %v1753_v10 = vmul.f32 2.0, %v1175_v1  ;;  %v1020_v45 = vpop.f32.mrf.mxu0 }
 0x161   : > { %v5803_v39 = vsub.f32 %v1687_v7, %v1751_v49  ;;  %v1754_v4 = vmul.f32 2.0, %v1018_v58  ;;  %v1689_v29 = vadd.f32 %v5540_v55, %v362_v38  ;;  %v1690_v44 = vadd.f32 %v5506_v53, %v365_v61  ;;  %v1181_v41 = vpop.f32.mrf.mxu1 }
 0x162   : > { %1883 = vmin.xlane.f32.xlu1 %v1882_v26  ;;  %v1756_v17 = vmul.f32 2.0, %v1179_v37  ;;  %v1886_v31 = vmin.f32 %v1885_v34, %v5777_v9  ;;  %v5808_v27 = vsub.f32 %v1688_v59, %v1752_v13  ;;  %v1691_v22 = vadd.f32 %v5503_v25, %v365_v61 }
 0x163   : > { %v1895_v30 = vmin.f32 %v5801_v43, %v5803_v39  ;;  %v1755_v11 = vmul.f32 2.0, %v1020_v45  ;;  %v5813_v1 = vsub.f32 %v1689_v29, %v1753_v10  ;;  %v5815_v7 = vsub.f32 %v1690_v44, %v1754_v4 }
 0x164   : > { %v1692_v38 = vadd.f32 %v5500_v36, %v365_v61  ;;  %v1887_v53 = vmin.f32 %v1886_v31, %v5781_v52  ;;  %v1757_v34 = vmul.f32 2.0, %v1181_v41  ;;  %v1891_v13 = vmin.f32 %v1890_v19, %v5789_v62 }
 0x165   : > { %v5819_v49 = vsub.f32 %v1691_v22, %v1755_v11  ;;  %v1896_v58 = vmin.f32 %v1895_v30, %v5808_v27  ;;  %v1693_v44 = vadd.f32 %v5540_v55, %v365_v61 }
 0x166   : > { %v5823_v37 = vsub.f32 %v1692_v38, %v1756_v17  ;;  %1888 = vmin.xlane.f32.xlu0 %v1887_v53  ;;  %v1892_v59 = vmin.f32 %v1891_v13, %v5797_v42  ;;  %v7071_v17 = vld [vmem:[#allocation14_spill] sm:$0xff] }
 0x167   : > { %v1900_v25 = vmin.f32 %v5815_v7, %v5819_v49  ;;  %v1897_v36 = vmin.f32 %v1896_v58, %v5813_v1  ;;  %v5830_v26 = vsub.f32 %v1693_v44, %v1757_v34  ;;  %v5835_v4 = vadd.s32 128, %v7071_v17 }
 0x168   : > { %1893 = vmin.xlane.f32.xlu1 %v1892_v59  ;;  %v5838_v29 = vadd.s32 256, %v7071_v17  ;;  %v5846_v41 = vadd.s32 384, %v7071_v17 }
 0x169   : > { %v1901_v10 = vmin.f32 %v1900_v25, %v5823_v37 }
 0x16a   : > { %1898 = vmin.xlane.f32.xlu0 %v1897_v36 }
 0x16b   : > { %v1902_v19 = vmin.f32 %v1901_v10, %v5830_v26 }
 0x16d   : > { %1903 = vmin.xlane.f32.xlu1 %v1902_v19 }
 0x1c3   : > { %v1829_v45 = vpop.xlane.xlu0 %1828 }
 0x1c4   : > { %vm1905_vm3 = vcmp.le.f32.partialorder %v5515_v54, %v1829_v45  ;;  %vm1906_vm4 = vcmp.le.f32.partialorder %v5517_v33, %v1829_v45  ;;  %vm1907_vm5 = vcmp.le.f32.partialorder %v5533_v14, %v1829_v45  ;;  %vm1908_vm10 = vcmp.le.f32.partialorder %v5565_v0, %v1829_v45 }
 0x1c5   : > { %v1969_v55 = vsel %vm1905_vm3, %v7071_v17, 512  ;;  %v1970_v61 = vsel %vm1906_vm4, %v5835_v4, 512  ;;  %v1971_v14 = vsel %vm1907_vm5, %v5838_v29, 512 }
 0x1c6   : > { %v1834_v31 = vpop.xlane.xlu1 %1833  ;;  %vm2033_vm6 = vcmp.lt.s32.totalorder %v1969_v55, %v1970_v61 }
 0x1c7   : > { %vm1909_vm7 = vcmp.le.f32.partialorder %v5542_v51, %v1834_v31  ;;  %vm1910_vm8 = vcmp.le.f32.partialorder %v5544_v8, %v1834_v31  ;;  %vm1911_vm9 = vcmp.le.f32.partialorder %v5551_v46, %v1834_v31  ;;  %v2034_v30 = vsel %vm2033_vm6, %v1969_v55, %v1970_v61 }
 0x1c8   : > { %v1973_v54 = vsel %vm1909_vm7, %v7071_v17, 512  ;;  %v1974_v33 = vsel %vm1910_vm8, %v5835_v4, 512  ;;  %v1975_v22 = vsel %vm1911_vm9, %v5838_v29, 512  ;;  %vm2035_vm12 = vcmp.lt.s32.totalorder %v2034_v30, %v1971_v14 }
 0x1c9   : > { %vm2053_vm11 = vcmp.lt.s32.totalorder %v1973_v54, %v1974_v33  ;;  %vm1912_vm13 = vcmp.le.f32.partialorder %v5597_v2, %v1834_v31  ;;  %v1972_v51 = vsel %vm1908_vm10, %v5846_v41, 512  ;;  %v2036_v8 = vsel %vm2035_vm12, %v2034_v30, %v1971_v14  ;;  %v7072_v30 = vld [vmem:[#allocation17_spill] sm:$0xff] }
 0x1ca   : > { %v2054_v11 = vsel %vm2053_vm11, %v1973_v54, %v1974_v33  ;;  %vm2037_vm15 = vcmp.lt.s32.totalorder %v2036_v8, %v1972_v51  ;;  %v1976_v34 = vsel %vm1912_vm13, %v5846_v41, 512 }
 0x1cb   : > { %vm2055_vm14 = vcmp.lt.s32.totalorder %v2054_v11, %v1975_v22  ;;  %v5865_v2 = vsel %vm2037_vm15, %v2036_v8, %v1972_v51 }
 0x1cc   : > { %v1844_v46 = vpop.xlane.xlu1 %1843  ;;  %v2056_v0 = vsel %vm2055_vm14, %v2054_v11, %v1975_v22 }
 0x1cd   : > { %vm1917_vm0 = vcmp.le.f32.partialorder %v5583_v32, %v1844_v46  ;;  %vm1918_vm1 = vcmp.le.f32.partialorder %v5589_v63, %v1844_v46  ;;  %vm1919_vm3 = vcmp.le.f32.partialorder %v5621_v20, %v1844_v46  ;;  %vm1920_vm4 = vcmp.le.f32.partialorder %v5627_v48, %v1844_v46 }
 0x1ce   : > { %v1981_v38 = vsel %vm1917_vm0, %v7071_v17, 512  ;;  %v1982_v53 = vsel %vm1918_vm1, %v5835_v4, 512  ;;  %vm2057_vm6 = vcmp.lt.s32.totalorder %v2056_v0, %v1976_v34  ;;  %v1983_v13 = vsel %vm1919_vm3, %v5838_v29, 512 }
 0x1cf   : > { %vm2093_vm5 = vcmp.lt.s32.totalorder %v1981_v38, %v1982_v53  ;;  %v2040_v63 = vshra.s32 %v5865_v2, 16  ;;  %v5869_v25 = vsel %vm2057_vm6, %v2056_v0, %v1976_v34  ;;  %v1984_v10 = vsel %vm1920_vm4, %v5846_v41, 512  ;;  %v7075_v34 = vld [vmem:[#allocation8_spill] sm:$0xff] }
 0x1d0   : > { %v2094_v58 = vsel %vm2093_vm5, %v1981_v38, %v1982_v53  ;;  %v1839_v32 = vpop.xlane.xlu0 %1838  ;;  %v2060_v36 = vshra.s32 %v5869_v25, 16  ;;  %v7073_v38 = vld [vmem:[#allocation21_spill] sm:$0xff]  ;;  %v7074_v53 = vld [vmem:[#allocation7_spill] sm:$0xff] }
 0x1d1   : > { %vm2095_vm7 = vcmp.lt.s32.totalorder %v2094_v58, %v1983_v13  ;;  %vm1913_vm8 = vcmp.le.f32.partialorder %v5633_v50, %v1839_v32  ;;  %vm1914_vm9 = vcmp.le.f32.partialorder %v5636_v18, %v1839_v32  ;;  %vm1915_vm10 = vcmp.le.f32.partialorder %v5650_v57, %v1839_v32 }
 0x1d2   : > { %vm1916_vm11 = vcmp.le.f32.partialorder %v5655_v15, %v1839_v32  ;;  %v1977_v20 = vsel %vm1913_vm8, %v7071_v17, 512  ;;  %v1978_v44 = vsel %vm1914_vm9, %v5835_v4, 512  ;;  %v5877_v59 = vcvt.s32.f32 %v2040_v63 }
 0x1d3   : > { %vm2073_vm12 = vcmp.lt.s32.totalorder %v1977_v20, %v1978_v44  ;;  %v1979_v50 = vsel %vm1915_vm10, %v5838_v29, 512  ;;  %v2096_v19 = vsel %vm2095_vm7, %v2094_v58, %v1983_v13  ;;  %v1980_v57 = vsel %vm1916_vm11, %v5846_v41, 512  ;;  %v7076_v13 = vld [vmem:[#allocation13_spill] sm:$0xff] }
 0x1d4   : > { %v2074_v18 = vsel %vm2073_vm12, %v1977_v20, %v1978_v44  ;;  %v1854_v15 = vpop.xlane.xlu1 %1853  ;;  %2043 = vmin.xlane.f32.xlu0 %v5877_v59  ;;  %v5886_v45 = vcvt.s32.f32 %v2060_v36  ;;  %vm2097_vm14 = vcmp.lt.s32.totalorder %v2096_v19, %v1984_v10 }
 0x1d5   : > { %vm2075_vm13 = vcmp.lt.s32.totalorder %v2074_v18, %v1979_v50  ;;  %v1849_v55 = vpop.xlane.xlu0 %1848  ;;  %vm1925_vm15 = vcmp.le.f32.partialorder %v5605_v56, %v1854_v15  ;;  %vm1926_vm0 = vcmp.le.f32.partialorder %v5611_v5, %v1854_v15  ;;  %vm1927_vm1 = vcmp.le.f32.partialorder %v5607_v28, %v1854_v15 }
 0x1d6   : > { %vm1928_vm3 = vcmp.le.f32.partialorder %v5617_v12, %v1854_v15  ;;  %vm1921_vm4 = vcmp.le.f32.partialorder %v5666_v23, %v1849_v55  ;;  %vm1922_vm5 = vcmp.le.f32.partialorder %v5675_v16, %v1849_v55  ;;  %vm1923_vm6 = vcmp.le.f32.partialorder %v5685_v21, %v1849_v55  ;;  %2063 = vmin.xlane.f32.xlu1 %v5886_v45 }
 0x1d7   : > { %vm1924_vm7 = vcmp.le.f32.partialorder %v5688_v6, %v1849_v55  ;;  %v1985_v48 = vsel %vm1921_vm4, %v7071_v17, 512  ;;  %v1986_v56 = vsel %vm1922_vm5, %v5835_v4, 512  ;;  %v1987_v5 = vsel %vm1923_vm6, %v5838_v29, 512  ;;  %v7080_v55 = vld [vmem:[#allocation10_spill] sm:$0xff] }
 0x1d8   : > { %v1988_v28 = vsel %vm1924_vm7, %v5846_v41, 512  ;;  %vm2113_vm8 = vcmp.lt.s32.totalorder %v1985_v48, %v1986_v56  ;;  %v1989_v12 = vsel %vm1925_vm15, %v7071_v17, 512  ;;  %v1990_v23 = vsel %vm1926_vm0, %v5835_v4, 512 }
 0x1d9   : > { %v1991_v16 = vsel %vm1927_vm1, %v5838_v29, 512  ;;  %v2114_v21 = vsel %vm2113_vm8, %v1985_v48, %v1986_v56  ;;  %v5905_v6 = vsel %vm1928_vm3, %v5846_v41, 512  ;;  %vm2133_vm9 = vcmp.lt.s32.totalorder %v1989_v12, %v1990_v23 }
 0x1da   : > { %v5908_v61 = vsel %vm2097_vm14, %v2096_v19, %v1984_v10  ;;  %vm2115_vm10 = vcmp.lt.s32.totalorder %v2114_v21, %v1987_v5  ;;  %v2134_v31 = vsel %vm2133_vm9, %v1989_v12, %v1990_v23  ;;  %v2076_v14 = vsel %vm2075_vm13, %v2074_v18, %v1979_v50  ;;  %v7077_v50 = vld [vmem:[#allocation18_spill] sm:$0xff]  ;;  %v7078_v19 = vld [vmem:[#allocation11_spill] sm:$0xff] }
 0x1db   : > { %v1859_v54 = vpop.xlane.xlu0 %1858  ;;  %v2100_v33 = vshra.s32 %v5908_v61, 16  ;;  %vm2135_vm11 = vcmp.lt.s32.totalorder %v2134_v31, %v1991_v16  ;;  %vm2077_vm14 = vcmp.lt.s32.totalorder %v2076_v14, %v1980_v57  ;;  %v2116_v10 = vsel %vm2115_vm10, %v2114_v21, %v1987_v5 }
 0x1dc   : > { %vm1929_vm12 = vcmp.le.f32.partialorder %v5642_v60, %v1859_v54  ;;  %vm1930_vm15 = vcmp.le.f32.partialorder %v5644_v24, %v1859_v54  ;;  %vm1931_vm0 = vcmp.le.f32.partialorder %v7072_v30, %v1859_v54  ;;  %v1864_v22 = vpop.xlane.xlu1 %1863  ;;  %vm1932_vm1 = vcmp.le.f32.partialorder %v5646_v40, %v1859_v54 }
 0x1dd   : > { %v1993_v11 = vsel %vm1929_vm12, %v7071_v17, 512  ;;  %v1994_v51 = vsel %vm1930_vm15, %v5835_v4, 512  ;;  %v1995_v8 = vsel %vm1931_vm0, %v5838_v29, 512  ;;  %v5920_v46 = vsel %vm1932_vm1, %v5846_v41, 512 }
 0x1de   : > { %vm2153_vm13 = vcmp.lt.s32.totalorder %v1993_v11, %v1994_v51  ;;  %v5922_v0 = vcvt.s32.f32 %v2100_v33  ;;  %v5924_v24 = vsel %vm2077_vm14, %v2076_v14, %v1980_v57  ;;  %vm1933_vm3 = vcmp.le.f32.partialorder %v7073_v38, %v1864_v22  ;;  %v7079_v57 = vld [vmem:[#allocation15_spill] sm:$0xff]  ;;  %v7081_v33 = vld [vmem:[#allocation22_spill] sm:$0xff] }
 0x1df   : > { %v2154_v60 = vsel %vm2153_vm13, %v1993_v11, %v1994_v51  ;;  %vm1934_vm4 = vcmp.le.f32.partialorder %v7074_v53, %v1864_v22  ;;  %v2080_v40 = vshra.s32 %v5924_v24, 16  ;;  %vm1935_vm6 = vcmp.le.f32.partialorder %v7075_v34, %v1864_v22  ;;  %v7084_v51 = vld [vmem:[#allocation9_spill] sm:$0xff] }
 0x1e0   : > { %vm2155_vm5 = vcmp.lt.s32.totalorder %v2154_v60, %v1995_v8  ;;  %2103 = vmin.xlane.f32.xlu1 %v5922_v0  ;;  %vm1936_vm7 = vcmp.le.f32.partialorder %v7076_v13, %v1864_v22  ;;  %v1869_v58 = vpop.xlane.xlu0 %1868  ;;  %v1997_v32 = vsel %vm1933_vm3, %v7071_v17, 512  ;;  %v1998_v63 = vsel %vm1934_vm4, %v5835_v4, 512  ;;  %v7083_v22 = vld [vmem:[#allocation19_spill] sm:$0xff]  ;;  %v7085_v13 = vld [vmem:[#allocation20_spill] sm:$0xff] }
 0x1e1   : > { %v1999_v20 = vsel %vm1935_vm6, %v5838_v29, 512  ;;  %v5936_v44 = vsel %vm1936_vm7, %v5846_v41, 512  ;;  %v5938_v36 = vcvt.s32.f32 %v2080_v40  ;;  %vm2173_vm8 = vcmp.lt.s32.totalorder %v1997_v32, %v1998_v63 }
 0x1e2   : > { %vm1937_vm9 = vcmp.le.f32.partialorder %v7077_v50, %v1869_v58  ;;  %v2174_v18 = vsel %vm2173_vm8, %v1997_v32, %v1998_v63  ;;  %vm2117_vm12 = vcmp.lt.s32.totalorder %v2116_v10, %v1988_v28  ;;  %vm1938_vm15 = vcmp.le.f32.partialorder %v7078_v19, %v1869_v58 }
 0x1e3   : > { %vm1939_vm0 = vcmp.le.f32.partialorder %v7079_v57, %v1869_v58  ;;  %2083 = vmin.xlane.f32.xlu0 %v5938_v36  ;;  %vm2175_vm1 = vcmp.lt.s32.totalorder %v2174_v18, %v1999_v20  ;;  %v5945_v15 = vsel %vm2117_vm12, %v2116_v10, %v1988_v28  ;;  %vm1940_vm13 = vcmp.le.f32.partialorder %v7080_v55, %v1869_v58  ;;  %v7082_v28 = vld [vmem:[#allocation16_spill] sm:$0xff] }
 0x1e4   : > { %v2001_v48 = vsel %vm1937_vm9, %v7071_v17, 512  ;;  %v1874_v56 = vpop.xlane.xlu1 %1873  ;;  %v2120_v5 = vshra.s32 %v5945_v15, 16  ;;  %v2002_v12 = vsel %vm1938_vm15, %v5835_v4, 512  ;;  %v2003_v23 = vsel %vm1939_vm0, %v5838_v29, 512  ;;  %v7086_v58 = vld [vmem:[#allocation12_spill] sm:$0xff] }
 0x1e5   : > { %v5953_v21 = vsel %vm1940_vm13, %v5846_v41, 512  ;;  %vm2193_vm10 = vcmp.lt.s32.totalorder %v2001_v48, %v2002_v12  ;;  %v2136_v54 = vsel %vm2135_vm11, %v2134_v31, %v1991_v16  ;;  %vm1941_vm14 = vcmp.le.f32.partialorder %v7081_v33, %v1874_v56  ;;  %v7087_v10 = vld [vmem:[#allocation24_spill] sm:$0xff] }
 0x1e6   : > { %vm1942_vm3 = vcmp.le.f32.partialorder %v7082_v28, %v1874_v56  ;;  %v5958_v14 = vcvt.s32.f32 %v2120_v5  ;;  %v2194_v30 = vsel %vm2193_vm10, %v2001_v48, %v2002_v12  ;;  %vm2137_vm4 = vcmp.lt.s32.totalorder %v2136_v54, %v5905_v6  ;;  %v7089_v5 = vld [vmem:[#allocation26_spill] sm:$0xff] }
 0x1e7   : > { %vm1943_vm6 = vcmp.le.f32.partialorder %v7083_v22, %v1874_v56  ;;  %vm2195_vm7 = vcmp.lt.s32.totalorder %v2194_v30, %v2003_v23  ;;  %v5963_v11 = vsel %vm2137_vm4, %v2136_v54, %v5905_v6  ;;  %vm1944_vm8 = vcmp.le.f32.partialorder %v7084_v51, %v1874_v56  ;;  %v1879_v16 = vpop.xlane.xlu0 %1878  ;;  %v7090_v54 = vld [vmem:[#allocation27_spill] sm:$0xff] }
 0x1e8   : > { %v2005_v38 = vsel %vm1941_vm14, %v7071_v17, 512  ;;  %2123 = vmin.xlane.f32.xlu0 %v5958_v14  ;;  %v2140_v31 = vshra.s32 %v5963_v11, 16  ;;  %v2006_v53 = vsel %vm1942_vm3, %v5835_v4, 512  ;;  %v2007_v40 = vsel %vm1943_vm6, %v5838_v29, 512 }
 0x1e9   : > { %v5972_v34 = vsel %vm1944_vm8, %v5846_v41, 512  ;;  %vm2213_vm11 = vcmp.lt.s32.totalorder %v2005_v38, %v2006_v53  ;;  %v2156_v6 = vsel %vm2155_vm5, %v2154_v60, %v1995_v8  ;;  %vm1945_vm9 = vcmp.le.f32.partialorder %v7085_v13, %v1879_v16 }
 0x1ea   : > { %vm1946_vm12 = vcmp.le.f32.partialorder %v7086_v58, %v1879_v16  ;;  %v5977_v32 = vcvt.s32.f32 %v2140_v31  ;;  %v2214_v63 = vsel %vm2213_vm11, %v2005_v38, %v2006_v53  ;;  %vm2157_vm15 = vcmp.lt.s32.totalorder %v2156_v6, %v5920_v46  ;;  %v7092_v31 = vld [vmem:[#allocation29_spill] sm:$0xff] }
 0x1eb   : > { %vm1947_vm0 = vcmp.le.f32.partialorder %v7087_v10, %v1879_v16  ;;  %v1884_v50 = vpop.xlane.xlu1 %1883  ;;  %vm2215_vm13 = vcmp.lt.s32.totalorder %v2214_v63, %v2007_v40  ;;  %v5982_v19 = vsel %vm2157_vm15, %v2156_v6, %v5920_v46  ;;  %vm1948_vm10 = vcmp.le.f32.partialorder %v5750_v3, %v1879_v16  ;;  %v7088_v46 = vld [vmem:[#allocation25_spill] sm:$0xff] }
 0x1ec   : > { %v2009_v8 = vsel %vm1945_vm9, %v7071_v17, 512  ;;  %2143 = vmin.xlane.f32.xlu1 %v5977_v32  ;;  %v2160_v60 = vshra.s32 %v5982_v19, 16  ;;  %v2010_v57 = vsel %vm1946_vm12, %v5835_v4, 512  ;;  %v2011_v55 = vsel %vm1947_vm0, %v5838_v29, 512 }
 0x1ed   : > { %v5991_v48 = vsel %vm1948_vm10, %v5846_v41, 512  ;;  %vm2233_vm5 = vcmp.lt.s32.totalorder %v2009_v8, %v2010_v57  ;;  %v2176_v56 = vsel %vm2175_vm1, %v2174_v18, %v1999_v20  ;;  %vm1949_vm14 = vcmp.le.f32.partialorder %v7088_v46, %v1884_v50 }
 0x1ee   : > { %vm1950_vm3 = vcmp.le.f32.partialorder %v7089_v5, %v1884_v50  ;;  %v5996_v3 = vcvt.s32.f32 %v2160_v60  ;;  %v2234_v12 = vsel %vm2233_vm5, %v2009_v8, %v2010_v57  ;;  %vm2177_vm4 = vcmp.lt.s32.totalorder %v2176_v56, %v5936_v44 }
 0x1ef   : > { %vm1951_vm6 = vcmp.le.f32.partialorder %v7090_v54, %v1884_v50  ;;  %v1889_v33 = vpop.xlane.xlu0 %1888  ;;  %vm2235_vm8 = vcmp.lt.s32.totalorder %v2234_v12, %v2011_v55  ;;  %v6001_v28 = vsel %vm2177_vm4, %v2176_v56, %v5936_v44  ;;  %vm1952_vm11 = vcmp.le.f32.partialorder %v5763_v47, %v1884_v50  ;;  %v7091_v44 = vld [vmem:[#allocation28_spill] sm:$0xff] }
 0x1f0   : > { %v2013_v20 = vsel %vm1949_vm14, %v7071_v17, 512  ;;  %2163 = vmin.xlane.f32.xlu0 %v5996_v3  ;;  %v2180_v18 = vshra.s32 %v6001_v28, 16  ;;  %v2014_v22 = vsel %vm1950_vm3, %v5835_v4, 512  ;;  %v2015_v51 = vsel %vm1951_vm6, %v5838_v29, 512 }
 0x1f1   : > { %v6010_v38 = vsel %vm1952_vm11, %v5846_v41, 512  ;;  %vm2253_vm1 = vcmp.lt.s32.totalorder %v2013_v20, %v2014_v22  ;;  %v2196_v16 = vsel %vm2195_vm7, %v2194_v30, %v2003_v23  ;;  %vm1953_vm9 = vcmp.le.f32.partialorder %v7091_v44, %v1889_v33  ;;  %v1894_v6 = vpop.xlane.xlu1 %1893 }
 0x1f2   : > { %vm1954_vm12 = vcmp.le.f32.partialorder %v7092_v31, %v1889_v33  ;;  %v6015_v47 = vcvt.s32.f32 %v2180_v18  ;;  %v2254_v53 = vsel %vm2253_vm1, %v2013_v20, %v2014_v22  ;;  %vm2197_vm15 = vcmp.lt.s32.totalorder %v2196_v16, %v5953_v21 }
 0x1f3   : > { %vm1955_vm0 = vcmp.le.f32.partialorder %v5777_v9, %v1889_v33  ;;  %vm2255_vm10 = vcmp.lt.s32.totalorder %v2254_v53, %v2015_v51  ;;  %v6020_v13 = vsel %vm2197_vm15, %v2196_v16, %v5953_v21  ;;  %vm1956_vm5 = vcmp.le.f32.partialorder %v5781_v52, %v1889_v33  ;;  %v7093_v21 = vld [vmem:[#allocation30_spill] sm:$0xff]  ;;  %v1899_v60 = vpop.xlane.xlu0 %1898 }
 0x1f4   : > { %v2017_v23 = vsel %vm1953_vm9, %v7071_v17, 512  ;;  %2183 = vmin.xlane.f32.xlu1 %v6015_v47  ;;  %v2200_v30 = vshra.s32 %v6020_v13, 16  ;;  %v2018_v58 = vsel %vm1954_vm12, %v5835_v4, 512  ;;  %v2019_v10 = vsel %vm1955_vm0, %v5838_v29, 512 }
 0x1f5   : > { %v6029_v50 = vsel %vm1956_vm5, %v5846_v41, 512  ;;  %vm2273_vm7 = vcmp.lt.s32.totalorder %v2017_v23, %v2018_v58  ;;  %v2216_v9 = vsel %vm2215_vm13, %v2214_v63, %v2007_v40  ;;  %vm1957_vm14 = vcmp.le.f32.partialorder %v5784_v35, %v1894_v6 }
 0x1f6   : > { %vm1958_vm3 = vcmp.le.f32.partialorder %v7093_v21, %v1894_v6  ;;  %v6034_v52 = vcvt.s32.f32 %v2200_v30  ;;  %v2274_v8 = vsel %vm2273_vm7, %v2017_v23, %v2018_v58  ;;  %vm2217_vm4 = vcmp.lt.s32.totalorder %v2216_v9, %v5972_v34  ;;  %v1904_v5 = vpop.xlane.xlu1 %1903 }
 0x1f7   : > { %vm1959_vm6 = vcmp.le.f32.partialorder %v5789_v62, %v1894_v6  ;;  %vm2275_vm11 = vcmp.lt.s32.totalorder %v2274_v8, %v2019_v10  ;;  %v6039_v57 = vsel %vm2217_vm4, %v2216_v9, %v5972_v34  ;;  %vm1960_vm1 = vcmp.le.f32.partialorder %v5797_v42, %v1894_v6 }
 0x1f8   : > { %v2021_v40 = vsel %vm1957_vm14, %v7071_v17, 512  ;;  %2203 = vmin.xlane.f32.xlu0 %v6034_v52  ;;  %v2220_v35 = vshra.s32 %v6039_v57, 16  ;;  %v2022_v63 = vsel %vm1958_vm3, %v5835_v4, 512  ;;  %v2023_v56 = vsel %vm1959_vm6, %v5838_v29, 512 }
 0x1f9   : > { %v2024_v46 = vsel %vm1960_vm1, %v5846_v41, 512  ;;  %vm2293_vm13 = vcmp.lt.s32.totalorder %v2021_v40, %v2022_v63  ;;  %v2236_v62 = vsel %vm2235_vm8, %v2234_v12, %v2011_v55  ;;  %vm1961_vm9 = vcmp.le.f32.partialorder %v5801_v43, %v1899_v60 }
 0x1fa   : > { %vm1962_vm12 = vcmp.le.f32.partialorder %v5803_v39, %v1899_v60  ;;  %v6051_v42 = vcvt.s32.f32 %v2220_v35  ;;  %v2294_v34 = vsel %vm2293_vm13, %v2021_v40, %v2022_v63  ;;  %vm2237_vm15 = vcmp.lt.s32.totalorder %v2236_v62, %v5991_v48 }
 0x1fb   : > { %vm1963_vm0 = vcmp.le.f32.partialorder %v5808_v27, %v1899_v60  ;;  %vm2295_vm5 = vcmp.lt.s32.totalorder %v2294_v34, %v2023_v56  ;;  %v6056_v54 = vsel %vm2237_vm15, %v2236_v62, %v5991_v48  ;;  %vm1964_vm7 = vcmp.le.f32.partialorder %v5813_v1, %v1899_v60 }
 0x1fc   : > { %v2025_v55 = vsel %vm1961_vm9, %v7071_v17, 512  ;;  %2223 = vmin.xlane.f32.xlu1 %v6051_v42  ;;  %v2240_v43 = vshra.s32 %v6056_v54, 16  ;;  %v2026_v39 = vsel %vm1962_vm12, %v5835_v4, 512  ;;  %v2027_v12 = vsel %vm1963_vm0, %v5838_v29, 512 }
 0x1fd   : > { %v2028_v33 = vsel %vm1964_vm7, %v5846_v41, 512  ;;  %vm2313_vm8 = vcmp.lt.s32.totalorder %v2025_v55, %v2026_v39  ;;  %v2256_v27 = vsel %vm2255_vm10, %v2254_v53, %v2015_v51  ;;  %vm1965_vm14 = vcmp.le.f32.partialorder %v5815_v7, %v1904_v5 }
 0x1fe   : > { %vm1966_vm3 = vcmp.le.f32.partialorder %v5819_v49, %v1904_v5  ;;  %v6068_v1 = vcvt.s32.f32 %v2240_v43  ;;  %v2314_v48 = vsel %vm2313_vm8, %v2025_v55, %v2026_v39  ;;  %vm2257_vm4 = vcmp.lt.s32.totalorder %v2256_v27, %v6010_v38 }
 0x1ff   : > { %vm1967_vm6 = vcmp.le.f32.partialorder %v5823_v37, %v1904_v5  ;;  %vm2315_vm1 = vcmp.lt.s32.totalorder %v2314_v48, %v2027_v12  ;;  %v6073_v20 = vsel %vm2257_vm4, %v2256_v27, %v6010_v38  ;;  %vm1968_vm13 = vcmp.le.f32.partialorder %v5830_v26, %v1904_v5 }
 0x200   : > { %v2029_v18 = vsel %vm1965_vm14, %v7071_v17, 512  ;;  %2243 = vmin.xlane.f32.xlu0 %v6068_v1  ;;  %v2260_v7 = vshra.s32 %v6073_v20, 16  ;;  %v2030_v49 = vsel %vm1966_vm3, %v5835_v4, 512  ;;  %v2031_v22 = vsel %vm1967_vm6, %v5838_v29, 512 }
 0x201   : > { %v2032_v51 = vsel %vm1968_vm13, %v5846_v41, 512  ;;  %vm2333_vm10 = vcmp.lt.s32.totalorder %v2029_v18, %v2030_v49  ;;  %v2276_v37 = vsel %vm2275_vm11, %v2274_v8, %v2019_v10  ;;  %v2296_v38 = vsel %vm2295_vm5, %v2294_v34, %v2023_v56 }
 0x202   : > { %v2316_v16 = vsel %vm2315_vm1, %v2314_v48, %v2027_v12  ;;  %v6084_v44 = vcvt.s32.f32 %v2260_v7  ;;  %v2334_v26 = vsel %vm2333_vm10, %v2029_v18, %v2030_v49  ;;  %vm2277_vm9 = vcmp.lt.s32.totalorder %v2276_v37, %v6029_v50 }
 0x203   : > { %vm2297_vm12 = vcmp.lt.s32.totalorder %v2296_v38, %v2024_v46  ;;  %vm2335_vm15 = vcmp.lt.s32.totalorder %v2334_v26, %v2031_v22  ;;  %v6088_v31 = vsel %vm2277_vm9, %v2276_v37, %v6029_v50  ;;  %vm2317_vm0 = vcmp.lt.s32.totalorder %v2316_v16, %v2028_v33 }
 0x204   : > { %v6090_v53 = vsel %vm2297_vm12, %v2296_v38, %v2024_v46  ;;  %2263 = vmin.xlane.f32.xlu1 %v6084_v44  ;;  %v2280_v6 = vshra.s32 %v6088_v31, 16  ;;  %v6095_v30 = vsel %vm2317_vm0, %v2316_v16, %v2028_v33  ;;  %v2336_v58 = vsel %vm2335_vm15, %v2334_v26, %v2031_v22 }
 0x205   : > { %v2300_v23 = vshra.s32 %v6090_v53, 16  ;;  %v2320_v10 = vshra.s32 %v6095_v30, 16  ;;  %vm2337_vm11 = vcmp.lt.s32.totalorder %v2336_v58, %v2032_v51  ;;  %v2039_v35 = vand.u32 65535, %v5865_v2 }
 0x206   : > { %v6098_v9 = vcvt.s32.f32 %v2280_v6  ;;  %v6102_v50 = vsel %vm2337_vm11, %v2336_v58, %v2032_v51  ;;  %v2059_v63 = vand.u32 65535, %v5869_v25  ;;  %v2099_v2 = vand.u32 65535, %v5908_v61 }
 0x207   : > { %v6100_v21 = vcvt.s32.f32 %v2300_v23  ;;  %v2340_v8 = vshra.s32 %v6102_v50, 16  ;;  %v6107_v60 = vcvt.s32.f32 %v2320_v10  ;;  %v2041_v46 = vcvt.s32.f32 %v2039_v35 }
 0x208   : > { %2283 = vmin.xlane.f32.xlu0 %v6098_v9  ;;  %v2061_v5 = vcvt.s32.f32 %v2059_v63  ;;  %v2101_v25 = vcvt.s32.f32 %v2099_v2  ;;  %v2079_v39 = vand.u32 65535, %v5924_v24  ;;  %v2139_v24 = vand.u32 65535, %v5963_v11 }
 0x209   : > { %2303 = vmin.xlane.f32.xlu1 %v6100_v21  ;;  %v6109_v40 = vcvt.s32.f32 %v2340_v8  ;;  %v2159_v49 = vand.u32 65535, %v5982_v19  ;;  %v2179_v11 = vand.u32 65535, %v6001_v28  ;;  %v2199_v19 = vand.u32 65535, %v6020_v13 }
 0x20a   : > { %v2081_v33 = vcvt.s32.f32 %v2079_v39  ;;  %v2141_v7 = vcvt.s32.f32 %v2139_v24  ;;  %v2219_v28 = vand.u32 65535, %v6039_v57  ;;  %v2239_v13 = vand.u32 65535, %v6056_v54 }
 0x20b   : > { %v2161_v22 = vcvt.s32.f32 %v2159_v49  ;;  %v2181_v37 = vcvt.s32.f32 %v2179_v11  ;;  %v2201_v16 = vcvt.s32.f32 %v2199_v19  ;;  %v2259_v57 = vand.u32 65535, %v6073_v20 }
 0x20c   : > { %2323 = vmin.xlane.f32.xlu0 %v6107_v60  ;;  %v2221_v6 = vcvt.s32.f32 %v2219_v28  ;;  %v2241_v58 = vcvt.s32.f32 %v2239_v13  ;;  %v2279_v54 = vand.u32 65535, %v6088_v31  ;;  %v2299_v35 = vand.u32 65535, %v6090_v53 }
 0x20d   : > { %2343 = vmin.xlane.f32.xlu1 %v6109_v40  ;;  %v2261_v8 = vcvt.s32.f32 %v2259_v57  ;;  %v6196_v39 = vstv %s3679_s8  ;;  %v4121_v28 = vmov 0.0  }
 0x20e   : > { %v2281_v20 = vcvt.s32.f32 %v2279_v54 }
 0x25d   : > { %v6115_v56 = vpop.xlane.xlu0 %2043 }
 0x25e   : > { %vm2045_vm5 = vcmp.eq.f32.partialorder %v5877_v59, %v6115_v56 }
 0x25f   : > { %v6119_v62 = vpop.xlane.xlu1 %2063  ;;  %v2046_v34 = vsel %vm2045_vm5, %v2041_v46, inf }
 0x260   : > { %vm2065_vm7 = vcmp.eq.f32.partialorder %v5886_v45, %v6119_v62  ;;  %2047 = vmin.xlane.f32.xlu0 %v2046_v34  ;;  %v2119_v45 = vand.u32 65535, %v5945_v15  ;;  %v2319_v34 = vand.u32 65535, %v6095_v30 }
 0x261   : > { %v2066_v55 = vsel %vm2065_vm7, %v2061_v5, inf  ;;  %v2339_v5 = vand.u32 65535, %v6102_v50  ;;  %v2070_v50 = vcvt.f32.s32 %v6119_v62 }
 0x262   : > { %2067 = vmin.xlane.f32.xlu1 %v2066_v55  ;;  %v2121_v48 = vcvt.s32.f32 %v2119_v45  ;;  %v2321_v55 = vcvt.s32.f32 %v2319_v34 }
 0x263   : > { %v6208_v62 = vshll.u32 %v2070_v50, 16 }
 0x269   : > { %v6124_v43 = vpop.xlane.xlu1 %2103 }
 0x26a   : > { %vm2105_vm8 = vcmp.eq.f32.partialorder %v5922_v0, %v6124_v43  ;;  %v2110_v45 = vcvt.f32.s32 %v6124_v43 }
 0x26b   : > { %v2106_v59 = vsel %vm2105_vm8, %v2101_v25, inf  ;;  %v2341_v25 = vcvt.s32.f32 %v2339_v5 }
 0x26c   : > { %2107 = vmin.xlane.f32.xlu1 %v2106_v59  ;;  %v6129_v12 = vpop.xlane.xlu0 %2083  ;;  %v7094_v59 = vld [vmem:[#allocation23_spill] sm:$0xff] }
 0x26d   : > { %vm2085_vm14 = vcmp.eq.f32.partialorder %v5938_v36, %v6129_v12  ;;  %v2934_v24 = vadd.s32 %v6196_v39, %v7094_v59  ;;  %v2920_v49 = vadd.s32 24, %v7094_v59  ;;  %v2923_v13 = vadd.s32 48, %v7094_v59 }
 0x26e   : > { %v2086_v27 = vsel %vm2085_vm14, %v2081_v33, inf  ;;  %v2918_v33 = vadd.s32 8, %v7094_v59 }
 0x26f   : > { %2087 = vmin.xlane.f32.xlu0 %v2086_v27  ;;  %v2919_v27 = vadd.s32 16, %v7094_v59  ;;  %vm2950_vm7 = vcmp.lt.s32.totalorder %v2934_v24, 512 }
 0x271   : > { %v6134_v61 = vpop.xlane.xlu0 %2123 }
 0x272   : > { %vm2125_vm3 = vcmp.eq.f32.partialorder %v5958_v14, %v6134_v61 }
 0x273   : > { %v2126_v0 = vsel %vm2125_vm3, %v2121_v48, inf }
 0x274   : > { %2127 = vmin.xlane.f32.xlu0 %v2126_v0  ;;  %v2935_v0 = vadd.s32 %v6196_v39, %v2918_v33 }
 0x275   : > { %v6139_v18 = vpop.xlane.xlu1 %2143 }
 0x276   : > { %vm2145_vm4 = vcmp.eq.f32.partialorder %v5977_v32, %v6139_v18  ;;  %v2150_v48 = vcvt.f32.s32 %v6139_v18  ;;  %v2936_v18 = vadd.s32 %v6196_v39, %v2919_v27  ;;  %vm2951_vm8 = vcmp.lt.s32.totalorder %v2935_v0, 512 }
 0x277   : > { %v2146_v36 = vsel %vm2145_vm4, %v2141_v7, inf  ;;  %v6211_v7 = vshll.u32 %v2110_v45, 16 }
 0x278   : > { %2147 = vmin.xlane.f32.xlu1 %v2146_v36  ;;  %v2921_v36 = vadd.s32 32, %v7094_v59  ;;  %vm2952_vm14 = vcmp.lt.s32.totalorder %v2936_v18, 512 }
 0x279   : > { %v6144_v15 = vpop.xlane.xlu0 %2163 }
 0x27a   : > { %vm2165_vm6 = vcmp.eq.f32.partialorder %v5996_v3, %v6144_v15  ;;  %v2170_v43 = vcvt.f32.s32 %v6144_v15 }
 0x27b   : > { %v2166_v14 = vsel %vm2165_vm6, %v2161_v22, inf  ;;  %v2922_v22 = vadd.s32 40, %v7094_v59 }
 0x27c   : > { %2167 = vmin.xlane.f32.xlu0 %v2166_v14  ;;  %v6223_v14 = vshll.u32 %v2150_v48, 16 }
 0x27d   : > { %v6149_v51 = vpop.xlane.xlu1 %2183 }
 0x27e   : > { %vm2185_vm1 = vcmp.eq.f32.partialorder %v6015_v47, %v6149_v51 }
 0x27f   : > { %v2186_v32 = vsel %vm2185_vm1, %v2181_v37, inf }
 0x280   : > { %2187 = vmin.xlane.f32.xlu1 %v2186_v32 }
 0x281   : > { %v6154_v38 = vpop.xlane.xlu0 %2203 }
 0x282   : > { %vm2205_vm13 = vcmp.eq.f32.partialorder %v6034_v52, %v6154_v38  ;;  %v2210_v37 = vcvt.f32.s32 %v6154_v38  ;;  %v2939_v38 = vadd.s32 %v6196_v39, %v2922_v22 }
 0x283   : > { %v2206_v3 = vsel %vm2205_vm13, %v2201_v16, inf  ;;  %v2937_v16 = vadd.s32 %v6196_v39, %v2920_v49  ;;  %v2931_v49 = vadd.s32 112, %v7094_v59 }
 0x284   : > { %2207 = vmin.xlane.f32.xlu0 %v2206_v3  ;;  %v6234_v3 = vsel %vm2950_vm7, 1.0, %v4121_v28  ;;  %vm2955_vm6 = vcmp.lt.s32.totalorder %v2939_v38, 512 }
 0x285   : > { %v6159_v26 = vpop.xlane.xlu1 %2223  ;;  %vm2953_vm3 = vcmp.lt.s32.totalorder %v2937_v16, 512  ;;  %v6290_v45 = vsel %vm2955_vm6, 1.0, %v4121_v28 }
 0x286   : > { %vm2225_vm10 = vcmp.eq.f32.partialorder %v6051_v42, %v6159_v26  ;;  %v2230_v15 = vcvt.f32.s32 %v6159_v26  ;;  %v6239_v26 = vsel %vm2951_vm8, 1.0, %v4121_v28 }
 0x287   : > { %v2226_v47 = vsel %vm2225_vm10, %v2221_v6, inf  ;;  %v2938_v6 = vadd.s32 %v6196_v39, %v2921_v36  ;;  %v4122_v36 = vmov 1.0  }
 0x288   : > { %2227 = vmin.xlane.f32.xlu1 %v2226_v47  ;;  %v2924_v47 = vadd.s32 56, %v7094_v59  ;;  %v6246_v57 = vshll.u32 %v2230_v15, 16 }
 0x289   : > { %v6164_v23 = vpop.xlane.xlu0 %2243  ;;  %vm2954_vm4 = vcmp.lt.s32.totalorder %v2938_v6, 512 }
 0x28a   : > { %vm2245_vm9 = vcmp.eq.f32.partialorder %v6068_v1, %v6164_v23  ;;  %v2301_v1 = vcvt.s32.f32 %v2299_v35  ;;  %v2250_v32 = vcvt.f32.s32 %v6164_v23  ;;  %v2925_v23 = vadd.s32 64, %v7094_v59 }
 0x28b   : > { %v2246_v52 = vsel %vm2245_vm9, %v2241_v58, inf  ;;  %v6244_v58 = vshll.u32 %v2210_v37, 16  ;;  %v6263_v5 = vadd.s32 %v6196_v39, %v2924_v47 }
 0x28c   : > { %2247 = vmin.xlane.f32.xlu0 %v2246_v52  ;;  %v6250_v54 = vshll.u32 %v2250_v32, 16 }
 0x28d   : > { %v6169_v10 = vpop.xlane.xlu1 %2263  ;;  %vm2957_vm13 = vcmp.lt.s32.totalorder %v6263_v5, 512  ;;  %v6390_v5 = vadd.s32 %v6196_v39, %v2931_v49 }
 0x28e   : > { %vm2265_vm12 = vcmp.eq.f32.partialorder %v6084_v44, %v6169_v10  ;;  %v2270_v52 = vcvt.f32.s32 %v6169_v10  ;;  %v6260_v10 = vadd.s32 %v6196_v39, %v2923_v13 }
 0x28f   : > { %v2266_v42 = vsel %vm2265_vm12, %v2261_v8, inf  ;;  %v2926_v8 = vadd.s32 72, %v7094_v59 }
 0x290   : > { %2267 = vmin.xlane.f32.xlu1 %v2266_v42  ;;  %v6254_v42 = vsel %vm2952_vm14, 1.0, %v4121_v28  ;;  %vm2956_vm1 = vcmp.lt.s32.totalorder %v6260_v10, 512 }
 0x291   : > { %v6175_v63 = vpop.xlane.xlu0 %2283 }
 0x292   : > { %v6177_v46 = vpop.xlane.xlu1 %2303  ;;  %vm2285_vm15 = vcmp.eq.f32.partialorder %v6098_v9, %v6175_v63  ;;  %v2290_v35 = vcvt.f32.s32 %v6175_v63  ;;  %v6266_v63 = vadd.s32 %v6196_v39, %v2925_v23 }
 0x293   : > { %vm2305_vm0 = vcmp.eq.f32.partialorder %v6100_v21, %v6177_v46  ;;  %v2286_v44 = vsel %vm2285_vm15, %v2281_v20, inf  ;;  %v2050_v21 = vcvt.f32.s32 %v6115_v56  ;;  %v2310_v20 = vcvt.f32.s32 %v6177_v46 }
 0x294   : > { %v2306_v31 = vsel %vm2305_vm0, %v2301_v1, inf  ;;  %2287 = vmin.xlane.f32.xlu0 %v2286_v44  ;;  %v6268_v44 = vshll.u32 %v2270_v52, 16  ;;  %v6274_v46 = vadd.s32 %v6196_v39, %v2926_v8  ;;  %vm2958_vm10 = vcmp.lt.s32.totalorder %v6266_v63, 512 }
 0x295   : > { %2307 = vmin.xlane.f32.xlu1 %v2306_v31  ;;  %v6185_v53 = vpop.xlane.xlu0 %2323  ;;  %v6206_v56 = vshll.u32 %v2050_v21, 16  ;;  %v6271_v31 = vsel %vm2953_vm3, 1.0, %v4121_v28  ;;  %v6284_v21 = vshll.u32 %v2310_v20, 16 }
 0x296   : > { %v6187_v2 = vpop.xlane.xlu1 %2343  ;;  %vm2325_vm11 = vcmp.eq.f32.partialorder %v6107_v60, %v6185_v53  ;;  %v2090_v60 = vcvt.f32.s32 %v6129_v12  ;;  %v2190_v12 = vcvt.f32.s32 %v6149_v51  ;;  %v6227_v51 = vshll.u32 %v2170_v43, 16 }
 0x297   : > { %vm2345_vm5 = vcmp.eq.f32.partialorder %v6109_v40, %v6187_v2  ;;  %v2326_v30 = vsel %vm2325_vm11, %v2321_v55, inf  ;;  %v2130_v40 = vcvt.f32.s32 %v6134_v61  ;;  %v2330_v1 = vcvt.f32.s32 %v6185_v53 }
 0x298   : > { %v2346_v9 = vsel %vm2345_vm5, %v2341_v25, inf  ;;  %2327 = vmin.xlane.f32.xlu0 %v2326_v30  ;;  %v6216_v61 = vshll.u32 %v2090_v60, 16  ;;  %v6229_v19 = vshll.u32 %v2190_v12, 16  ;;  %v2350_v34 = vcvt.f32.s32 %v6187_v2 }
 0x299   : > { %2347 = vmin.xlane.f32.xlu1 %v2346_v9  ;;  %v6221_v11 = vshll.u32 %v2130_v40, 16  ;;  %v2927_v53 = vadd.s32 80, %v7094_v59  ;;  %v6277_v55 = vshll.u32 %v2290_v35, 16  ;;  %v6280_v25 = vsel %vm2954_vm4, 1.0, %v4121_v28 }
 0x29a   : > { %v2928_v30 = vadd.s32 88, %v7094_v59  ;;  %v2929_v9 = vadd.s32 96, %v7094_v59  ;;  %v6286_v50 = vshll.u32 %v2330_v1, 16  ;;  %v6292_v60 = vshll.u32 %v2350_v34, 16 }
 0x29b   : > { %vm2959_vm9 = vcmp.lt.s32.totalorder %v6274_v46, 512  ;;  %v2944_v24 = vadd.s32 %v6196_v39, %v2927_v53  ;;  %v2930_v12 = vadd.s32 104, %v7094_v59 }
 0x29c   : > { %v6301_v0 = vadd.s32 %v6196_v39, %v2928_v30  ;;  %v6304_v43 = vadd.s32 %v6196_v39, %v2929_v9 }
 0x29d   : > { %vm2960_vm3 = vcmp.lt.s32.totalorder %v2944_v24, 512  ;;  %v2947_v53 = vadd.s32 %v6196_v39, %v2930_v12 }
 0x29e   : > { %vm2961_vm4 = vcmp.lt.s32.totalorder %v6301_v0, 512  ;;  %v6384_v0 = vsel %vm2959_vm9, 1.0, %v4121_v28  ;;  %v6387_v10 = vsel %vm2960_vm3, 1.0, %v4121_v28  ;;  %vm2962_vm6 = vcmp.lt.s32.totalorder %v6304_v43, 512 }
 0x29f   : > { %v6393_v63 = vsel %vm2961_vm4, 1.0, %v4121_v28 }
 0x2e9   : > { %v2048_v2 = vpop.xlane.xlu0 %2047 }
 0x2ea   : > { %v2049_v33 = vcvt.f32.s32 %v2048_v2 }
 0x2eb   : > { %v2068_v27 = vpop.xlane.xlu1 %2067 }
 0x2ec   : > { %v2052_v40 = vadd.s32 %v6206_v56, %v2049_v33  ;;  %v2069_v48 = vcvt.f32.s32 %v2068_v27  ;;  %v6366_v27 = vsel %vm2956_vm1, 1.0, %v4121_v28  ;;  %vm2963_vm1 = vcmp.lt.s32.totalorder %v2947_v53, 512 }
 0x2ee   : > { %v2072_v18 = vadd.s32 %v6208_v62, %v2069_v48  ;;  %vm2354_vm12 = vcmp.eq.s32.totalorder %v5835_v4, %v2052_v40  ;;  %vm2356_vm15 = vcmp.eq.s32.totalorder %v5846_v41, %v2052_v40  ;;  %vm2353_vm0 = vcmp.eq.s32.totalorder %v7071_v17, %v2052_v40 }
 0x2ef   : > { %v3552_v56 = vsel %vm2354_vm12, 1.0, %v4121_v28  ;;  %3615 = vmatprep.mubr.msk.f32.mxu0 %vm2354_vm12, %v4122_v36  ;;  %v3554_v22 = vsel %vm2356_vm15, 1.0, %v4121_v28  ;;  %3647 = vmatprep.mubr.msk.f32.mxu1 %vm2356_vm15, %v4122_v36  ;;  %v3551_v37 = vsel %vm2353_vm0, 1.0, %v4121_v28  ;;  %vm2355_vm11 = vcmp.eq.s32.totalorder %v5838_v29, %v2052_v40 }
 0x2f0   : > { %2836 = vst [vmem:[%s4214_s11 + $0x8] sm:$0xff] %v3552_v56  ;;  %v3000_v62 = vmul.f32 %v6234_v3, %v3552_v56  ;;  %2838 = vst [vmem:[%s4214_s11 + $0x18] sm:$0xff] %v3554_v22  ;;  %v3002_v15 = vmul.f32 %v6234_v3, %v3554_v22  ;;  %3616 = vmatmul.mubr.msk.f32.vlgmr.msra.gmra.mxu0 %vm2353_vm0, %v4122_v36  ;;  %v3553_v32 = vsel %vm2355_vm11, 1.0, %v4121_v28  ;;  %3648 = vmatmul.mubr.msk.f32.vlgmr.msra.gmra.mxu1 %vm2355_vm11, %v4122_v36 }
 0x2f1   : > { %2835 = vst [vmem:[%s4214_s11] sm:$0xff] %v3551_v37  ;;  %vm2358_vm5 = vcmp.eq.s32.totalorder %v5835_v4, %v2072_v18  ;;  %2837 = vst [vmem:[%s4214_s11 + $0x10] sm:$0xff] %v3553_v32  ;;  %vm2360_vm7 = vcmp.eq.s32.totalorder %v5846_v41, %v2072_v18  ;;  %vm2357_vm8 = vcmp.eq.s32.totalorder %v7071_v17, %v2072_v18  ;;  %v6371_v40 = vsel %vm2957_vm13, 1.0, %v4121_v28 }
 0x2f2   : > { %v3556_v16 = vsel %vm2358_vm5, 1.0, %v4121_v28  ;;  %3617 = vmatprep.mubr.msk.f32.mxu0 %vm2358_vm5, %v4122_v36  ;;  %v2999_v6 = vmul.f32 %v6234_v3, %v3551_v37  ;;  %v3558_v13 = vsel %vm2360_vm7, 1.0, %v4121_v28  ;;  %3649 = vmatprep.mubr.msk.f32.mxu1 %vm2360_vm7, %v4122_v36  ;;  %v3555_v47 = vsel %vm2357_vm8, 1.0, %v4121_v28 }
 0x2f3   : > { %2840 = vst [vmem:[%s4214_s11 + $0x28] sm:$0xff] %v3556_v16  ;;  %v3004_v38 = vmul.f32 %v6239_v26, %v3556_v16  ;;  %vm2359_vm14 = vcmp.eq.s32.totalorder %v5838_v29, %v2072_v18  ;;  %2842 = vst [vmem:[%s4214_s11 + $0x38] sm:$0xff] %v3558_v13  ;;  %v3006_v23 = vmul.f32 %v6239_v26, %v3558_v13  ;;  %v6376_v48 = vsel %vm2958_vm10, 1.0, %v4121_v28 }
 0x2f4   : > { %2839 = vst [vmem:[%s4214_s11 + $0x20] sm:$0xff] %v3555_v47  ;;  %v3003_v52 = vmul.f32 %v6239_v26, %v3555_v47  ;;  %v3557_v8 = vsel %vm2359_vm14, 1.0, %v4121_v28  ;;  %v3001_v35 = vmul.f32 %v6234_v3, %v3553_v32  ;;  %3618 = vmatmul.mubr.msk.f32.gmra.mxu0 %vm2357_vm8, %v4122_v36  ;;  %3650 = vmatmul.mubr.msk.f32.gmra.mxu1 %vm2359_vm14, %v4122_v36  ;;  %v6422_v22 = vsel %vm2962_vm6, 1.0, %v4121_v28 }
 0x2f5   : > { %v2108_v20 = vpop.xlane.xlu1 %2107  ;;  %v6347_v1 = vadd.f32 %v3004_v38, %v3000_v62  ;;  %2841 = vst [vmem:[%s4214_s11 + $0x30] sm:$0xff] %v3557_v8  ;;  %v3005_v34 = vmul.f32 %v6239_v26, %v3557_v8  ;;  %v6356_v30 = vadd.f32 %v3006_v23, %v3002_v15  ;;  %v6425_v37 = vsel %vm2963_vm1, 1.0, %v4121_v28 }
 0x2f6   : > { %v2109_v2 = vcvt.f32.s32 %v2108_v20  ;;  %v6358_v9 = vadd.f32 %v3003_v52, %v2999_v6  ;;  %vm2964_vm15 = vcmp.lt.s32.totalorder %v6390_v5, 512 }
 0x2f7   : > { %v6361_v33 = vadd.f32 %v3005_v34, %v3001_v35 }
 0x2f8   : > { %v6379_v24 = vadd.s32 %v6211_v7, %v2109_v2  ;;  %v2088_v12 = vpop.xlane.xlu0 %2087  ;;  %v2932_v7 = vadd.s32 120, %v7094_v59 }
 0x2f9   : > { %v2089_v46 = vcvt.f32.s32 %v2088_v12 }
 0x2fa   : > { %vm2366_vm13 = vcmp.eq.s32.totalorder %v5835_v4, %v6379_v24  ;;  %vm2368_vm10 = vcmp.eq.s32.totalorder %v5846_v41, %v6379_v24  ;;  %vm2365_vm9 = vcmp.eq.s32.totalorder %v7071_v17, %v6379_v24  ;;  %vm2367_vm12 = vcmp.eq.s32.totalorder %v5838_v29, %v6379_v24 }
 0x2fb   : > { %v3564_v49 = vsel %vm2366_vm13, 1.0, %v4121_v28  ;;  %v3566_v43 = vsel %vm2368_vm10, 1.0, %v4121_v28  ;;  %v3563_v18 = vsel %vm2365_vm9, 1.0, %v4121_v28  ;;  %v2092_v56 = vadd.s32 %v6216_v61, %v2089_v46 }
 0x2fc   : > { %2848 = vst [vmem:[%s4214_s11 + $0x68] sm:$0xff] %v3564_v49  ;;  %2850 = vst [vmem:[%s4214_s11 + $0x78] sm:$0xff] %v3566_v43  ;;  %v3012_v62 = vmul.f32 %v6271_v31, %v3564_v49  ;;  %v3014_v15 = vmul.f32 %v6271_v31, %v3566_v43  ;;  %v3565_v61 = vsel %vm2367_vm12, 1.0, %v4121_v28  ;;  %v6435_v32 = vadd.s32 %v6196_v39, %v2932_v7 }
 0x2fd   : > { %2847 = vst [vmem:[%s4214_s11 + $0x60] sm:$0xff] %v3563_v18  ;;  %v2128_v16 = vpop.xlane.xlu0 %2127  ;;  %vm2362_vm0 = vcmp.eq.s32.totalorder %v5835_v4, %v2092_v56  ;;  %vm2364_vm11 = vcmp.eq.s32.totalorder %v5846_v41, %v2092_v56  ;;  %vm2361_vm5 = vcmp.eq.s32.totalorder %v7071_v17, %v2092_v56  ;;  %vm2363_vm7 = vcmp.eq.s32.totalorder %v5838_v29, %v2092_v56 }
 0x2fe   : > { %2849 = vst [vmem:[%s4214_s11 + $0x70] sm:$0xff] %v3565_v61  ;;  %v2129_v6 = vcvt.f32.s32 %v2128_v16  ;;  %v3560_v38 = vsel %vm2362_vm0, 1.0, %v4121_v28  ;;  %3619 = vmatprep.mubr.msk.f32.mxu0 %vm2362_vm0, %v4122_v36  ;;  %v3562_v39 = vsel %vm2364_vm11, 1.0, %v4121_v28  ;;  %3651 = vmatprep.mubr.msk.f32.mxu1 %vm2364_vm11, %v4122_v36  ;;  %v3559_v13 = vsel %vm2361_vm5, 1.0, %v4121_v28 }
 0x2ff   : > { %2844 = vst [vmem:[%s4214_s11 + $0x48] sm:$0xff] %v3560_v38  ;;  %v3008_v47 = vmul.f32 %v6254_v42, %v3560_v38  ;;  %2846 = vst [vmem:[%s4214_s11 + $0x58] sm:$0xff] %v3562_v39  ;;  %v3010_v23 = vmul.f32 %v6254_v42, %v3562_v39  ;;  %3620 = vmatmul.mubr.msk.f32.gmra.mxu0 %vm2361_vm5, %v4122_v36  ;;  %v3007_v52 = vmul.f32 %v6254_v42, %v3559_v13 }
 0x300   : > { %2843 = vst [vmem:[%s4214_s11 + $0x40] sm:$0xff] %v3559_v13  ;;  %v3561_v8 = vsel %vm2363_vm7, 1.0, %v4121_v28  ;;  %3652 = vmatmul.mubr.msk.f32.gmra.mxu1 %vm2363_vm7, %v4122_v36  ;;  %v2132_v35 = vadd.s32 %v6221_v11, %v2129_v6  ;;  %3621 = vmatprep.mubr.msk.f32.mxu0 %vm2366_vm13, %v4122_v36  ;;  %v3011_v34 = vmul.f32 %v6271_v31, %v3563_v18  ;;  %vm2965_vm8 = vcmp.lt.s32.totalorder %v6435_v32, 512 }
 0x301   : > { %2845 = vst [vmem:[%s4214_s11 + $0x50] sm:$0xff] %v3561_v8  ;;  %v3009_v20 = vmul.f32 %v6254_v42, %v3561_v8  ;;  %3653 = vmatprep.mubr.msk.f32.mxu1 %vm2368_vm10, %v4122_v36  ;;  %v2148_v53 = vpop.xlane.xlu1 %2147  ;;  %v3085_v11 = vadd.f32 %v6347_v1, %v3008_v47  ;;  %v3127_v2 = vadd.f32 %v6356_v30, %v3010_v23  ;;  %v6515_v47 = vsel %vm2965_vm8, 1.0, %v4121_v28 }
 0x302   : > { %v3064_v12 = vadd.f32 %v6358_v9, %v3007_v52  ;;  %v3013_v7 = vmul.f32 %v6271_v31, %v3565_v61  ;;  %v2149_v46 = vcvt.f32.s32 %v2148_v53  ;;  %vm2370_vm14 = vcmp.eq.s32.totalorder %v5835_v4, %v2132_v35 }
 0x303   : > { %v3106_v49 = vadd.f32 %v6361_v33, %v3009_v20  ;;  %vm2372_vm3 = vcmp.eq.s32.totalorder %v5846_v41, %v2132_v35  ;;  %v3086_v43 = vadd.f32 %v3085_v11, %v3012_v62  ;;  %v3128_v18 = vadd.f32 %v3127_v2, %v3014_v15  ;;  %3622 = vmatmul.mubr.msk.f32.gmra.mxu0 %vm2365_vm9, %v4122_v36 }
 0x304   : > { %v3065_v1 = vadd.f32 %v3064_v12, %v3011_v34  ;;  %3654 = vmatmul.mubr.msk.f32.gmra.mxu1 %vm2367_vm12, %v4122_v36  ;;  %v3568_v30 = vsel %vm2370_vm14, 1.0, %v4121_v28  ;;  %v2152_v9 = vadd.s32 %v6223_v14, %v2149_v46  ;;  %3623 = vmatprep.mubr.msk.f32.mxu0 %vm2370_vm14, %v4122_v36  ;;  %v3570_v62 = vsel %vm2372_vm3, 1.0, %v4121_v28 }
 0x305   : > { %v3107_v33 = vadd.f32 %v3106_v49, %v3013_v7  ;;  %2852 = vst [vmem:[%s4214_s11 + $0x88] sm:$0xff] %v3568_v30  ;;  %v3016_v56 = vmul.f32 %v6280_v25, %v3568_v30  ;;  %3655 = vmatprep.mubr.msk.f32.mxu1 %vm2372_vm3, %v4122_v36  ;;  %v2168_v15 = vpop.xlane.xlu0 %2167  ;;  %2854 = vst [vmem:[%s4214_s11 + $0x98] sm:$0xff] %v3570_v62  ;;  %v3018_v24 = vmul.f32 %v6280_v25, %v3570_v62 }
 0x306   : > { %vm2369_vm4 = vcmp.eq.s32.totalorder %v7071_v17, %v2132_v35  ;;  %vm2371_vm6 = vcmp.eq.s32.totalorder %v5838_v29, %v2132_v35  ;;  %v6502_v14 = vsel %vm2964_vm15, 1.0, %v4121_v28  ;;  %v2169_v61 = vcvt.f32.s32 %v2168_v15 }
 0x307   : > { %v3087_v16 = vadd.f32 %v3086_v43, %v3016_v56  ;;  %v3567_v6 = vsel %vm2369_vm4, 1.0, %v4121_v28  ;;  %v3569_v38 = vsel %vm2371_vm6, 1.0, %v4121_v28  ;;  %v3129_v39 = vadd.f32 %v3128_v18, %v3018_v24  ;;  %3624 = vmatmul.mubr.msk.f32.gmra.mxu0 %vm2369_vm4, %v4122_v36 }
 0x308   : > { %2851 = vst [vmem:[%s4214_s11 + $0x80] sm:$0xff] %v3567_v6  ;;  %v3015_v13 = vmul.f32 %v6280_v25, %v3567_v6  ;;  %3656 = vmatmul.mubr.msk.f32.gmra.mxu1 %vm2371_vm6, %v4122_v36  ;;  %2853 = vst [vmem:[%s4214_s11 + $0x90] sm:$0xff] %v3569_v38  ;;  %v3017_v5 = vmul.f32 %v6280_v25, %v3569_v38  ;;  %v2172_v23 = vadd.s32 %v6227_v51, %v2169_v61 }
 0x309   : > { %vm2374_vm1 = vcmp.eq.s32.totalorder %v5835_v4, %v2152_v9  ;;  %vm2376_vm13 = vcmp.eq.s32.totalorder %v5846_v41, %v2152_v9  ;;  %vm2373_vm10 = vcmp.eq.s32.totalorder %v7071_v17, %v2152_v9  ;;  %v2188_v52 = vpop.xlane.xlu1 %2187  ;;  %vm2375_vm9 = vcmp.eq.s32.totalorder %v5838_v29, %v2152_v9 }
 0x30a   : > { %v3066_v8 = vadd.f32 %v3065_v1, %v3015_v13  ;;  %v3108_v35 = vadd.f32 %v3107_v33, %v3017_v5  ;;  %v3572_v20 = vsel %vm2374_vm1, 1.0, %v4121_v28  ;;  %3625 = vmatprep.mubr.msk.f32.mxu0 %vm2374_vm1, %v4122_v36  ;;  %v3574_v32 = vsel %vm2376_vm13, 1.0, %v4121_v28  ;;  %3657 = vmatprep.mubr.msk.f32.mxu1 %vm2376_vm13, %v4122_v36 }
 0x30b   : > { %v2189_v34 = vcvt.f32.s32 %v2188_v52  ;;  %2856 = vst [vmem:[%s4214_s11 + $0xa8] sm:$0xff] %v3572_v20  ;;  %v3020_v51 = vmul.f32 %v6290_v45, %v3572_v20  ;;  %2858 = vst [vmem:[%s4214_s11 + $0xb8] sm:$0xff] %v3574_v32  ;;  %v3022_v53 = vmul.f32 %v6290_v45, %v3574_v32  ;;  %v3571_v11 = vsel %vm2373_vm10, 1.0, %v4121_v28  ;;  %3626 = vmatmul.mubr.msk.f32.gmra.mxu0 %vm2373_vm10, %v4122_v36 }
 0x30c   : > { %2855 = vst [vmem:[%s4214_s11 + $0xa0] sm:$0xff] %v3571_v11  ;;  %v3019_v2 = vmul.f32 %v6290_v45, %v3571_v11  ;;  %vm2378_vm12 = vcmp.eq.s32.totalorder %v5835_v4, %v2172_v23  ;;  %vm2380_vm15 = vcmp.eq.s32.totalorder %v5846_v41, %v2172_v23  ;;  %v3573_v49 = vsel %vm2375_vm9, 1.0, %v4121_v28  ;;  %3658 = vmatmul.mubr.msk.f32.gmra.mxu1 %vm2375_vm9, %v4122_v36 }
 0x30d   : > { %v2192_v12 = vadd.s32 %v6229_v19, %v2189_v34  ;;  %v3088_v7 = vadd.f32 %v3087_v16, %v3020_v51  ;;  %v3130_v46 = vadd.f32 %v3129_v39, %v3022_v53  ;;  %3627 = vmatprep.mubr.msk.f32.mxu0 %vm2378_vm12, %v4122_v36  ;;  %v2208_v43 = vpop.xlane.xlu0 %2207  ;;  %2857 = vst [vmem:[%s4214_s11 + $0xb0] sm:$0xff] %v3573_v49  ;;  %v3576_v30 = vsel %vm2378_vm12, 1.0, %v4121_v28 }
 0x30e   : > { %v3067_v18 = vadd.f32 %v3066_v8, %v3019_v2  ;;  %v3021_v1 = vmul.f32 %v6290_v45, %v3573_v49  ;;  %v3578_v9 = vsel %vm2380_vm15, 1.0, %v4121_v28  ;;  %3659 = vmatprep.mubr.msk.f32.mxu1 %vm2380_vm15, %v4122_v36  ;;  %v2209_v19 = vcvt.f32.s32 %v2208_v43  ;;  %2860 = vst [vmem:[%s4214_s11 + $0xc8] sm:$0xff] %v3576_v30 }
 0x30f   : > { %v3024_v33 = vmul.f32 %v6366_v27, %v3576_v30  ;;  %2862 = vst [vmem:[%s4214_s11 + $0xd8] sm:$0xff] %v3578_v9  ;;  %v3026_v56 = vmul.f32 %v6366_v27, %v3578_v9  ;;  %vm2377_vm0 = vcmp.eq.s32.totalorder %v7071_v17, %v2172_v23  ;;  %vm2379_vm11 = vcmp.eq.s32.totalorder %v5838_v29, %v2172_v23 }
 0x310   : > { %v3109_v62 = vadd.f32 %v3108_v35, %v3021_v1  ;;  %v3575_v15 = vsel %vm2377_vm0, 1.0, %v4121_v28  ;;  %3628 = vmatmul.mubr.msk.f32.gmra.mxu0 %vm2377_vm0, %v4122_v36  ;;  %vm2382_vm5 = vcmp.eq.s32.totalorder %v5835_v4, %v2192_v12  ;;  %v2212_v24 = vadd.s32 %v6244_v58, %v2209_v19  ;;  %3660 = vmatmul.mubr.msk.f32.gmra.mxu1 %vm2379_vm11, %v4122_v36 }
 0x311   : > { %v3089_v61 = vadd.f32 %v3088_v7, %v3024_v33  ;;  %v3131_v16 = vadd.f32 %v3130_v46, %v3026_v56  ;;  %2859 = vst [vmem:[%s4214_s11 + $0xc0] sm:$0xff] %v3575_v15  ;;  %v3023_v6 = vmul.f32 %v6366_v27, %v3575_v15  ;;  %v2228_v38 = vpop.xlane.xlu1 %2227  ;;  %v3577_v39 = vsel %vm2379_vm11, 1.0, %v4121_v28  ;;  %3629 = vmatprep.mubr.msk.f32.mxu0 %vm2382_vm5, %v4122_v36 }
 0x312   : > { %v3580_v13 = vsel %vm2382_vm5, 1.0, %v4121_v28  ;;  %vm2384_vm7 = vcmp.eq.s32.totalorder %v5846_v41, %v2192_v12  ;;  %vm2381_vm8 = vcmp.eq.s32.totalorder %v7071_v17, %v2192_v12  ;;  %v2229_v58 = vcvt.f32.s32 %v2228_v38  ;;  %2861 = vst [vmem:[%s4214_s11 + $0xd0] sm:$0xff] %v3577_v39 }
 0x313   : > { %v3068_v5 = vadd.f32 %v3067_v18, %v3023_v6  ;;  %v3025_v23 = vmul.f32 %v6366_v27, %v3577_v39  ;;  %2864 = vst [vmem:[%s4214_s11 + $0xe8] sm:$0xff] %v3580_v13  ;;  %v3028_v52 = vmul.f32 %v6371_v40, %v3580_v13  ;;  %3661 = vmatprep.mubr.msk.f32.mxu1 %vm2384_vm7, %v4122_v36  ;;  %v3582_v8 = vsel %vm2384_vm7, 1.0, %v4121_v28 }
 0x314   : > { %v3579_v35 = vsel %vm2381_vm8, 1.0, %v4121_v28  ;;  %3630 = vmatmul.mubr.msk.f32.gmra.mxu0 %vm2381_vm8, %v4122_v36  ;;  %vm2383_vm14 = vcmp.eq.s32.totalorder %v5838_v29, %v2192_v12  ;;  %vm2386_vm3 = vcmp.eq.s32.totalorder %v5835_v4, %v2212_v24  ;;  %v2232_v20 = vadd.s32 %v6246_v57, %v2229_v58  ;;  %2866 = vst [vmem:[%s4214_s11 + $0xf8] sm:$0xff] %v3582_v8 }
 0x315   : > { %v3110_v32 = vadd.f32 %v3109_v62, %v3025_v23  ;;  %v3090_v34 = vadd.f32 %v3089_v61, %v3028_v52  ;;  %v3030_v51 = vmul.f32 %v6371_v40, %v3582_v8  ;;  %2863 = vst [vmem:[%s4214_s11 + $0xe0] sm:$0xff] %v3579_v35  ;;  %3662 = vmatmul.mubr.msk.f32.gmra.mxu1 %vm2383_vm14, %v4122_v36  ;;  %v2248_v53 = vpop.xlane.xlu0 %2247  ;;  %v3581_v2 = vsel %vm2383_vm14, 1.0, %v4121_v28 }
 0x316   : > { %v3027_v11 = vmul.f32 %v6371_v40, %v3579_v35  ;;  %v3584_v12 = vsel %vm2386_vm3, 1.0, %v4121_v28  ;;  %3631 = vmatprep.mubr.msk.f32.mxu0 %vm2386_vm3, %v4122_v36  ;;  %vm2388_vm4 = vcmp.eq.s32.totalorder %v5846_v41, %v2212_v24  ;;  %v2249_v57 = vcvt.f32.s32 %v2248_v53  ;;  %2865 = vst [vmem:[%s4214_s11 + $0xf0] sm:$0xff] %v3581_v2 }
 0x317   : > { %v3132_v7 = vadd.f32 %v3131_v16, %v3030_v51  ;;  %v3029_v46 = vmul.f32 %v6371_v40, %v3581_v2  ;;  %2868 = vst [vmem:[%s4214_s11 + $0x108] sm:$0xff] %v3584_v12  ;;  %v3032_v49 = vmul.f32 %v6376_v48, %v3584_v12  ;;  %3663 = vmatprep.mubr.msk.f32.mxu1 %vm2388_vm4, %v4122_v36  ;;  %v3586_v18 = vsel %vm2388_vm4, 1.0, %v4121_v28 }
 0x318   : > { %v3069_v43 = vadd.f32 %v3068_v5, %v3027_v11  ;;  %vm2385_vm6 = vcmp.eq.s32.totalorder %v7071_v17, %v2212_v24  ;;  %vm2387_vm1 = vcmp.eq.s32.totalorder %v5838_v29, %v2212_v24  ;;  %v6592_v1 = vadd.s32 %v6250_v54, %v2249_v57  ;;  %2870 = vst [vmem:[%s4214_s11 + $0x118] sm:$0xff] %v3586_v18 }
 0x319   : > { %v3111_v30 = vadd.f32 %v3110_v32, %v3029_v46  ;;  %v3091_v9 = vadd.f32 %v3090_v34, %v3032_v49  ;;  %v3034_v19 = vmul.f32 %v6376_v48, %v3586_v18  ;;  %3632 = vmatmul.mubr.msk.f32.gmra.mxu0 %vm2385_vm6, %v4122_v36  ;;  %v2268_v33 = vpop.xlane.xlu1 %2267  ;;  %v3583_v56 = vsel %vm2385_vm6, 1.0, %v4121_v28  ;;  %3664 = vmatmul.mubr.msk.f32.gmra.mxu1 %vm2387_vm1, %v4122_v36 }
 0x31a   : > { %v3585_v62 = vsel %vm2387_vm1, 1.0, %v4121_v28  ;;  %vm2390_vm13 = vcmp.eq.s32.totalorder %v5835_v4, %v2232_v20  ;;  %vm2392_vm10 = vcmp.eq.s32.totalorder %v5846_v41, %v2232_v20  ;;  %v2269_v54 = vcvt.f32.s32 %v2268_v33  ;;  %2867 = vst [vmem:[%s4214_s11 + $0x100] sm:$0xff] %v3583_v56 }
 0x31b   : > { %v3133_v15 = vadd.f32 %v3132_v7, %v3034_v19  ;;  %v3031_v24 = vmul.f32 %v6376_v48, %v3583_v56  ;;  %2869 = vst [vmem:[%s4214_s11 + $0x110] sm:$0xff] %v3585_v62  ;;  %v3033_v61 = vmul.f32 %v6376_v48, %v3585_v62  ;;  %3633 = vmatprep.mubr.msk.f32.mxu0 %vm2390_vm13, %v4122_v36  ;;  %v3588_v16 = vsel %vm2390_vm13, 1.0, %v4121_v28 }
 0x31c   : > { %3665 = vmatprep.mubr.msk.f32.mxu1 %vm2392_vm10, %v4122_v36  ;;  %v3590_v6 = vsel %vm2392_vm10, 1.0, %v4121_v28  ;;  %vm2389_vm9 = vcmp.eq.s32.totalorder %v7071_v17, %v2232_v20  ;;  %vm2391_vm12 = vcmp.eq.s32.totalorder %v5838_v29, %v2232_v20  ;;  %v6613_v38 = vadd.s32 %v6268_v44, %v2269_v54  ;;  %2872 = vst [vmem:[%s4214_s11 + $0x128] sm:$0xff] %v3588_v16 }
 0x31d   : > { %v3070_v39 = vadd.f32 %v3069_v43, %v3031_v24  ;;  %v3112_v13 = vadd.f32 %v3111_v30, %v3033_v61  ;;  %v3036_v58 = vmul.f32 %v6384_v0, %v3588_v16  ;;  %2874 = vst [vmem:[%s4214_s11 + $0x138] sm:$0xff] %v3590_v6  ;;  %3634 = vmatmul.mubr.msk.f32.gmra.mxu0 %vm2389_vm9, %v4122_v36  ;;  %v2288_v5 = vpop.xlane.xlu0 %2287  ;;  %v3587_v8 = vsel %vm2389_vm9, 1.0, %v4121_v28 }
 0x31e   : > { %v3038_v23 = vmul.f32 %v6384_v0, %v3590_v6  ;;  %v2308_v52 = vpop.xlane.xlu1 %2307  ;;  %v3589_v35 = vsel %vm2391_vm12, 1.0, %v4121_v28  ;;  %3666 = vmatmul.mubr.msk.f32.gmra.mxu1 %vm2391_vm12, %v4122_v36  ;;  %vm2394_vm15 = vcmp.eq.s32.totalorder %v5835_v4, %v6592_v1  ;;  %v2289_v44 = vcvt.f32.s32 %v2288_v5  ;;  %2871 = vst [vmem:[%s4214_s11 + $0x120] sm:$0xff] %v3587_v8 }
 0x31f   : > { %v3092_v20 = vadd.f32 %v3091_v9, %v3036_v58  ;;  %v2309_v32 = vcvt.f32.s32 %v2308_v52  ;;  %v3035_v34 = vmul.f32 %v6384_v0, %v3587_v8  ;;  %2873 = vst [vmem:[%s4214_s11 + $0x130] sm:$0xff] %v3589_v35  ;;  %3635 = vmatprep.mubr.msk.f32.mxu0 %vm2394_vm15, %v4122_v36  ;;  %v3037_v53 = vmul.f32 %v6384_v0, %v3589_v35 }
 0x320   : > { %v3134_v51 = vadd.f32 %v3133_v15, %v3038_v23  ;;  %v3592_v11 = vsel %vm2394_vm15, 1.0, %v4121_v28  ;;  %vm2396_vm0 = vcmp.eq.s32.totalorder %v5846_v41, %v6592_v1  ;;  %v6634_v2 = vadd.s32 %v6277_v55, %v2289_v44 }
 0x321   : > { %v6637_v12 = vadd.s32 %v6284_v21, %v2309_v32  ;;  %v3071_v57 = vadd.f32 %v3070_v39, %v3035_v34  ;;  %2876 = vst [vmem:[%s4214_s11 + $0x148] sm:$0xff] %v3592_v11  ;;  %v3040_v7 = vmul.f32 %v6387_v10, %v3592_v11  ;;  %3667 = vmatprep.mubr.msk.f32.mxu1 %vm2396_vm0, %v4122_v36  ;;  %v3594_v49 = vsel %vm2396_vm0, 1.0, %v4121_v28  ;;  %v2328_v55 = vpop.xlane.xlu0 %2327 }
 0x322   : > { %v3113_v46 = vadd.f32 %v3112_v13, %v3037_v53  ;;  %vm2393_vm11 = vcmp.eq.s32.totalorder %v7071_v17, %v6592_v1  ;;  %vm2395_vm5 = vcmp.eq.s32.totalorder %v5838_v29, %v6592_v1  ;;  %v2348_v21 = vpop.xlane.xlu1 %2347  ;;  %2878 = vst [vmem:[%s4214_s11 + $0x158] sm:$0xff] %v3594_v49  ;;  %v3042_v18 = vmul.f32 %v6387_v10, %v3594_v49 }
 0x323   : > { %v3093_v43 = vadd.f32 %v3092_v20, %v3040_v7  ;;  %v3591_v30 = vsel %vm2393_vm11, 1.0, %v4121_v28  ;;  %3636 = vmatmul.mubr.msk.f32.gmra.mxu0 %vm2393_vm11, %v4122_v36  ;;  %v3593_v9 = vsel %vm2395_vm5, 1.0, %v4121_v28  ;;  %3668 = vmatmul.mubr.msk.f32.gmra.mxu1 %vm2395_vm5, %v4122_v36  ;;  %v2329_v33 = vcvt.f32.s32 %v2328_v55 }
 0x324   : > { %2875 = vst [vmem:[%s4214_s11 + $0x140] sm:$0xff] %v3591_v30  ;;  %v3039_v19 = vmul.f32 %v6387_v10, %v3591_v30  ;;  %2877 = vst [vmem:[%s4214_s11 + $0x150] sm:$0xff] %v3593_v9  ;;  %v3041_v1 = vmul.f32 %v6387_v10, %v3593_v9  ;;  %vm2398_vm7 = vcmp.eq.s32.totalorder %v5835_v4, %v6613_v38  ;;  %v2349_v54 = vcvt.f32.s32 %v2348_v21 }
 0x325   : > { %v3135_v56 = vadd.f32 %v3134_v51, %v3042_v18  ;;  %v3596_v62 = vsel %vm2398_vm7, 1.0, %v4121_v28  ;;  %3637 = vmatprep.mubr.msk.f32.mxu0 %vm2398_vm7, %v4122_v36  ;;  %vm2400_vm8 = vcmp.eq.s32.totalorder %v5846_v41, %v6613_v38  ;;  %v6664_v61 = vadd.s32 %v6286_v50, %v2329_v33 }
 0x326   : > { %v3072_v15 = vadd.f32 %v3071_v57, %v3039_v19  ;;  %v3114_v24 = vadd.f32 %v3113_v46, %v3041_v1  ;;  %2880 = vst [vmem:[%s4214_s11 + $0x168] sm:$0xff] %v3596_v62  ;;  %v3044_v16 = vmul.f32 %v6393_v63, %v3596_v62  ;;  %3669 = vmatprep.mubr.msk.f32.mxu1 %vm2400_vm8, %v4122_v36  ;;  %v3598_v6 = vsel %vm2400_vm8, 1.0, %v4121_v28 }
 0x327   : > { %v6671_v39 = vadd.s32 %v6292_v60, %v2349_v54  ;;  %vm2397_vm14 = vcmp.eq.s32.totalorder %v7071_v17, %v6613_v38  ;;  %vm2399_vm3 = vcmp.eq.s32.totalorder %v5838_v29, %v6613_v38  ;;  %2882 = vst [vmem:[%s4214_s11 + $0x178] sm:$0xff] %v3598_v6  ;;  %v3046_v50 = vmul.f32 %v6393_v63, %v3598_v6 }
 0x328   : > { %v3094_v13 = vadd.f32 %v3093_v43, %v3044_v16  ;;  %v3595_v58 = vsel %vm2397_vm14, 1.0, %v4121_v28  ;;  %3638 = vmatmul.mubr.msk.f32.gmra.mxu0 %vm2397_vm14, %v4122_v36  ;;  %v3597_v5 = vsel %vm2399_vm3, 1.0, %v4121_v28  ;;  %3670 = vmatmul.mubr.msk.f32.gmra.mxu1 %vm2399_vm3, %v4122_v36  ;;  %vm2402_vm4 = vcmp.eq.s32.totalorder %v5835_v4, %v6634_v2 }
 0x329   : > { %2879 = vst [vmem:[%s4214_s11 + $0x160] sm:$0xff] %v3595_v58  ;;  %v3043_v60 = vmul.f32 %v6393_v63, %v3595_v58  ;;  %2881 = vst [vmem:[%s4214_s11 + $0x170] sm:$0xff] %v3597_v5  ;;  %v3045_v38 = vmul.f32 %v6393_v63, %v3597_v5  ;;  %vm2404_vm6 = vcmp.eq.s32.totalorder %v5846_v41, %v6634_v2  ;;  %v3600_v52 = vsel %vm2402_vm4, 1.0, %v4121_v28 }
 0x32a   : > { %v3136_v23 = vadd.f32 %v3135_v56, %v3046_v50  ;;  %3639 = vmatprep.mubr.msk.f32.mxu0 %vm2402_vm4, %v4122_v36  ;;  %v3602_v8 = vsel %vm2404_vm6, 1.0, %v4121_v28  ;;  %3671 = vmatprep.mubr.msk.f32.mxu1 %vm2404_vm6, %v4122_v36  ;;  %vm2401_vm1 = vcmp.eq.s32.totalorder %v7071_v17, %v6634_v2  ;;  %2884 = vst [vmem:[%s4214_s11 + $0x188] sm:$0xff] %v3600_v52 }
 0x32b   : > { %v3073_v35 = vadd.f32 %v3072_v15, %v3043_v60  ;;  %v3115_v44 = vadd.f32 %v3114_v24, %v3045_v38  ;;  %v3048_v20 = vmul.f32 %v6422_v22, %v3600_v52  ;;  %2886 = vst [vmem:[%s4214_s11 + $0x198] sm:$0xff] %v3602_v8  ;;  %v3050_v32 = vmul.f32 %v6422_v22, %v3602_v8 }
 0x32c   : > { %v3599_v34 = vsel %vm2401_vm1, 1.0, %v4121_v28  ;;  %3640 = vmatmul.mubr.msk.f32.gmra.mxu0 %vm2401_vm1, %v4122_v36  ;;  %vm2403_vm13 = vcmp.eq.s32.totalorder %v5838_v29, %v6634_v2  ;;  %vm2406_vm10 = vcmp.eq.s32.totalorder %v5835_v4, %v6637_v12  ;;  %vm2408_vm9 = vcmp.eq.s32.totalorder %v5846_v41, %v6637_v12 }
 0x32d   : > { %v3095_v51 = vadd.f32 %v3094_v13, %v3048_v20  ;;  %v3137_v53 = vadd.f32 %v3136_v23, %v3050_v32  ;;  %2883 = vst [vmem:[%s4214_s11 + $0x180] sm:$0xff] %v3599_v34  ;;  %v3047_v11 = vmul.f32 %v6422_v22, %v3599_v34  ;;  %v3601_v57 = vsel %vm2403_vm13, 1.0, %v4121_v28  ;;  %3672 = vmatmul.mubr.msk.f32.gmra.mxu1 %vm2403_vm13, %v4122_v36 }
 0x32e   : > { %3641 = vmatprep.mubr.msk.f32.mxu0 %vm2406_vm10, %v4122_v36  ;;  %2885 = vst [vmem:[%s4214_s11 + $0x190] sm:$0xff] %v3601_v57  ;;  %v3049_v2 = vmul.f32 %v6422_v22, %v3601_v57  ;;  %v3604_v7 = vsel %vm2406_vm10, 1.0, %v4121_v28  ;;  %v3606_v46 = vsel %vm2408_vm9, 1.0, %v4121_v28  ;;  %3673 = vmatprep.mubr.msk.f32.mxu1 %vm2408_vm9, %v4122_v36  ;;  %vm2405_vm12 = vcmp.eq.s32.totalorder %v7071_v17, %v6637_v12 }
 0x32f   : > { %v3074_v49 = vadd.f32 %v3073_v35, %v3047_v11  ;;  %2888 = vst [vmem:[%s4214_s11 + $0x1a8] sm:$0xff] %v3604_v7  ;;  %v3052_v55 = vmul.f32 %v6425_v37, %v3604_v7  ;;  %2890 = vst [vmem:[%s4214_s11 + $0x1b8] sm:$0xff] %v3606_v46  ;;  %v3054_v21 = vmul.f32 %v6425_v37, %v3606_v46  ;;  %v3603_v43 = vsel %vm2405_vm12, 1.0, %v4121_v28 }
 0x330   : > { %v3116_v18 = vadd.f32 %v3115_v44, %v3049_v2  ;;  %3642 = vmatmul.mubr.msk.f32.gmra.mxu0 %vm2405_vm12, %v4122_v36  ;;  %2887 = vst [vmem:[%s4214_s11 + $0x1a0] sm:$0xff] %v3603_v43  ;;  %v3051_v30 = vmul.f32 %v6425_v37, %v3603_v43  ;;  %vm2407_vm15 = vcmp.eq.s32.totalorder %v5838_v29, %v6637_v12  ;;  %v4123_v46 = vmov 1966171168  }
 0x331   : > { %vm2410_vm0 = vcmp.eq.s32.totalorder %v5835_v4, %v6664_v61  ;;  %v3096_v9 = vadd.f32 %v3095_v51, %v3052_v55  ;;  %v3138_v19 = vadd.f32 %v3137_v53, %v3054_v21  ;;  %v3605_v1 = vsel %vm2407_vm15, 1.0, %v4121_v28  ;;  %3674 = vmatmul.mubr.msk.f32.gmra.mxu1 %vm2407_vm15, %v4122_v36 }
 0x332   : > { %v3608_v33 = vsel %vm2410_vm0, 1.0, %v4121_v28  ;;  %3643 = vmatprep.mubr.msk.f32.mxu0 %vm2410_vm0, %v4122_v36  ;;  %v3075_v56 = vadd.f32 %v3074_v49, %v3051_v30  ;;  %2889 = vst [vmem:[%s4214_s11 + $0x1b0] sm:$0xff] %v3605_v1  ;;  %v3053_v62 = vmul.f32 %v6425_v37, %v3605_v1  ;;  %vm2412_vm11 = vcmp.eq.s32.totalorder %v5846_v41, %v6664_v61 }
 0x333   : > { %2892 = vst [vmem:[%s4214_s11 + $0x1c8] sm:$0xff] %v3608_v33  ;;  %v3056_v12 = vmul.f32 %v6502_v14, %v3608_v33  ;;  %v3610_v54 = vsel %vm2412_vm11, 1.0, %v4121_v28  ;;  %3675 = vmatprep.mubr.msk.f32.mxu1 %vm2412_vm11, %v4122_v36  ;;  %vm2409_vm5 = vcmp.eq.s32.totalorder %v7071_v17, %v6664_v61  ;;  %vm2411_vm7 = vcmp.eq.s32.totalorder %v5838_v29, %v6664_v61 }
 0x334   : > { %vm2414_vm8 = vcmp.eq.s32.totalorder %v5835_v4, %v6671_v39  ;;  %v3117_v15 = vadd.f32 %v3116_v18, %v3053_v62  ;;  %2894 = vst [vmem:[%s4214_s11 + $0x1d8] sm:$0xff] %v3610_v54  ;;  %v3058_v24 = vmul.f32 %v6502_v14, %v3610_v54  ;;  %v3607_v16 = vsel %vm2409_vm5, 1.0, %v4121_v28  ;;  %3644 = vmatmul.mubr.msk.f32.gmra.mxu0 %vm2409_vm5, %v4122_v36 }
 0x335   : > { %2891 = vst [vmem:[%s4214_s11 + $0x1c0] sm:$0xff] %v3607_v16  ;;  %v3055_v6 = vmul.f32 %v6502_v14, %v3607_v16  ;;  %v3609_v13 = vsel %vm2411_vm7, 1.0, %v4121_v28  ;;  %3676 = vmatmul.mubr.msk.f32.gmra.mxu1 %vm2411_vm7, %v4122_v36  ;;  %v3612_v61 = vsel %vm2414_vm8, 1.0, %v4121_v28  ;;  %3645 = vmatprep.mubr.msk.f32.mxu0 %vm2414_vm8, %v4122_v36  ;;  %vm2416_vm14 = vcmp.eq.s32.totalorder %v5846_v41, %v6671_v39 }
 0x336   : > { %v3097_v4 = vadd.f32 %v3096_v9, %v3056_v12  ;;  %2893 = vst [vmem:[%s4214_s11 + $0x1d0] sm:$0xff] %v3609_v13  ;;  %v3057_v50 = vmul.f32 %v6502_v14, %v3609_v13  ;;  %2896 = vst [vmem:[%s4214_s11 + $0x1e8] sm:$0xff] %v3612_v61  ;;  %v3060_v58 = vmul.f32 %v6515_v47, %v3612_v61  ;;  %v3614_v5 = vsel %vm2416_vm14, 1.0, %v4121_v28 }
 0x337   : > { %3677 = vmatprep.mubr.msk.f32.mxu1 %vm2416_vm14, %v4122_v36  ;;  %v3139_v60 = vadd.f32 %v3138_v19, %v3058_v24  ;;  %2898 = vst [vmem:[%s4214_s11 + $0x1f8] sm:$0xff] %v3614_v5  ;;  %v3062_v38 = vmul.f32 %v6515_v47, %v3614_v5  ;;  %vm2413_vm3 = vcmp.eq.s32.totalorder %v7071_v17, %v6671_v39  ;;  %v3154_v49 = vunpack.c.l.s4 %v4123_v46 }
 0x338   : > { %vm2415_vm4 = vcmp.eq.s32.totalorder %v5838_v29, %v6671_v39  ;;  %v3076_v41 = vadd.f32 %v3075_v56, %v3055_v6  ;;  %v3098_v23 = vadd.f32 %v3097_v4, %v3060_v58  ;;  %v3611_v52 = vsel %vm2413_vm3, 1.0, %v4121_v28  ;;  %3646 = vmatmul.mubr.msk.f32.gmra.mxu0 %vm2413_vm3, %v4122_v36  ;;  %v2998_v58 = vld [vmem:[#allocation2] sm:$0xf] }
 0x339   : > { %v3613_v8 = vsel %vm2415_vm4, 1.0, %v4121_v28  ;;  %v3118_v35 = vadd.f32 %v3117_v15, %v3057_v50  ;;  %v3140_v44 = vadd.f32 %v3139_v60, %v3062_v38  ;;  %2895 = vst [vmem:[%s4214_s11 + $0x1e0] sm:$0xff] %v3611_v52  ;;  %v3059_v20 = vmul.f32 %v6515_v47, %v3611_v52  ;;  %3678 = vmatmul.mubr.msk.f32.gmra.mxu1 %vm2415_vm4, %v4122_v36 }
 0x33a   : > { %2897 = vst [vmem:[%s4214_s11 + $0x1f0] sm:$0xff] %v3613_v8  ;;  %v3061_v17 = vmul.f32 %v6515_v47, %v3613_v8  ;;  %v3099_v32 = vrot.slane %v3098_v23, 4  ;;  %v3155_v1 = vunpack.c.0.s8 %v3154_v49  ;;  %v7095_v60 = vlaneseq }
 0x33b   : > { %v3141_v29 = vrot.slane %v3140_v44, 4  ;;  %v3077_v39 = vadd.f32 %v3076_v41, %v3059_v20  ;;  %vm3269_vm1 = vcmask 516096  }
 0x33c   : > { %v3119_v34 = vadd.f32 %v3118_v35, %v3061_v17  ;;  %v3100_v51 = vadd.f32 %v3099_v32, %v3098_v23  ;;  %v3158_v24 = vsub.s32 %v3155_v1, %v7094_v59  ;;  %vm3179_vm6 = vcmp.lt.s32.totalorder %v7095_v60, 512 }
 0x33d   : > { %v3142_v53 = vadd.f32 %v3141_v29, %v3140_v44  ;;  %v3078_v11 = vrot.slane %v3077_v39, 4 }
 0x33e   : > { %v3120_v57 = vrot.slane %v3119_v34, 4  ;;  %v3101_v2 = vrot.slane %v3100_v51, 2 }
 0x33f   : > { %v3143_v28 = vrot.slane %v3142_v53, 2  ;;  %v3079_v7 = vadd.f32 %v3078_v11, %v3077_v39 }
 0x340   : > { %v3121_v55 = vadd.f32 %v3120_v57, %v3119_v34  ;;  %v3102_v21 = vadd.f32 %v3101_v2, %v3100_v51 }
 0x341   : > { %v3144_v43 = vadd.f32 %v3143_v28, %v3142_v53  ;;  %v3080_v36 = vrot.slane %v3079_v7, 2 }
 0x342   : > { %v3122_v18 = vrot.slane %v3121_v55, 2  ;;  %v3103_v30 = vrot.slane %v3102_v21, 1 }
 0x343   : > { %v3145_v9 = vrot.slane %v3144_v43, 1  ;;  %v3081_v19 = vadd.f32 %v3080_v36, %v3079_v7 }
 0x344   : > { %v3123_v33 = vadd.f32 %v3122_v18, %v3121_v55  ;;  %v3104_v56 = vadd.f32 %v3103_v30, %v3102_v21 }
 0x345   : > { %v3146_v62 = vadd.f32 %v3145_v9, %v3144_v43  ;;  %v3082_v12 = vrot.slane %v3081_v19, 1 }
 0x346   : > { %v3124_v54 = vrot.slane %v3123_v33, 1 }
 0x347   : > { %v3083_v15 = vadd.f32 %v3082_v12, %v3081_v19 }
 0x348   : > { %v3125_v16 = vadd.f32 %v3124_v54, %v3123_v33 }
 0x349   : > { %v3151_v6 = vcombine.low %v3083_v15, %v3104_v56 }
 0x34a   : > { %v3152_v13 = vcombine.low %v3125_v16, %v3146_v62 }
 0x34b   : > { %v3159_v61 = vrot.slane %v3151_v6, %v3158_v24 }
 0x34c   : > { %v3166_v4 = vrot.slane %v3152_v13, %v3158_v24 }
 0x34e   : > { %v3167_v50 = vcombine.low %v3159_v61, %v3166_v4 }
 0x350   : > { %v3174_v5 = vrot.slane %v3167_v50, %v3158_v24 }
 0x352   : > { %v3176_v38 = vadd.f32 %v3174_v5, %v2998_v58 }
 0x354   : > { %3181 = vst.msk [vmem:[#allocation2] sm:$0xf] %vm3179_vm6, %v3176_v38 }
 0x3b0   : > { %v3865_v41 = vpop.f32.mrf.mxu0  ;;  %v3945_v23 = vpop.f32.mrf.mxu1 }
 0x3b2   : > { %v3866_v52 = vpop.f32.mrf.mxu0  ;;  %v3946_v8 = vpop.f32.mrf.mxu1 }
 0x3b3   : > { %v3867_v35 = vadd.f32 %v3866_v52, %v3865_v41  ;;  %v3947_v59 = vadd.f32 %v3946_v8, %v3945_v23 }
 0x3b4   : > { %v3868_v44 = vpop.f32.mrf.mxu0  ;;  %v3948_v20 = vpop.f32.mrf.mxu1 }
 0x3b5   : > { %v6785_v17 = vadd.f32 %v3947_v59, %v3867_v35 }
 0x3b6   : > { %v3869_v32 = vpop.f32.mrf.mxu0  ;;  %v3949_v29 = vpop.f32.mrf.mxu1 }
 0x3b7   : > { %2899 = vst.msk [vmem:[%s4212_s10] sm:$0xff] %vm317_vm2, %v6785_v17  ;;  %v3870_v39 = vadd.f32 %v3869_v32, %v3868_v44  ;;  %v3950_v34 = vadd.f32 %v3949_v29, %v3948_v20 }
 0x3b9   : > { %v2762_v51 = vadd.f32 %v3950_v34, %v3870_v39  ;;  %v4038_v34 = vld [vmem:[%s4207_s7 + $0x8] sm:$0xff] }
 0x3bb   : > { %2900 = vst.msk [vmem:[%s4212_s10 + $0x8] sm:$0xff] %vm317_vm2, %v2762_v51 }
 0x3bf   : > { %v3871_v53 = vpop.f32.mrf.mxu0 }
 0x3c0   : > { %v3951_v11 = vpop.f32.mrf.mxu1 }
 0x3c1   : > { %v3872_v57 = vpop.f32.mrf.mxu0 }
 0x3c2   : > { %v3952_v2 = vpop.f32.mrf.mxu1  ;;  %v3873_v28 = vadd.f32 %v3872_v57, %v3871_v53  ;;  %v3184_v53 = vsub.f32 %v2762_v51, %v4038_v34 }
 0x3c3   : > { %v3953_v7 = vadd.f32 %v3952_v2, %v3951_v11  ;;  %v3874_v46 = vpop.f32.mrf.mxu0  ;;  %v4039_v2 = vld [vmem:[%s4207_s7] sm:$0xff] }
 0x3c4   : > { %v3954_v49 = vpop.f32.mrf.mxu1 }
 0x3c5   : > { %v2767_v55 = vadd.f32 %v3953_v7, %v3873_v28  ;;  %v3875_v21 = vpop.f32.mrf.mxu0  ;;  %v3183_v28 = vsub.f32 %v6785_v17, %v4039_v2  ;;  %v4040_v7 = vld [vmem:[%s4207_s7 + $0x10] sm:$0xff] }
 0x3c6   : > { %v3955_v43 = vpop.f32.mrf.mxu1  ;;  %v3876_v36 = vadd.f32 %v3875_v21, %v3874_v46 }
 0x3c7   : > { %2901 = vst.msk [vmem:[%s4212_s10 + $0x10] sm:$0xff] %vm317_vm2, %v2767_v55  ;;  %v3956_v18 = vadd.f32 %v3955_v43, %v3954_v49  ;;  %v3877_v30 = vpop.f32.mrf.mxu0  ;;  %v3185_v46 = vsub.f32 %v2767_v55, %v4040_v7 }
 0x3c8   : > { %v3957_v9 = vpop.f32.mrf.mxu1 }
 0x3c9   : > { %v2772_v19 = vadd.f32 %v3956_v18, %v3876_v36  ;;  %v3878_v1 = vpop.f32.mrf.mxu0 }
 0x3ca   : > { %v3958_v33 = vpop.f32.mrf.mxu1  ;;  %v3879_v56 = vadd.f32 %v3878_v1, %v3877_v30  ;;  %v3200_v30 = vmul.f32 %v3184_v53, %v3184_v53  ;;  %v4046_v53 = vld [vmem:[%s4207_s7 + $0x40] sm:$0xff] }
 0x3cb   : > { %2902 = vst.msk [vmem:[%s4212_s10 + $0x18] sm:$0xff] %vm317_vm2, %v2772_v19  ;;  %v3959_v62 = vadd.f32 %v3958_v33, %v3957_v9  ;;  %v3880_v12 = vpop.f32.mrf.mxu0  ;;  %v4041_v9 = vld [vmem:[%s4207_s7 + $0x18] sm:$0xff] }
 0x3cc   : > { %v3960_v15 = vpop.f32.mrf.mxu1  ;;  %v3186_v51 = vsub.f32 %v2772_v19, %v4041_v9 }
 0x3cd   : > { %v2777_v54 = vadd.f32 %v3959_v62, %v3879_v56  ;;  %v3881_v24 = vpop.f32.mrf.mxu0  ;;  %v3199_v56 = vmul.f32 %v3183_v28, %v3183_v28  ;;  %v3201_v62 = vmul.f32 %v3185_v46, %v3185_v46 }
 0x3ce   : > { %v3882_v16 = vadd.f32 %v3881_v24, %v3880_v12  ;;  %v3961_v6 = vpop.f32.mrf.mxu1  ;;  %v4042_v12 = vld [vmem:[%s4207_s7 + $0x20] sm:$0xff] }
 0x3cf   : > { %2903 = vst.msk [vmem:[%s4212_s10 + $0x20] sm:$0xff] %vm317_vm2, %v2777_v54  ;;  %v3962_v13 = vadd.f32 %v3961_v6, %v3960_v15  ;;  %v3187_v55 = vsub.f32 %v2777_v54, %v4042_v12  ;;  %v3216_v6 = vmul.f32 %v6239_v26, %v3200_v30 }
 0x3d0   : > { %v3883_v61 = vpop.f32.mrf.mxu0  ;;  %v3963_v4 = vpop.f32.mrf.mxu1 }
 0x3d1   : > { %v2782_v50 = vadd.f32 %v3962_v13, %v3882_v16  ;;  %v3202_v13 = vmul.f32 %v3186_v51, %v3186_v51 }
 0x3d2   : > { %v3884_v58 = vpop.f32.mrf.mxu0  ;;  %v3964_v60 = vpop.f32.mrf.mxu1 }
 0x3d3   : > { %v3885_v5 = vadd.f32 %v3884_v58, %v3883_v61  ;;  %2904 = vst.msk [vmem:[%s4212_s10 + $0x28] sm:$0xff] %vm317_vm2, %v2782_v50  ;;  %v3965_v38 = vadd.f32 %v3964_v60, %v3963_v4  ;;  %v4043_v61 = vld [vmem:[%s4207_s7 + $0x28] sm:$0xff]  ;;  %v3215_v4 = vmul.f32 %v6234_v3, %v3199_v56  ;;  %v3217_v58 = vmul.f32 %v6254_v42, %v3201_v62 }
 0x3d4   : > { %v3886_v41 = vpop.f32.mrf.mxu0  ;;  %v3188_v19 = vsub.f32 %v2782_v50, %v4043_v61  ;;  %v3218_v50 = vmul.f32 %v6271_v31, %v3202_v13 }
 0x3d5   : > { %v3966_v23 = vpop.f32.mrf.mxu1  ;;  %v2787_v52 = vadd.f32 %v3965_v38, %v3885_v5  ;;  %v3203_v38 = vmul.f32 %v3187_v55, %v3187_v55 }
 0x3d6   : > { %v3887_v8 = vpop.f32.mrf.mxu0  ;;  %v3204_v3 = vmul.f32 %v3188_v19, %v3188_v19  ;;  %v3236_v46 = vsel %vm317_vm2, %v3218_v50, 0.0 }
 0x3d7   : > { %v3888_v35 = vadd.f32 %v3887_v8, %v3886_v41  ;;  %v3967_v59 = vpop.f32.mrf.mxu1  ;;  %2905 = vst.msk [vmem:[%s4212_s10 + $0x30] sm:$0xff] %vm317_vm2, %v2787_v52  ;;  %v4044_v41 = vld [vmem:[%s4207_s7 + $0x30] sm:$0xff] }
 0x3d8   : > { %v3968_v44 = vadd.f32 %v3967_v59, %v3966_v23  ;;  %v3189_v54 = vsub.f32 %v2787_v52, %v4044_v41  ;;  %v3232_v59 = vsel %vm317_vm2, %v3216_v6, 0.0  ;;  %v3219_v52 = vmul.f32 %v6280_v25, %v3203_v38 }
 0x3d9   : > { %v3889_v20 = vpop.f32.mrf.mxu0  ;;  %v3969_v29 = vpop.f32.mrf.mxu1 }
 0x3da   : > { %v2792_v32 = vadd.f32 %v3968_v44, %v3888_v35  ;;  %v4045_v35 = vld [vmem:[%s4207_s7 + $0x38] sm:$0xff]  ;;  %v3205_v34 = vmul.f32 %v3189_v54, %v3189_v54  ;;  %v3238_v9 = vsel %vm317_vm2, %v3219_v52, 0.0 }
 0x3db   : > { %v3890_v39 = vpop.f32.mrf.mxu0  ;;  %v3970_v57 = vpop.f32.mrf.mxu1 }
 0x3dc   : > { %2906 = vst.msk [vmem:[%s4212_s10 + $0x38] sm:$0xff] %vm317_vm2, %v2792_v32  ;;  %v3891_v11 = vadd.f32 %v3890_v39, %v3889_v20  ;;  %v3971_v49 = vadd.f32 %v3970_v57, %v3969_v29  ;;  %v3190_v26 = vsub.f32 %v2792_v32, %v4045_v35  ;;  %v3231_v29 = vsel %vm317_vm2, %v3215_v4, 0.0 }
 0x3dd   : > { %v3892_v21 = vpop.f32.mrf.mxu0  ;;  %v3234_v39 = vsel %vm317_vm2, %v3217_v58, 0.0  ;;  %v3233_v31 = vadd.f32 %v3232_v59, %v3231_v29  ;;  %v3221_v51 = vmul.f32 %v6366_v27, %v3205_v34 }
 0x3de   : > { %v3972_v43 = vpop.f32.mrf.mxu1  ;;  %v2797_v36 = vadd.f32 %v3971_v49, %v3891_v11  ;;  %v3206_v2 = vmul.f32 %v3190_v26, %v3190_v26  ;;  %v3220_v49 = vmul.f32 %v6290_v45, %v3204_v3  ;;  %v4050_v26 = vld [vmem:[%s4207_s7 + $0x60] sm:$0xff] }
 0x3df   : > { %v3893_v18 = vpop.f32.mrf.mxu0  ;;  %v3242_v4 = vsel %vm317_vm2, %v3221_v51, 0.0  ;;  %v4052_v51 = vld [vmem:[%s4207_s7 + $0x70] sm:$0xff] }
 0x3e0   : > { %v3894_v1 = vadd.f32 %v3893_v18, %v3892_v21  ;;  %v3973_v33 = vpop.f32.mrf.mxu1  ;;  %2907 = vst.msk [vmem:[%s4212_s10 + $0x40] sm:$0xff] %vm317_vm2, %v2797_v36  ;;  %v3191_v11 = vsub.f32 %v2797_v36, %v4046_v53  ;;  %v4047_v21 = vld [vmem:[%s4207_s7 + $0x48] sm:$0xff]  ;;  %v3235_v18 = vadd.f32 %v3234_v39, %v3233_v31  ;;  %v3222_v12 = vmul.f32 %v6371_v40, %v3206_v2 }
 0x3e1   : > { %v3974_v17 = vadd.f32 %v3973_v33, %v3972_v43  ;;  %v4048_v33 = vld [vmem:[%s4207_s7 + $0x50] sm:$0xff] }
 0x3e2   : > { %v3244_v41 = vsel %vm317_vm2, %v3222_v12, 0.0 }
 0x3e3   : > { %v2802_v15 = vadd.f32 %v3974_v17, %v3894_v1  ;;  %v3895_v24 = vpop.f32.mrf.mxu0  ;;  %v3975_v16 = vpop.f32.mrf.mxu1  ;;  %v3207_v1 = vmul.f32 %v3191_v11, %v3191_v11  ;;  %v3237_v17 = vadd.f32 %v3236_v46, %v3235_v18 }
 0x3e5   : > { %2908 = vst.msk [vmem:[%s4212_s10 + $0x48] sm:$0xff] %vm317_vm2, %v2802_v15  ;;  %v3896_v5 = vpop.f32.mrf.mxu0  ;;  %v3976_v60 = vpop.f32.mrf.mxu1  ;;  %v3192_v43 = vsub.f32 %v2802_v15, %v4047_v21  ;;  %v3240_v15 = vsel %vm317_vm2, %v3220_v49, 0.0  ;;  %v3239_v61 = vadd.f32 %v3238_v9, %v3237_v17  ;;  %v3223_v58 = vmul.f32 %v6376_v48, %v3207_v1 }
 0x3e6   : > { %v3897_v23 = vadd.f32 %v3896_v5, %v3895_v24  ;;  %v3977_v8 = vadd.f32 %v3976_v60, %v3975_v16  ;;  %v4049_v16 = vld [vmem:[%s4207_s7 + $0x58] sm:$0xff] }
 0x3e7   : > { %v3208_v24 = vmul.f32 %v3192_v43, %v3192_v43  ;;  %v3241_v38 = vadd.f32 %v3240_v15, %v3239_v61  ;;  %v4053_v15 = vld [vmem:[%s4207_s7 + $0x78] sm:$0xff] }
 0x3e8   : > { %v2807_v44 = vadd.f32 %v3977_v8, %v3897_v23  ;;  %v3898_v42 = vpop.f32.mrf.mxu0  ;;  %v3978_v20 = vpop.f32.mrf.mxu1 }
 0x3e9   : > { %v3224_v8 = vmul.f32 %v6384_v0, %v3208_v24  ;;  %v3243_v48 = vadd.f32 %v3242_v4, %v3241_v38  ;;  %v3182_v38 = vld [vmem:[#allocation3] sm:$0x1] }
 0x3ea   : > { %2909 = vst.msk [vmem:[%s4212_s10 + $0x50] sm:$0xff] %vm317_vm2, %v2807_v44  ;;  %v3899_v32 = vpop.f32.mrf.mxu0  ;;  %v3979_v57 = vpop.f32.mrf.mxu1  ;;  %v3193_v56 = vsub.f32 %v2807_v44, %v4048_v33 }
 0x3eb   : > { %v3900_v28 = vadd.f32 %v3899_v32, %v3898_v42  ;;  %v3980_v7 = vadd.f32 %v3979_v57, %v3978_v20  ;;  %v3246_v42 = vsel %vm317_vm2, %v3223_v58, 0.0  ;;  %v3245_v34 = vadd.f32 %v3244_v41, %v3243_v48  ;;  %v4051_v57 = vld [vmem:[%s4207_s7 + $0x68] sm:$0xff] }
 0x3ec   : > { %v3901_v25 = vpop.f32.mrf.mxu0  ;;  %v3209_v40 = vmul.f32 %v3193_v56, %v3193_v56  ;;  %v3248_v11 = vsel %vm317_vm2, %v3224_v8, 0.0 }
 0x3ed   : > { %v2812_v36 = vadd.f32 %v3980_v7, %v3900_v28  ;;  %v3981_v30 = vpop.f32.mrf.mxu1  ;;  %v3247_v7 = vadd.f32 %v3246_v42, %v3245_v34 }
 0x3ee   : > { %v3902_v62 = vpop.f32.mrf.mxu0  ;;  %v3225_v20 = vmul.f32 %v6387_v10, %v3209_v40 }
 0x3ef   : > { %2910 = vst.msk [vmem:[%s4212_s10 + $0x58] sm:$0xff] %vm317_vm2, %v2812_v36  ;;  %v3903_v45 = vadd.f32 %v3902_v62, %v3901_v25  ;;  %v3982_v55 = vpop.f32.mrf.mxu1  ;;  %v3194_v6 = vsub.f32 %v2812_v36, %v4049_v16  ;;  %v3249_v18 = vadd.f32 %v3248_v11, %v3247_v7 }
 0x3f0   : > { %v3983_v13 = vadd.f32 %v3982_v55, %v3981_v30  ;;  %v3904_v27 = vpop.f32.mrf.mxu0  ;;  %v3250_v46 = vsel %vm317_vm2, %v3225_v20, 0.0 }
 0x3f1   : > { %v3984_v19 = vpop.f32.mrf.mxu1  ;;  %v3210_v35 = vmul.f32 %v3194_v6, %v3194_v6  ;;  %v3251_v56 = vadd.f32 %v3250_v46, %v3249_v18 }
 0x3f2   : > { %v2817_v5 = vadd.f32 %v3983_v13, %v3903_v45  ;;  %v3905_v60 = vpop.f32.mrf.mxu0 }
 0x3f3   : > { %v3906_v54 = vadd.f32 %v3905_v60, %v3904_v27  ;;  %v3985_v23 = vpop.f32.mrf.mxu1  ;;  %v3226_v32 = vmul.f32 %v6393_v63, %v3210_v35 }
 0x3f4   : > { %2911 = vst.msk [vmem:[%s4212_s10 + $0x60] sm:$0xff] %vm317_vm2, %v2817_v5  ;;  %v3195_v59 = vsub.f32 %v2817_v5, %v4050_v26  ;;  %v3986_v50 = vadd.f32 %v3985_v23, %v3984_v19  ;;  %v3907_v3 = vpop.f32.mrf.mxu0 }
 0x3f5   : > { %v3987_v44 = vpop.f32.mrf.mxu1  ;;  %v3252_v30 = vsel %vm317_vm2, %v3226_v32, 0.0 }
 0x3f6   : > { %v3211_v29 = vmul.f32 %v3195_v59, %v3195_v59  ;;  %v2822_v39 = vadd.f32 %v3986_v50, %v3906_v54  ;;  %v3908_v52 = vpop.f32.mrf.mxu0  ;;  %v3253_v12 = vadd.f32 %v3252_v30, %v3251_v56 }
 0x3f7   : > { %v3909_v0 = vadd.f32 %v3908_v52, %v3907_v3  ;;  %v3988_v53 = vpop.f32.mrf.mxu1 }
 0x3f8   : > { %2912 = vst.msk [vmem:[%s4212_s10 + $0x68] sm:$0xff] %vm317_vm2, %v2822_v39  ;;  %v3196_v31 = vsub.f32 %v2822_v39, %v4051_v57  ;;  %v3989_v2 = vadd.f32 %v3988_v53, %v3987_v44  ;;  %v3910_v28 = vpop.f32.mrf.mxu0  ;;  %v3227_v49 = vmul.f32 %v6422_v22, %v3211_v29 }
 0x3f9   : > { %v3990_v10 = vpop.f32.mrf.mxu1 }
 0x3fa   : > { %v3212_v21 = vmul.f32 %v3196_v31, %v3196_v31  ;;  %v2827_v43 = vadd.f32 %v3989_v2, %v3909_v0  ;;  %v3911_v25 = vpop.f32.mrf.mxu0  ;;  %v3254_v22 = vsel %vm317_vm2, %v3227_v49, 0.0 }
 0x3fb   : > { %v3912_v63 = vadd.f32 %v3911_v25, %v3910_v28  ;;  %v3991_v36 = vpop.f32.mrf.mxu1 }
 0x3fc   : > { %v3228_v9 = vmul.f32 %v6425_v37, %v3212_v21  ;;  %2913 = vst.msk [vmem:[%s4212_s10 + $0x70] sm:$0xff] %vm317_vm2, %v2827_v43  ;;  %v3197_v1 = vsub.f32 %v2827_v43, %v4052_v51  ;;  %v3992_v33 = vadd.f32 %v3991_v36, %v3990_v10  ;;  %v3255_v37 = vadd.f32 %v3254_v22, %v3253_v12 }
 0x3fe   : > { %v3213_v62 = vmul.f32 %v3197_v1, %v3197_v1  ;;  %v2832_v17 = vadd.f32 %v3992_v33, %v3912_v63  ;;  %v3256_v45 = vsel %vm317_vm2, %v3228_v9, 0.0 }
 0x3ff   : > { %v3257_v13 = vadd.f32 %v3256_v45, %v3255_v37 }
 0x400   : > { %v3229_v55 = vmul.f32 %v6502_v14, %v3213_v62  ;;  %2914 = vst.msk [vmem:[%s4212_s10 + $0x78] sm:$0xff] %vm317_vm2, %v2832_v17  ;;  %v3198_v24 = vsub.f32 %v2832_v17, %v4053_v15 }
 0x402   : > { %v3258_v16 = vsel %vm317_vm2, %v3229_v55, 0.0  ;;  %v3214_v6 = vmul.f32 %v3198_v24, %v3198_v24 }
 0x403   : > { %v3259_v61 = vadd.f32 %v3258_v16, %v3257_v13 }
 0x404   : > { %v3230_v27 = vmul.f32 %v6515_v47, %v3214_v6 }
 0x406   : > { %v3260_v19 = vsel %vm317_vm2, %v3230_v27, 0.0 }
 0x407   : > { %v3261_v4 = vadd.f32 %v3260_v19, %v3259_v61 }
 0x409   : > { %v3262_v58 = vrot.slane %v3261_v4, 4 }
 0x40b   : > { %v3263_v40 = vadd.f32 %v3262_v58, %v3261_v4 }
 0x40d   : > { %v3264_v5 = vrot.slane %v3263_v40, 2 }
 0x40f   : > { %v3265_v60 = vadd.f32 %v3264_v5, %v3263_v40 }
 0x411   : > { %v3266_v14 = vrot.slane %v3265_v60, 1 }
 0x413   : > { %v3267_v41 = vadd.f32 %v3266_v14, %v3265_v60  ;;  %3274 = sbr.rel (%p3696_p12) target bundleno = 1240 (0x4d8), region = 36 }
 0x415   : > { %v3268_v54 = vadd.f32 %v3267_v41, %v3182_v38 }
 0x417   : > { %3270 = vst.msk [vmem:[#allocation3] sm:$0x1] %vm3269_vm1, %v3268_v54 }
 0x418   : > { %v3275_v23 = vld [vmem:[#allocation2] sm:$0xf]  ;;  %v7096_v26 = vld [vmem:[#allocation23_spill] sm:$0xff]  ;;  %vm3309_vm2 = vcmask 1040384  }
 0x419   : > { %v3276_v47 = vmul.f32 0.001953125, %v3275_v23  ;;  %v3291_v59 = vsub.s32 0, %v7096_v26  ;;  %v3295_v3 = vsub.s32 1, %v7096_v26  ;;  %v3299_v48 = vsub.s32 2, %v7096_v26  ;;  %v7097_v18 = vld [vmem:[#allocation14_spill] sm:$0xff] }
 0x41a   : > { %v3303_v44 = vsub.s32 3, %v7096_v26  ;;  %vm3322_vm13 = vcmp.eq.s32.totalorder %v7097_v18, 0  ;;  %vm3324_vm10 = vcmp.eq.s32.totalorder %v7097_v18, 1 }
 0x41b   : > { %v3284_v8 = vadd.f32 1e-10, %v3276_v47 }
 0x41d   : > { %4054 = vlog2.f32 %v3284_v8 }
 0x41e   : > { %v3277_v2 = vld [vmem:[#allocation3] sm:$0x1] }
 0x41f   : > { %v3278_v28 = vsel %vm3269_vm1, %v3277_v2, 0.0 }
 0x42a   : > { %v4055_v35 = vpop.eup %4054 }
 0x42b   : > { %v3286_v50 = vmul.f32 0.6931472, %v4055_v35 }
 0x42d   : > { %v3287_v42 = vmul.f32 %v3286_v50, %v3276_v47 }
 0x42f   : > { %v3292_v20 = vrot.slane %v3287_v42, %v3291_v59  ;;  %v3296_v29 = vrot.slane %v3287_v42, %v3295_v3  ;;  %v3300_v39 = vrot.slane %v3287_v42, %v3299_v48  ;;  %v3304_v52 = vrot.slane %v3287_v42, %v3303_v44 }
 0x431   : > { %v3310_v34 = vsel %vm3309_vm2, %v3292_v20, 0.0  ;;  %v3311_v0 = vsel %vm3309_vm2, %v3296_v29, 0.0  ;;  %v3313_v53 = vsel %vm3309_vm2, %v3300_v39, 0.0  ;;  %v3315_v32 = vsel %vm3309_vm2, %v3304_v52, 0.0 }
 0x432   : > { %v3312_v11 = vadd.f32 %v3311_v0, %v3310_v34 }
 0x434   : > { %v3314_v57 = vadd.f32 %v3313_v53, %v3312_v11 }
 0x436   : > { %v3316_v31 = vadd.f32 %v3315_v32, %v3314_v57 }
 0x438   : > { %3317 = vadd.xlane.f32.xlu0 %v3316_v31 }
 0x43c   : > { %3279 = vadd.xlane.f32.xlu0 %v3278_v28 }
 0x4c1   : > { %v3318_v7 = vpop.xlane.xlu0 %3317 }
 0x4c2   : > { %v3319_v10 = vsub.f32 0.0, %v3318_v7 }
 0x4c4   : > { %v3320_v46 = vmul.f32 1.442695, %v3319_v10 }
 0x4c5   : > { %v3280_v49 = vpop.xlane.xlu0 %3279 }
 0x4c6   : > { %4056 = vpow2.f32 %v3320_v46  ;;  %v3281_v21 = vmul.f32 3.0517578e-05, %v3280_v49 }
 0x4c8   : > { %v3282_v43 = vmul.f32 0.25, %v3281_v21 }
 0x4ca   : > { %v3283_v25 = vadd.f32 %v3282_v43, %v3281_v21 }
 0x4cc   : > { %v3323_v30 = vsel %vm3322_vm13, %v3283_v25, 0.0 }
 0x4d3   : > { %v4057_v63 = vpop.eup %4056 }
 0x4d4   : > { %v3325_v36 = vsel %vm3324_vm10, %v4057_v63, 0.0 }
 0x4d5   : > { %v3326_v9 = vadd.f32 %v3325_v36, %v3323_v30 }
 0x4d7   : > { %3327 = vst [vmem:[%s6936_s4] sm:$0x1] %v3326_v9 }
 0x4d8 PF: > { %s3704_s9 = sshll.u32 %s4173_s19, 13  ;;  %s3352_s20 = sshll.u32 %s4214_s11, 4  ;;  %s6888_s20 = int_to_ptr.vmem [resolvable:$true] %s3352_s20 }
 0x4d9   : > { %s6885_s14 = scalar_lea.hbm %s6935_s3, %s3704_s9  ;;  %s6892_s22 = scalar_lea.sflag [#allocation5], %s192_s27 }
 0x4da   : > { %s4058_s23 = scalar_lea.vmem %s6888_s20, 8192  ;;  %s4124_s19 = smov [#allocation4]  }
 0x4db   : > { %p4059_p13 = scmp.ne.s32.totalorder %s6888_s20, %s4058_s23  ;;  %s4062_s28 = sshll.u32 %s4124_s19, 4  ;;  %s4063_s28 = int_to_ptr.vmem [resolvable:$false] %s4062_s28 }
 0x4dc   : > { %s4064_s29 = scalar_lea.vmem %s4063_s28, 16384  ;;  %p4065_p2 = scmp.lt.s32.totalorder %s6888_s20, %s4063_s28 }
 0x4dd   : > { %p4060_p0 = pnand %p4059_p13, %p4190_p5  ;;  %p4066_p3 = scmp.lt.s32.totalorder %s4064_s29, %s4058_s23 }
 0x4df   : > { %p4061_p1 = pneg %p4060_p0  ;;  %p4067_p4 = por %p4066_p3, %p4065_p2 }
 0x4e1   : > { %p4068_p7 = pnand %p4067_p4, %p4061_p1 }
 0x4e3   : > { %4071 = shalt.err (!%p4068_p7)
}
 0x4e4   : > { %s4072_s27 = scalar_lea.hbm %s6885_s14, 8192  ;;  %s4076_s5 = scalar_lea.hbm %s6935_s3, 32768 }
 0x4e5   : > { %p4073_p8 = scmp.ne.s32.totalorder %s6885_s14, %s4072_s27  ;;  %p4077_p11 = scmp.lt.s32.totalorder %s6885_s14, %s6935_s3 }
 0x4e6   : > { %p4078_p12 = scmp.lt.s32.totalorder %s4076_s5, %s4072_s27 }
 0x4e7   : > { %p4074_p9 = pnand %p4073_p8, %p4190_p5 }
 0x4e8   : > { %p4079_p13 = por %p4078_p12, %p4077_p11 }
 0x4e9   : > { %p4075_p10 = pneg %p4074_p9 }
 0x4eb   : > { %p4080_p0 = pnand %p4079_p13, %p4075_p10 }
 0x4ed   : > { %4083 = shalt.err (!%p4080_p0)
}
 0x4ee   : > { %s4125_s7 = smov 512   ;;  %s4126_s10 = smov 32  }
 0x4ef   : > { %3993 = dma.vmem_to_hbm [thread:$0]  (%p4190_p5), %s6888_s20, 8192, %s6885_s14, %s6892_s22, %s4125_s7, %s4125_s7, %s4126_s10  }
 0x4f0 PF: > { %p3999_p1 = scmp.ge.s32.totalorder %s4118_s18, 2  ;;  %s3381_s9 = sand.u32 1, %s4106_s15  }
 0x4f1   : > { %s3382_s12 = scalar_lea.sflag [#allocation5], %s3381_s9 }
 0x4f2   : > { %p3996_p2 = pnand %p3999_p1, %p4194_p6 }
 0x4f4   : > { %p3997_p3 = pneg %p3996_p2 }
 0x4f6   : > { %4101 = dma.done.wait (%p3997_p3), %s3382_s12, 8192  }
 0x4f7   : > { %4103 = vsyncadd (%p3997_p3), %s3382_s12, 4294959104  ;;  %p15_p4 = scmp.ge.s32.totalorder %s4177_s21, 6   ;;  %s7098_s15 = smov %s4110_s16 }
 0x4f8   : > { %s7099_s16 = smov %s4114_s17  ;;  %s7100_s17 = smov %s4188_s24 }
 0x4f9   : > { %s7101_s18 = smov %s4177_s21  ;;  %17 = sbr.rel (!%p15_p4) target bundleno = 3 (0x3), region = 91 }
 0x4fe   :  { %3387 = vsyncpa [#allocation5], 1 }
 0x4ff   :  { %3389 = vsyncpa [#allocation5 + $0x1], 1 }

</bundles_post_ra>
